<compile_context>
chip_gen: v7x
topology: tpu7x:2x2x1
jax: 0.10.0
libtpu: 0.0.40
codegen_flags: <defaults>
</compile_context>

<pallas_src>
import math
from functools import partial

import numpy as np
import jax
import jax.numpy as jnp
from jax.experimental import pallas as pl
from jax.experimental.pallas import tpu as pltpu

LANE = 128  # TPU lane width; all channel dims are padded to a multiple of this.


def _round_up(x, m):
    return ((x + m - 1) // m) * m


def _pick_tm(M, row_bytes, budget_bytes=8 << 20):
    """Largest sublane-aligned row tile that divides M and fits a VMEM budget."""
    cap = max(8, budget_bytes // max(row_bytes, 1))
    for t in (4096, 2048, 1024, 512, 256, 128, 64, 32, 16, 8):
        if t <= cap and M % t == 0:
            return t
    return M  # whole array as a single block (legal: equals full dim)


# ---------------------------------------------------------------------------
# In-kernel helpers
# ---------------------------------------------------------------------------
def _masked_layernorm(x, c_real, eps=1e-5):
    """LayerNorm (no affine) over the first `c_real` lanes of the last dim.

    Equivalent to F.layer_norm(x[..., :c_real], [c_real]); pad lanes -> 0.
    `x` must be float32 and at least 2-D.
    """
    lane = jax.lax.broadcasted_iota(jnp.int32, x.shape, x.ndim - 1)
    mask = (lane < c_real).astype(jnp.float32)
    inv_c = 1.0 / float(c_real)
    mean = jnp.sum(x * mask, axis=-1, keepdims=True) * inv_c
    xc = (x - mean) * mask
    var = jnp.sum(xc * xc, axis=-1, keepdims=True) * inv_c
    return xc * jax.lax.rsqrt(var + eps)


# ---------------------------------------------------------------------------
# Pallas kernels
# ---------------------------------------------------------------------------
def _linear_ln_kernel(c_out, act, x_ref, w_ref, b_ref, o_ref):
    """One row tile: y = act(x @ w + b); out = LayerNorm(y[:, :c_out]); pads -> 0."""
    x = x_ref[...].astype(jnp.float32)
    y = jnp.dot(x, w_ref[...], preferred_element_type=jnp.float32) + b_ref[...]
    if act == "gelu":
        # TODO(synk): PyTorch nn.GELU defaults to exact erf GELU; tanh approximation
        # is used here for guaranteed Mosaic lowering of this synthetic backbone.
        y = jax.nn.gelu(y)
    o_ref[...] = _masked_layernorm(y, c_out).astype(o_ref.dtype)


def _stage_block_kernel(c, x_ref, w1_ref, b1_ref, w2_ref, b2_ref, o_ref):
    """Fused pre-LN -> fc1 (gelu) -> fc2 -> residual add on one row tile."""
    x = x_ref[...].astype(jnp.float32)
    h = _masked_layernorm(x, c)
    h = jnp.dot(h, w1_ref[...], preferred_element_type=jnp.float32) + b1_ref[...]
    h = jax.nn.gelu(h)  # TODO(synk): tanh approx (see note above)
    h = jnp.dot(h, w2_ref[...], preferred_element_type=jnp.float32) + b2_ref[...]
    o_ref[...] = (x + h).astype(o_ref.dtype)  # pad lanes stay zero


def _norm_pool_kernel(c, hw, sizes, post_norm, x_ref, *o_refs):
    """Fused (optional) post-norm LayerNorm + adaptive max pool, one batch element.

    x_ref block: (1, hw*hw, Cpad) tokens, row-major spatial order.
    One output per requested size: s == hw -> the (normalized) tokens themselves,
    otherwise the adaptive max pool to (1, s*s, Cpad).
    """
    x = x_ref[0].astype(jnp.float32)  # (hw*hw, Cpad)
    if post_norm:
        x = _masked_layernorm(x, c)  # F.layer_norm(raw, [channel])
    cpad = x.shape[-1]

    for o_ref, s in zip(o_refs, sizes):
        if s == hw:
            o_ref[...] = x[None].astype(o_ref.dtype)
        elif hw % s == 0:
            # Reshape-based pooling: equivalent to the PyTorch adaptive windows when
            # hw % s == 0.  Implemented as lane-dense elementwise maxima over static
            # views (no cross-sublane reductions, no concatenates).
            k = hw // s
            a = x.reshape(s, k, hw, cpad)      # a[io, ii, j, c] = grid[io*k+ii, j, c]
            r = a[:, 0]
            for ii in range(1, k):
                r = jnp.maximum(r, a[:, ii])   # (s, hw, cpad): pooled over rows
            b4 = r.reshape(s, s, k, cpad)      # b4[io, oj, jj, c] = r[io, oj*k+jj, c]
            p = b4[:, :, 0]
            for jj in range(1, k):
                p = jnp.maximum(p, b4[:, :, jj])  # (s, s, cpad): pooled over cols
            o_ref[...] = p.reshape(1, s * s, cpad).astype(o_ref.dtype)
        else:
            # TODO(synk): non-divisible fallback keeps exact PyTorch adaptive window
            # boundaries (overlapping windows); slower path, unused in the demo.
            grid2 = x.reshape(hw, hw, cpad)
            rows = []
            for oi in range(s):
                sh = (oi * hw) // s
                eh = -((-(oi + 1) * hw) // s)
                for oj in range(s):
                    sw = (oj * hw) // s
                    ew = -((-(oj + 1) * hw) // s)
                    win = grid2[sh:eh, sw:ew, :].reshape(-1, cpad)
                    rows.append(jnp.max(win, axis=0, keepdims=True))
            o_ref[...] = jnp.concatenate(rows, axis=0)[None].astype(o_ref.dtype)


# ---------------------------------------------------------------------------
# Pallas wrappers
# ---------------------------------------------------------------------------
def pallas_linear_ln(x2d, w, b, c_out, act=None):
    """x2d: (M, K) -> LayerNorm_{c_out}(act(x2d @ w + b)), output (M, Npad)."""
    M, K = x2d.shape
    Kw, N = w.shape
    assert K == Kw and N % LANE == 0
    tm = _pick_tm(M, (K + 2 * N) * 4)
    return pl.pallas_call(
        partial(_linear_ln_kernel, c_out, act),
        out_shape=jax.ShapeDtypeStruct((M, N), x2d.dtype),
        grid=(M // tm,),
        in_specs=[
            pl.BlockSpec((tm, K), lambda i: (i, 0)),
            pl.BlockSpec((K, N), lambda i: (0, 0)),   # weight resident across grid
            pl.BlockSpec((1, N), lambda i: (0, 0)),
        ],
        out_specs=pl.BlockSpec((tm, N), lambda i: (i, 0)),
        compiler_params=pltpu.CompilerParams(dimension_semantics=("parallel",)),
    )(x2d, w, b.reshape(1, N))


def pallas_stage_block(tokens2d, w1, b1, w2, b2, c):
    """Fused LN -> MLP -> residual over a flattened (B*S, Cpad) token matrix."""
    M, Cp = tokens2d.shape
    Hp = w1.shape[1]
    assert Cp % LANE == 0 and Hp % LANE == 0
    tm = _pick_tm(M, (2 * Cp + Hp) * 4)
    return pl.pallas_call(
        partial(_stage_block_kernel, c),
        out_shape=jax.ShapeDtypeStruct((M, Cp), tokens2d.dtype),
        grid=(M // tm,),
        in_specs=[
            pl.BlockSpec((tm, Cp), lambda i: (i, 0)),
            pl.BlockSpec((Cp, Hp), lambda i: (0, 0)),
            pl.BlockSpec((1, Hp), lambda i: (0, 0)),
            pl.BlockSpec((Hp, Cp), lambda i: (0, 0)),
            pl.BlockSpec((1, Cp), lambda i: (0, 0)),
        ],
        out_specs=pl.BlockSpec((tm, Cp), lambda i: (i, 0)),
        compiler_params=pltpu.CompilerParams(dimension_semantics=("parallel",)),
    )(tokens2d, w1, b1.reshape(1, Hp), w2, b2.reshape(1, Cp))


def pallas_norm_and_pool(tokens, c, sizes, post_norm):
    """tokens: (B, hw*hw, Cpad) -> one (B, s*s, Cpad) array per size in `sizes`."""
    B, sq, Cp = tokens.shape
    hw = int(math.isqrt(sq))
    assert hw * hw == sq and Cp % LANE == 0
    out_shapes = tuple(jax.ShapeDtypeStruct((B, s * s, Cp), tokens.dtype) for s in sizes)
    out_specs = tuple(pl.BlockSpec((1, s * s, Cp), lambda b: (b, 0, 0)) for s in sizes)
    outs = pl.pallas_call(
        partial(_norm_pool_kernel, c, hw, tuple(sizes), post_norm),
        out_shape=out_shapes,
        grid=(B,),
        in_specs=[pl.BlockSpec((1, sq, Cp), lambda b: (b, 0, 0))],
        out_specs=out_specs,
        compiler_params=pltpu.CompilerParams(dimension_semantics=("parallel",)),
    )(tokens)
    if not isinstance(outs, (tuple, list)):
        outs = (outs,)
    return list(outs)


# ---------------------------------------------------------------------------
# Synthetic Swin-like backbone (stand-in for build_swin + pretrained weights)
# ---------------------------------------------------------------------------
# TODO(synk): the real pretrained Swin (window attention, relative position bias,
# checkpoint load) is external; this deterministic pyramid preserves the (B, sq, C)
# hidden-layer shapes expected by SWTBackbone.forward.

def init_backbone_params(key, in_ch, patch, embed_dim, num_stages, mlp_ratio=2):
    """Deterministic synthetic weights, pre-padded to 128-lane channel blocks."""
    params = {}
    k = key

    def nrm(kk, shape, scale):
        return scale * jax.random.normal(kk, shape, dtype=jnp.float32)

    def pad2(w, rows, cols):
        return jnp.pad(w, ((0, rows - w.shape[0]), (0, cols - w.shape[1])))

    kin = patch * patch * in_ch
    dpad = _round_up(embed_dim, LANE)
    k, sub = jax.random.split(k)
    params["embed_w"] = pad2(nrm(sub, (kin, embed_dim), 1.0 / math.sqrt(kin)), kin, dpad)
    params["embed_b"] = jnp.zeros((dpad,), jnp.float32)

    dim = embed_dim
    for s in range(num_stages):
        hid = mlp_ratio * dim
        cpad, hpad = _round_up(dim, LANE), _round_up(hid, LANE)
        k, k1, k2 = jax.random.split(k, 3)
        params[f"s{s}_fc1_w"] = pad2(nrm(k1, (dim, hid), 1.0 / math.sqrt(dim)), cpad, hpad)
        params[f"s{s}_fc1_b"] = jnp.zeros((hpad,), jnp.float32)
        params[f"s{s}_fc2_w"] = pad2(nrm(k2, (hid, dim), 1.0 / math.sqrt(hid)), hpad, cpad)
        params[f"s{s}_fc2_b"] = jnp.zeros((cpad,), jnp.float32)
        if s + 1 < num_stages:
            k, km = jax.random.split(k)
            nxt = 2 * dim
            npad = _round_up(nxt, LANE)
            # Pad the merge weight per 2x2-neighbour block so rows line up with the
            # channel-padded merged-token layout [t00_pad | t01_pad | t10_pad | t11_pad].
            w = nrm(km, (4 * dim, nxt), 1.0 / math.sqrt(4 * dim)).reshape(4, dim, nxt)
            w = jnp.pad(w, ((0, 0), (0, cpad - dim), (0, npad - nxt)))
            params[f"s{s}_merge_w"] = w.reshape(4 * cpad, npad)
            params[f"s{s}_merge_b"] = jnp.zeros((npad,), jnp.float32)
            dim = nxt
    return params


def forward_features(params, x_nchw, patch, embed_dim, num_stages):
    """Returns (pooled, hidden_layers); each hidden layer is ((B, sq, Cpad), C)."""
    B, Cin, H, W = x_nchw.shape
    hw = H // patch
    # NCHW -> non-overlapping patches (B*hw*hw, patch*patch*Cin)
    # TODO(synk): the patchify and the 2x2 merge gather below are wrapper-side jnp
    # ops; they could be folded into the kernels' index_maps with strided BlockSpecs.
    x = jnp.transpose(x_nchw, (0, 2, 3, 1))
    x = x.reshape(B, hw, patch, hw, patch, Cin)
    x = jnp.transpose(x, (0, 1, 3, 2, 4, 5)).reshape(B * hw * hw, patch * patch * Cin)

    dim = embed_dim
    n = hw * hw
    tokens = pallas_linear_ln(x, params["embed_w"], params["embed_b"], dim)  # (B*n, Cpad)

    hidden_layers = []
    for s in range(num_stages):
        cpad = _round_up(dim, LANE)
        tokens = pallas_stage_block(tokens, params[f"s{s}_fc1_w"], params[f"s{s}_fc1_b"],
                                    params[f"s{s}_fc2_w"], params[f"s{s}_fc2_b"], dim)
        hidden_layers.append((tokens.reshape(B, n, cpad), dim))

        if s + 1 < num_stages:
            g = int(math.isqrt(n))
            t = tokens.reshape(B, g // 2, 2, g // 2, 2, cpad)
            t = jnp.transpose(t, (0, 1, 3, 2, 4, 5)).reshape(B * (g // 2) ** 2, 4 * cpad)
            nxt = 2 * dim
            tokens = pallas_linear_ln(t, params[f"s{s}_merge_w"], params[f"s{s}_merge_b"], nxt)
            dim, n = nxt, (g // 2) ** 2

    pooled = jnp.mean(hidden_layers[-1][0][..., :dim], axis=1)  # glue: global average
    return pooled, hidden_layers


# ---------------------------------------------------------------------------
# SWTBackbone.forward
# ---------------------------------------------------------------------------
def swt_backbone_forward(params, x_nchw, *, patch, embed_dim, num_stages,
                         last_nblocks, maxpool_sizes, post_norm):
    _, hidden_layers = forward_features(params, x_nchw, patch, embed_dim, num_stages)
    intermediate_output = hidden_layers[-last_nblocks:]
    _sizes = maxpool_sizes[-last_nblocks:]

    output_list = []
    for i, (tokens_p, channel) in enumerate(intermediate_output):
        # One fused kernel: post_norm LayerNorm (if any) + all pool sizes, no HBM
        # round-trip of the normalized tokens between norm and pooling.
        outs_p = pallas_norm_and_pool(tokens_p, channel, _sizes[i], post_norm)
        # Strip channel padding back to the logical (B, s*s, C) PyTorch shapes.
        output_list.append([o[..., :channel] for o in outs_p])
    return output_list


# ---------------------------------------------------------------------------
# main
# ---------------------------------------------------------------------------
if __name__ == "__main__":
    key = jax.random.PRNGKey(0)
    kx, kp = jax.random.split(key)

    # small shapes consistent with the module's NCHW image input
    B, Cin, H, W = 2, 4, 16, 16
    patch, embed_dim, num_stages = 2, 32, 2
    last_nblocks = 2
    maxpool_sizes = [[8, 4], [4, 2]]   # per hidden layer; 8 and 4 equal the layer's hw
    post_norm = True

    x = jax.random.normal(kx, (B, Cin, H, W), dtype=jnp.float32)
    params = init_backbone_params(kp, Cin, patch, embed_dim, num_stages)

    fwd = jax.jit(partial(swt_backbone_forward, patch=patch, embed_dim=embed_dim,
                          num_stages=num_stages, last_nblocks=last_nblocks,
                          maxpool_sizes=maxpool_sizes, post_norm=post_norm))
    outputs = jax.block_until_ready(fwd(params, x))

    # expected shapes: [[(2,64,32),(2,16,32)], [(2,16,64),(2,4,64)]]
    assert outputs[0][0].shape == (B, 64, 32)
    assert outputs[0][1].shape == (B, 16, 32)
    assert outputs[1][0].shape == (B, 16, 64)
    assert outputs[1][1].shape == (B, 4, 64)

    # --- sanity checks vs plain numpy references ---------------------------------
    _, hidden = forward_features(params, x, patch, embed_dim, num_stages)
    tok = np.asarray(hidden[-2][0])[..., :embed_dim].astype(np.float64)  # (B, 64, 32)

    # post_norm LayerNorm (F.layer_norm over channel, no affine)
    mu = tok.mean(-1, keepdims=True)
    var = tok.var(-1, keepdims=True)
    ref_norm = (tok - mu) / np.sqrt(var + 1e-5)
    got_norm = np.asarray(outputs[0][0])
    assert np.allclose(got_norm, ref_norm, rtol=1e-4, atol=1e-4), "post-norm mismatch"

    # adaptive max pool 8 -> 4 (divisible case == reshape max over 2x2 windows)
    hw, s = 8, 4
    ref_pool = (ref_norm.reshape(B, s, hw // s, s, hw // s, embed_dim)
                .max(axis=(2, 4)).reshape(B, s * s, embed_dim))
    got_pool = np.asarray(outputs[0][1])
    assert np.allclose(got_pool, ref_pool, rtol=1e-4, atol=1e-4), "adaptive max pool mismatch"

    print("KERNEL_OK")
</pallas_src>

<mosaic_0001>
module attributes {stable_mosaic.version = 11 : i64} {
  func.func @_stage_block_kernel(%arg0: i32, %arg1: memref<128x128xf32, #tpu.memory_space<vmem>>, %arg2: memref<128x128xf32, #tpu.memory_space<vmem>>, %arg3: memref<1x128xf32, #tpu.memory_space<vmem>>, %arg4: memref<128x128xf32, #tpu.memory_space<vmem>>, %arg5: memref<1x128xf32, #tpu.memory_space<vmem>>, %arg6: memref<128x128xf32, #tpu.memory_space<vmem>>) attributes {dimension_semantics = [#tpu.dimension_semantics<parallel>], iteration_bounds = array<i64: 1>, scalar_prefetch = 0 : i64, scratch_operands = 0 : i64, tpu.core_type = #tpu.core_type<tc>, window_params = [{transform_indices = @transform_0, window_bounds = array<i64: 128, 128>}, {pipeline_mode = #tpu.pipeline_mode<synchronous>, transform_indices = @transform_1, window_bounds = array<i64: 128, 128>}, {pipeline_mode = #tpu.pipeline_mode<synchronous>, transform_indices = @transform_2, window_bounds = array<i64: 1, 128>}, {pipeline_mode = #tpu.pipeline_mode<synchronous>, transform_indices = @transform_3, window_bounds = array<i64: 128, 128>}, {pipeline_mode = #tpu.pipeline_mode<synchronous>, transform_indices = @transform_4, window_bounds = array<i64: 1, 128>}, {transform_indices = @transform_5, window_bounds = array<i64: 128, 128>}]} {
    %c0 = arith.constant 0 : index
    %c0_0 = arith.constant 0 : index
    %0 = vector.load %arg1[%c0, %c0_0] : memref<128x128xf32, #tpu.memory_space<vmem>>, vector<128x128xf32>
    %1 = tpu.iota {dimensions = array<i32: 1>} : vector<128x128xi32>
    %c32_i32 = arith.constant 32 : i32
    %2 = vector.broadcast %c32_i32 : i32 to vector<128x128xi32>
    %3 = arith.cmpi slt, %1, %2 : vector<128x128xi32>
    %4 = arith.extui %3 : vector<128x128xi1> to vector<128x128xi32>
    %5 = arith.sitofp %4 : vector<128x128xi32> to vector<128x128xf32>
    %6 = arith.mulf %0, %5 : vector<128x128xf32>
    %cst = arith.constant dense<0.000000e+00> : vector<128xf32>
    %7 = vector.multi_reduction <add>, %6, %cst [1] : vector<128x128xf32> to vector<128xf32>
    %8 = vector.shape_cast %7 : vector<128xf32> to vector<128x1xf32>
    %cst_1 = arith.constant 3.125000e-02 : f32
    %9 = vector.broadcast %cst_1 : f32 to vector<128x1xf32>
    %10 = arith.mulf %8, %9 : vector<128x1xf32>
    %11 = vector.broadcast %10 : vector<128x1xf32> to vector<128x128xf32>
    %12 = arith.subf %0, %11 : vector<128x128xf32>
    %13 = arith.mulf %12, %5 : vector<128x128xf32>
    %14 = arith.mulf %13, %13 : vector<128x128xf32>
    %cst_2 = arith.constant dense<0.000000e+00> : vector<128xf32>
    %15 = vector.multi_reduction <add>, %14, %cst_2 [1] : vector<128x128xf32> to vector<128xf32>
    %16 = vector.shape_cast %15 : vector<128xf32> to vector<128x1xf32>
    %cst_3 = arith.constant 3.125000e-02 : f32
    %17 = vector.broadcast %cst_3 : f32 to vector<128x1xf32>
    %18 = arith.mulf %16, %17 : vector<128x1xf32>
    %cst_4 = arith.constant 9.99999974E-6 : f32
    %19 = vector.broadcast %cst_4 : f32 to vector<128x1xf32>
    %20 = arith.addf %18, %19 : vector<128x1xf32>
    %21 = math.rsqrt %20 : vector<128x1xf32>
    %22 = vector.broadcast %21 : vector<128x1xf32> to vector<128x128xf32>
    %23 = arith.mulf %13, %22 : vector<128x128xf32>
    %c0_5 = arith.constant 0 : index
    %c0_6 = arith.constant 0 : index
    %24 = vector.load %arg2[%c0_5, %c0_6] : memref<128x128xf32, #tpu.memory_space<vmem>>, vector<128x128xf32>
    %cst_7 = arith.constant dense<0.000000e+00> : vector<128x128xf32>
    %25 = tpu.matmul %23, %24, %cst_7 {dimension_numbers = #tpu.dot_dimension_numbers<[1], [0], [0], [1], [0, 0, 1, 1], [], []>} : vector<128x128xf32>, vector<128x128xf32>, vector<128x128xf32> -> vector<128x128xf32>
    %c0_8 = arith.constant 0 : index
    %c0_9 = arith.constant 0 : index
    %26 = vector.load %arg3[%c0_8, %c0_9] : memref<1x128xf32, #tpu.memory_space<vmem>>, vector<1x128xf32>
    %27 = vector.broadcast %26 : vector<1x128xf32> to vector<128x128xf32>
    %28 = arith.addf %25, %27 : vector<128x128xf32>
    %29 = arith.mulf %28, %28 : vector<128x128xf32>
    %30 = arith.mulf %28, %29 : vector<128x128xf32>
    %cst_10 = arith.constant 4.471500e-02 : f32
    %31 = vector.broadcast %cst_10 : f32 to vector<128x128xf32>
    %32 = arith.mulf %31, %30 : vector<128x128xf32>
    %33 = arith.addf %28, %32 : vector<128x128xf32>
    %cst_11 = arith.constant 0.797884583 : f32
    %34 = vector.broadcast %cst_11 : f32 to vector<128x128xf32>
    %35 = arith.mulf %34, %33 : vector<128x128xf32>
    %36 = math.tanh %35 : vector<128x128xf32>
    %cst_12 = arith.constant 1.000000e+00 : f32
    %37 = vector.broadcast %cst_12 : f32 to vector<128x128xf32>
    %38 = arith.addf %37, %36 : vector<128x128xf32>
    %cst_13 = arith.constant 5.000000e-01 : f32
    %39 = vector.broadcast %cst_13 : f32 to vector<128x128xf32>
    %40 = arith.mulf %39, %38 : vector<128x128xf32>
    %41 = arith.mulf %28, %40 : vector<128x128xf32>
    %c0_14 = arith.constant 0 : index
    %c0_15 = arith.constant 0 : index
    %42 = vector.load %arg4[%c0_14, %c0_15] : memref<128x128xf32, #tpu.memory_space<vmem>>, vector<128x128xf32>
    %cst_16 = arith.constant dense<0.000000e+00> : vector<128x128xf32>
    %43 = tpu.matmul %41, %42, %cst_16 {dimension_numbers = #tpu.dot_dimension_numbers<[1], [0], [0], [1], [0, 0, 1, 1], [], []>} : vector<128x128xf32>, vector<128x128xf32>, vector<128x128xf32> -> vector<128x128xf32>
    %c0_17 = arith.constant 0 : index
    %c0_18 = arith.constant 0 : index
    %44 = vector.load %arg5[%c0_17, %c0_18] : memref<1x128xf32, #tpu.memory_space<vmem>>, vector<1x128xf32>
    %45 = vector.broadcast %44 : vector<1x128xf32> to vector<128x128xf32>
    %46 = arith.addf %43, %45 : vector<128x128xf32>
    %47 = arith.addf %0, %46 : vector<128x128xf32>
    %c0_19 = arith.constant 0 : index
    %c0_20 = arith.constant 0 : index
    %48 = vector.load %arg6[%c0_19, %c0_20] : memref<128x128xf32, #tpu.memory_space<vmem>>, vector<128x128xf32>
    tpu.vector_store %arg6[%c0_19, %c0_20], %47 {strides = array<i32>} : memref<128x128xf32, #tpu.memory_space<vmem>>, vector<128x128xf32>,
    return
  }
  func.func @transform_0(%arg0: i32) -> (i32, i32) {
    %c0_i32 = arith.constant 0 : i32
    %c0_i32_0 = arith.constant 0 : i32
    return %arg0, %c0_i32 : i32, i32
  }
  func.func @transform_1(%arg0: i32) -> (i32, i32) {
    %c0_i32 = arith.constant 0 : i32
    %c0_i32_0 = arith.constant 0 : i32
    %c0_i32_1 = arith.constant 0 : i32
    return %c0_i32, %c0_i32_0 : i32, i32
  }
  func.func @transform_2(%arg0: i32) -> (i32, i32) {
    %c0_i32 = arith.constant 0 : i32
    %c0_i32_0 = arith.constant 0 : i32
    %c0_i32_1 = arith.constant 0 : i32
    return %c0_i32, %c0_i32_0 : i32, i32
  }
  func.func @transform_3(%arg0: i32) -> (i32, i32) {
    %c0_i32 = arith.constant 0 : i32
    %c0_i32_0 = arith.constant 0 : i32
    %c0_i32_1 = arith.constant 0 : i32
    return %c0_i32, %c0_i32_0 : i32, i32
  }
  func.func @transform_4(%arg0: i32) -> (i32, i32) {
    %c0_i32 = arith.constant 0 : i32
    %c0_i32_0 = arith.constant 0 : i32
    %c0_i32_1 = arith.constant 0 : i32
    return %c0_i32, %c0_i32_0 : i32, i32
  }
  func.func @transform_5(%arg0: i32) -> (i32, i32) {
    %c0_i32 = arith.constant 0 : i32
    %c0_i32_0 = arith.constant 0 : i32
    return %arg0, %c0_i32 : i32, i32
  }
}

module attributes {stable_mosaic.version = 11 : i64} {
  func.func @_linear_ln_kernel(%arg0: i32, %arg1: memref<128x16xf32, #tpu.memory_space<vmem>>, %arg2: memref<16x128xf32, #tpu.memory_space<vmem>>, %arg3: memref<1x128xf32, #tpu.memory_space<vmem>>, %arg4: memref<128x128xf32, #tpu.memory_space<vmem>>) attributes {dimension_semantics = [#tpu.dimension_semantics<parallel>], iteration_bounds = array<i64: 1>, scalar_prefetch = 0 : i64, scratch_operands = 0 : i64, tpu.core_type = #tpu.core_type<tc>, window_params = [{transform_indices = @transform_0, window_bounds = array<i64: 128, 16>}, {pipeline_mode = #tpu.pipeline_mode<synchronous>, transform_indices = @transform_1, window_bounds = array<i64: 16, 128>}, {pipeline_mode = #tpu.pipeline_mode<synchronous>, transform_indices = @transform_2, window_bounds = array<i64: 1, 128>}, {transform_indices = @transform_3, window_bounds = array<i64: 128, 128>}]} {
    %c0 = arith.constant 0 : index
    %c0_0 = arith.constant 0 : index
    %0 = vector.load %arg1[%c0, %c0_0] : memref<128x16xf32, #tpu.memory_space<vmem>>, vector<128x16xf32>
    %c0_1 = arith.constant 0 : index
    %c0_2 = arith.constant 0 : index
    %1 = vector.load %arg2[%c0_1, %c0_2] : memref<16x128xf32, #tpu.memory_space<vmem>>, vector<16x128xf32>
    %cst = arith.constant dense<0.000000e+00> : vector<128x128xf32>
    %2 = tpu.matmul %0, %1, %cst {dimension_numbers = #tpu.dot_dimension_numbers<[1], [0], [0], [1], [0, 0, 1, 1], [], []>} : vector<128x16xf32>, vector<16x128xf32>, vector<128x128xf32> -> vector<128x128xf32>
    %c0_3 = arith.constant 0 : index
    %c0_4 = arith.constant 0 : index
    %3 = vector.load %arg3[%c0_3, %c0_4] : memref<1x128xf32, #tpu.memory_space<vmem>>, vector<1x128xf32>
    %4 = vector.broadcast %3 : vector<1x128xf32> to vector<128x128xf32>
    %5 = arith.addf %2, %4 : vector<128x128xf32>
    %6 = tpu.iota {dimensions = array<i32: 1>} : vector<128x128xi32>
    %c32_i32 = arith.constant 32 : i32
    %7 = vector.broadcast %c32_i32 : i32 to vector<128x128xi32>
    %8 = arith.cmpi slt, %6, %7 : vector<128x128xi32>
    %9 = arith.extui %8 : vector<128x128xi1> to vector<128x128xi32>
    %10 = arith.sitofp %9 : vector<128x128xi32> to vector<128x128xf32>
    %11 = arith.mulf %5, %10 : vector<128x128xf32>
    %cst_5 = arith.constant dense<0.000000e+00> : vector<128xf32>
    %12 = vector.multi_reduction <add>, %11, %cst_5 [1] : vector<128x128xf32> to vector<128xf32>
    %13 = vector.shape_cast %12 : vector<128xf32> to vector<128x1xf32>
    %cst_6 = arith.constant 3.125000e-02 : f32
    %14 = vector.broadcast %cst_6 : f32 to vector<128x1xf32>
    %15 = arith.mulf %13, %14 : vector<128x1xf32>
    %16 = vector.broadcast %15 : vector<128x1xf32> to vector<128x128xf32>
    %17 = arith.subf %5, %16 : vector<128x128xf32>
    %18 = arith.mulf %17, %10 : vector<128x128xf32>
    %19 = arith.mulf %18, %18 : vector<128x128xf32>
    %cst_7 = arith.constant dense<0.000000e+00> : vector<128xf32>
    %20 = vector.multi_reduction <add>, %19, %cst_7 [1] : vector<128x128xf32> to vector<128xf32>
    %21 = vector.shape_cast %20 : vector<128xf32> to vector<128x1xf32>
    %cst_8 = arith.constant 3.125000e-02 : f32
    %22 = vector.broadcast %cst_8 : f32 to vector<128x1xf32>
    %23 = arith.mulf %21, %22 : vector<128x1xf32>
    %cst_9 = arith.constant 9.99999974E-6 : f32
    %24 = vector.broadcast %cst_9 : f32 to vector<128x1xf32>
    %25 = arith.addf %23, %24 : vector<128x1xf32>
    %26 = math.rsqrt %25 : vector<128x1xf32>
    %27 = vector.broadcast %26 : vector<128x1xf32> to vector<128x128xf32>
    %28 = arith.mulf %18, %27 : vector<128x128xf32>
    %c0_10 = arith.constant 0 : index
    %c0_11 = arith.constant 0 : index
    %29 = vector.load %arg4[%c0_10, %c0_11] : memref<128x128xf32, #tpu.memory_space<vmem>>, vector<128x128xf32>
    tpu.vector_store %arg4[%c0_10, %c0_11], %28 {strides = array<i32>} : memref<128x128xf32, #tpu.memory_space<vmem>>, vector<128x128xf32>,
    return
  }
  func.func @transform_0(%arg0: i32) -> (i32, i32) {
    %c0_i32 = arith.constant 0 : i32
    %c0_i32_0 = arith.constant 0 : i32
    return %arg0, %c0_i32 : i32, i32
  }
  func.func @transform_1(%arg0: i32) -> (i32, i32) {
    %c0_i32 = arith.constant 0 : i32
    %c0_i32_0 = arith.constant 0 : i32
    %c0_i32_1 = arith.constant 0 : i32
    return %c0_i32, %c0_i32_0 : i32, i32
  }
  func.func @transform_2(%arg0: i32) -> (i32, i32) {
    %c0_i32 = arith.constant 0 : i32
    %c0_i32_0 = arith.constant 0 : i32
    %c0_i32_1 = arith.constant 0 : i32
    return %c0_i32, %c0_i32_0 : i32, i32
  }
  func.func @transform_3(%arg0: i32) -> (i32, i32) {
    %c0_i32 = arith.constant 0 : i32
    %c0_i32_0 = arith.constant 0 : i32
    return %arg0, %c0_i32 : i32, i32
  }
}

module attributes {stable_mosaic.version = 11 : i64} {
  func.func @_linear_ln_kernel(%arg0: i32, %arg1: memref<32x512xf32, #tpu.memory_space<vmem>>, %arg2: memref<512x128xf32, #tpu.memory_space<vmem>>, %arg3: memref<1x128xf32, #tpu.memory_space<vmem>>, %arg4: memref<32x128xf32, #tpu.memory_space<vmem>>) attributes {dimension_semantics = [#tpu.dimension_semantics<parallel>], iteration_bounds = array<i64: 1>, scalar_prefetch = 0 : i64, scratch_operands = 0 : i64, tpu.core_type = #tpu.core_type<tc>, window_params = [{transform_indices = @transform_0, window_bounds = array<i64: 32, 512>}, {pipeline_mode = #tpu.pipeline_mode<synchronous>, transform_indices = @transform_1, window_bounds = array<i64: 512, 128>}, {pipeline_mode = #tpu.pipeline_mode<synchronous>, transform_indices = @transform_2, window_bounds = array<i64: 1, 128>}, {transform_indices = @transform_3, window_bounds = array<i64: 32, 128>}]} {
    %c0 = arith.constant 0 : index
    %c0_0 = arith.constant 0 : index
    %0 = vector.load %arg1[%c0, %c0_0] : memref<32x512xf32, #tpu.memory_space<vmem>>, vector<32x512xf32>
    %c0_1 = arith.constant 0 : index
    %c0_2 = arith.constant 0 : index
    %1 = vector.load %arg2[%c0_1, %c0_2] : memref<512x128xf32, #tpu.memory_space<vmem>>, vector<512x128xf32>
    %cst = arith.constant dense<0.000000e+00> : vector<32x128xf32>
    %2 = tpu.matmul %0, %1, %cst {dimension_numbers = #tpu.dot_dimension_numbers<[1], [0], [0], [1], [0, 0, 1, 1], [], []>} : vector<32x512xf32>, vector<512x128xf32>, vector<32x128xf32> -> vector<32x128xf32>
    %c0_3 = arith.constant 0 : index
    %c0_4 = arith.constant 0 : index
    %3 = vector.load %arg3[%c0_3, %c0_4] : memref<1x128xf32, #tpu.memory_space<vmem>>, vector<1x128xf32>
    %4 = vector.broadcast %3 : vector<1x128xf32> to vector<32x128xf32>
    %5 = arith.addf %2, %4 : vector<32x128xf32>
    %6 = tpu.iota {dimensions = array<i32: 1>} : vector<32x128xi32>
    %c64_i32 = arith.constant 64 : i32
    %7 = vector.broadcast %c64_i32 : i32 to vector<32x128xi32>
    %8 = arith.cmpi slt, %6, %7 : vector<32x128xi32>
    %9 = arith.extui %8 : vector<32x128xi1> to vector<32x128xi32>
    %10 = arith.sitofp %9 : vector<32x128xi32> to vector<32x128xf32>
    %11 = arith.mulf %5, %10 : vector<32x128xf32>
    %cst_5 = arith.constant dense<0.000000e+00> : vector<32xf32>
    %12 = vector.multi_reduction <add>, %11, %cst_5 [1] : vector<32x128xf32> to vector<32xf32>
    %13 = vector.shape_cast %12 : vector<32xf32> to vector<32x1xf32>
    %cst_6 = arith.constant 1.562500e-02 : f32
    %14 = vector.broadcast %cst_6 : f32 to vector<32x1xf32>
    %15 = arith.mulf %13, %14 : vector<32x1xf32>
    %16 = vector.broadcast %15 : vector<32x1xf32> to vector<32x128xf32>
    %17 = arith.subf %5, %16 : vector<32x128xf32>
    %18 = arith.mulf %17, %10 : vector<32x128xf32>
    %19 = arith.mulf %18, %18 : vector<32x128xf32>
    %cst_7 = arith.constant dense<0.000000e+00> : vector<32xf32>
    %20 = vector.multi_reduction <add>, %19, %cst_7 [1] : vector<32x128xf32> to vector<32xf32>
    %21 = vector.shape_cast %20 : vector<32xf32> to vector<32x1xf32>
    %cst_8 = arith.constant 1.562500e-02 : f32
    %22 = vector.broadcast %cst_8 : f32 to vector<32x1xf32>
    %23 = arith.mulf %21, %22 : vector<32x1xf32>
    %cst_9 = arith.constant 9.99999974E-6 : f32
    %24 = vector.broadcast %cst_9 : f32 to vector<32x1xf32>
    %25 = arith.addf %23, %24 : vector<32x1xf32>
    %26 = math.rsqrt %25 : vector<32x1xf32>
    %27 = vector.broadcast %26 : vector<32x1xf32> to vector<32x128xf32>
    %28 = arith.mulf %18, %27 : vector<32x128xf32>
    %c0_10 = arith.constant 0 : index
    %c0_11 = arith.constant 0 : index
    %29 = vector.load %arg4[%c0_10, %c0_11] : memref<32x128xf32, #tpu.memory_space<vmem>>, vector<32x128xf32>
    tpu.vector_store %arg4[%c0_10, %c0_11], %28 {strides = array<i32>} : memref<32x128xf32, #tpu.memory_space<vmem>>, vector<32x128xf32>,
    return
  }
  func.func @transform_0(%arg0: i32) -> (i32, i32) {
    %c0_i32 = arith.constant 0 : i32
    %c0_i32_0 = arith.constant 0 : i32
    return %arg0, %c0_i32 : i32, i32
  }
  func.func @transform_1(%arg0: i32) -> (i32, i32) {
    %c0_i32 = arith.constant 0 : i32
    %c0_i32_0 = arith.constant 0 : i32
    %c0_i32_1 = arith.constant 0 : i32
    return %c0_i32, %c0_i32_0 : i32, i32
  }
  func.func @transform_2(%arg0: i32) -> (i32, i32) {
    %c0_i32 = arith.constant 0 : i32
    %c0_i32_0 = arith.constant 0 : i32
    %c0_i32_1 = arith.constant 0 : i32
    return %c0_i32, %c0_i32_0 : i32, i32
  }
  func.func @transform_3(%arg0: i32) -> (i32, i32) {
    %c0_i32 = arith.constant 0 : i32
    %c0_i32_0 = arith.constant 0 : i32
    return %arg0, %c0_i32 : i32, i32
  }
}

module attributes {stable_mosaic.version = 11 : i64} {
  func.func @_stage_block_kernel(%arg0: i32, %arg1: memref<32x128xf32, #tpu.memory_space<vmem>>, %arg2: memref<128x128xf32, #tpu.memory_space<vmem>>, %arg3: memref<1x128xf32, #tpu.memory_space<vmem>>, %arg4: memref<128x128xf32, #tpu.memory_space<vmem>>, %arg5: memref<1x128xf32, #tpu.memory_space<vmem>>, %arg6: memref<32x128xf32, #tpu.memory_space<vmem>>) attributes {dimension_semantics = [#tpu.dimension_semantics<parallel>], iteration_bounds = array<i64: 1>, scalar_prefetch = 0 : i64, scratch_operands = 0 : i64, tpu.core_type = #tpu.core_type<tc>, window_params = [{transform_indices = @transform_0, window_bounds = array<i64: 32, 128>}, {pipeline_mode = #tpu.pipeline_mode<synchronous>, transform_indices = @transform_1, window_bounds = array<i64: 128, 128>}, {pipeline_mode = #tpu.pipeline_mode<synchronous>, transform_indices = @transform_2, window_bounds = array<i64: 1, 128>}, {pipeline_mode = #tpu.pipeline_mode<synchronous>, transform_indices = @transform_3, window_bounds = array<i64: 128, 128>}, {pipeline_mode = #tpu.pipeline_mode<synchronous>, transform_indices = @transform_4, window_bounds = array<i64: 1, 128>}, {transform_indices = @transform_5, window_bounds = array<i64: 32, 128>}]} {
    %c0 = arith.constant 0 : index
    %c0_0 = arith.constant 0 : index
    %0 = vector.load %arg1[%c0, %c0_0] : memref<32x128xf32, #tpu.memory_space<vmem>>, vector<32x128xf32>
    %1 = tpu.iota {dimensions = array<i32: 1>} : vector<32x128xi32>
    %c64_i32 = arith.constant 64 : i32
    %2 = vector.broadcast %c64_i32 : i32 to vector<32x128xi32>
    %3 = arith.cmpi slt, %1, %2 : vector<32x128xi32>
    %4 = arith.extui %3 : vector<32x128xi1> to vector<32x128xi32>
    %5 = arith.sitofp %4 : vector<32x128xi32> to vector<32x128xf32>
    %6 = arith.mulf %0, %5 : vector<32x128xf32>
    %cst = arith.constant dense<0.000000e+00> : vector<32xf32>
    %7 = vector.multi_reduction <add>, %6, %cst [1] : vector<32x128xf32> to vector<32xf32>
    %8 = vector.shape_cast %7 : vector<32xf32> to vector<32x1xf32>
    %cst_1 = arith.constant 1.562500e-02 : f32
    %9 = vector.broadcast %cst_1 : f32 to vector<32x1xf32>
    %10 = arith.mulf %8, %9 : vector<32x1xf32>
    %11 = vector.broadcast %10 : vector<32x1xf32> to vector<32x128xf32>
    %12 = arith.subf %0, %11 : vector<32x128xf32>
    %13 = arith.mulf %12, %5 : vector<32x128xf32>
    %14 = arith.mulf %13, %13 : vector<32x128xf32>
    %cst_2 = arith.constant dense<0.000000e+00> : vector<32xf32>
    %15 = vector.multi_reduction <add>, %14, %cst_2 [1] : vector<32x128xf32> to vector<32xf32>
    %16 = vector.shape_cast %15 : vector<32xf32> to vector<32x1xf32>
    %cst_3 = arith.constant 1.562500e-02 : f32
    %17 = vector.broadcast %cst_3 : f32 to vector<32x1xf32>
    %18 = arith.mulf %16, %17 : vector<32x1xf32>
    %cst_4 = arith.constant 9.99999974E-6 : f32
    %19 = vector.broadcast %cst_4 : f32 to vector<32x1xf32>
    %20 = arith.addf %18, %19 : vector<32x1xf32>
    %21 = math.rsqrt %20 : vector<32x1xf32>
    %22 = vector.broadcast %21 : vector<32x1xf32> to vector<32x128xf32>
    %23 = arith.mulf %13, %22 : vector<32x128xf32>
    %c0_5 = arith.constant 0 : index
    %c0_6 = arith.constant 0 : index
    %24 = vector.load %arg2[%c0_5, %c0_6] : memref<128x128xf32, #tpu.memory_space<vmem>>, vector<128x128xf32>
    %cst_7 = arith.constant dense<0.000000e+00> : vector<32x128xf32>
    %25 = tpu.matmul %23, %24, %cst_7 {dimension_numbers = #tpu.dot_dimension_numbers<[1], [0], [0], [1], [0, 0, 1, 1], [], []>} : vector<32x128xf32>, vector<128x128xf32>, vector<32x128xf32> -> vector<32x128xf32>
    %c0_8 = arith.constant 0 : index
    %c0_9 = arith.constant 0 : index
    %26 = vector.load %arg3[%c0_8, %c0_9] : memref<1x128xf32, #tpu.memory_space<vmem>>, vector<1x128xf32>
    %27 = vector.broadcast %26 : vector<1x128xf32> to vector<32x128xf32>
    %28 = arith.addf %25, %27 : vector<32x128xf32>
    %29 = arith.mulf %28, %28 : vector<32x128xf32>
    %30 = arith.mulf %28, %29 : vector<32x128xf32>
    %cst_10 = arith.constant 4.471500e-02 : f32
    %31 = vector.broadcast %cst_10 : f32 to vector<32x128xf32>
    %32 = arith.mulf %31, %30 : vector<32x128xf32>
    %33 = arith.addf %28, %32 : vector<32x128xf32>
    %cst_11 = arith.constant 0.797884583 : f32
    %34 = vector.broadcast %cst_11 : f32 to vector<32x128xf32>
    %35 = arith.mulf %34, %33 : vector<32x128xf32>
    %36 = math.tanh %35 : vector<32x128xf32>
    %cst_12 = arith.constant 1.000000e+00 : f32
    %37 = vector.broadcast %cst_12 : f32 to vector<32x128xf32>
    %38 = arith.addf %37, %36 : vector<32x128xf32>
    %cst_13 = arith.constant 5.000000e-01 : f32
    %39 = vector.broadcast %cst_13 : f32 to vector<32x128xf32>
    %40 = arith.mulf %39, %38 : vector<32x128xf32>
    %41 = arith.mulf %28, %40 : vector<32x128xf32>
    %c0_14 = arith.constant 0 : index
    %c0_15 = arith.constant 0 : index
    %42 = vector.load %arg4[%c0_14, %c0_15] : memref<128x128xf32, #tpu.memory_space<vmem>>, vector<128x128xf32>
    %cst_16 = arith.constant dense<0.000000e+00> : vector<32x128xf32>
    %43 = tpu.matmul %41, %42, %cst_16 {dimension_numbers = #tpu.dot_dimension_numbers<[1], [0], [0], [1], [0, 0, 1, 1], [], []>} : vector<32x128xf32>, vector<128x128xf32>, vector<32x128xf32> -> vector<32x128xf32>
    %c0_17 = arith.constant 0 : index
    %c0_18 = arith.constant 0 : index
    %44 = vector.load %arg5[%c0_17, %c0_18] : memref<1x128xf32, #tpu.memory_space<vmem>>, vector<1x128xf32>
    %45 = vector.broadcast %44 : vector<1x128xf32> to vector<32x128xf32>
    %46 = arith.addf %43, %45 : vector<32x128xf32>
    %47 = arith.addf %0, %46 : vector<32x128xf32>
    %c0_19 = arith.constant 0 : index
    %c0_20 = arith.constant 0 : index
    %48 = vector.load %arg6[%c0_19, %c0_20] : memref<32x128xf32, #tpu.memory_space<vmem>>, vector<32x128xf32>
    tpu.vector_store %arg6[%c0_19, %c0_20], %47 {strides = array<i32>} : memref<32x128xf32, #tpu.memory_space<vmem>>, vector<32x128xf32>,
    return
  }
  func.func @transform_0(%arg0: i32) -> (i32, i32) {
    %c0_i32 = arith.constant 0 : i32
    %c0_i32_0 = arith.constant 0 : i32
    return %arg0, %c0_i32 : i32, i32
  }
  func.func @transform_1(%arg0: i32) -> (i32, i32) {
    %c0_i32 = arith.constant 0 : i32
    %c0_i32_0 = arith.constant 0 : i32
    %c0_i32_1 = arith.constant 0 : i32
    return %c0_i32, %c0_i32_0 : i32, i32
  }
  func.func @transform_2(%arg0: i32) -> (i32, i32) {
    %c0_i32 = arith.constant 0 : i32
    %c0_i32_0 = arith.constant 0 : i32
    %c0_i32_1 = arith.constant 0 : i32
    return %c0_i32, %c0_i32_0 : i32, i32
  }
  func.func @transform_3(%arg0: i32) -> (i32, i32) {
    %c0_i32 = arith.constant 0 : i32
    %c0_i32_0 = arith.constant 0 : i32
    %c0_i32_1 = arith.constant 0 : i32
    return %c0_i32, %c0_i32_0 : i32, i32
  }
  func.func @transform_4(%arg0: i32) -> (i32, i32) {
    %c0_i32 = arith.constant 0 : i32
    %c0_i32_0 = arith.constant 0 : i32
    %c0_i32_1 = arith.constant 0 : i32
    return %c0_i32, %c0_i32_0 : i32, i32
  }
  func.func @transform_5(%arg0: i32) -> (i32, i32) {
    %c0_i32 = arith.constant 0 : i32
    %c0_i32_0 = arith.constant 0 : i32
    return %arg0, %c0_i32 : i32, i32
  }
}

module attributes {stable_mosaic.version = 11 : i64} {
  func.func @_norm_pool_kernel(%arg0: i32, %arg1: memref<1x16x128xf32, #tpu.memory_space<vmem>>, %arg2: memref<1x16x128xf32, #tpu.memory_space<vmem>>, %arg3: memref<1x4x128xf32, #tpu.memory_space<vmem>>) attributes {dimension_semantics = [#tpu.dimension_semantics<parallel>], iteration_bounds = array<i64: 2>, scalar_prefetch = 0 : i64, scratch_operands = 0 : i64, tpu.core_type = #tpu.core_type<tc>, window_params = [{transform_indices = @transform_0, window_bounds = array<i64: 1, 16, 128>}, {transform_indices = @transform_1, window_bounds = array<i64: 1, 16, 128>}, {transform_indices = @transform_2, window_bounds = array<i64: 1, 4, 128>}]} {
    %c0 = arith.constant 0 : index
    %c0_0 = arith.constant 0 : index
    %c0_1 = arith.constant 0 : index
    %0 = vector.load %arg1[%c0, %c0_0, %c0_1] : memref<1x16x128xf32, #tpu.memory_space<vmem>>, vector<1x16x128xf32>
    %1 = vector.shape_cast %0 : vector<1x16x128xf32> to vector<16x128xf32>
    %2 = tpu.iota {dimensions = array<i32: 1>} : vector<16x128xi32>
    %c64_i32 = arith.constant 64 : i32
    %3 = vector.broadcast %c64_i32 : i32 to vector<16x128xi32>
    %4 = arith.cmpi slt, %2, %3 : vector<16x128xi32>
    %5 = arith.extui %4 : vector<16x128xi1> to vector<16x128xi32>
    %6 = arith.sitofp %5 : vector<16x128xi32> to vector<16x128xf32>
    %7 = arith.mulf %1, %6 : vector<16x128xf32>
    %cst = arith.constant dense<0.000000e+00> : vector<16xf32>
    %8 = vector.multi_reduction <add>, %7, %cst [1] : vector<16x128xf32> to vector<16xf32>
    %9 = vector.shape_cast %8 : vector<16xf32> to vector<16x1xf32>
    %cst_2 = arith.constant 1.562500e-02 : f32
    %10 = vector.broadcast %cst_2 : f32 to vector<16x1xf32>
    %11 = arith.mulf %9, %10 : vector<16x1xf32>
    %12 = vector.broadcast %11 : vector<16x1xf32> to vector<16x128xf32>
    %13 = arith.subf %1, %12 : vector<16x128xf32>
    %14 = arith.mulf %13, %6 : vector<16x128xf32>
    %15 = arith.mulf %14, %14 : vector<16x128xf32>
    %cst_3 = arith.constant dense<0.000000e+00> : vector<16xf32>
    %16 = vector.multi_reduction <add>, %15, %cst_3 [1] : vector<16x128xf32> to vector<16xf32>
    %17 = vector.shape_cast %16 : vector<16xf32> to vector<16x1xf32>
    %cst_4 = arith.constant 1.562500e-02 : f32
    %18 = vector.broadcast %cst_4 : f32 to vector<16x1xf32>
    %19 = arith.mulf %17, %18 : vector<16x1xf32>
    %cst_5 = arith.constant 9.99999974E-6 : f32
    %20 = vector.broadcast %cst_5 : f32 to vector<16x1xf32>
    %21 = arith.addf %19, %20 : vector<16x1xf32>
    %22 = math.rsqrt %21 : vector<16x1xf32>
    %23 = vector.broadcast %22 : vector<16x1xf32> to vector<16x128xf32>
    %24 = arith.mulf %14, %23 : vector<16x128xf32>
    %25 = vector.shape_cast %24 : vector<16x128xf32> to vector<1x16x128xf32>
    %c0_6 = arith.constant 0 : index
    %c0_7 = arith.constant 0 : index
    %c0_8 = arith.constant 0 : index
    %26 = vector.load %arg2[%c0_6, %c0_7, %c0_8] : memref<1x16x128xf32, #tpu.memory_space<vmem>>, vector<1x16x128xf32>
    tpu.vector_store %arg2[%c0_6, %c0_7, %c0_8], %25 {strides = array<i32>} : memref<1x16x128xf32, #tpu.memory_space<vmem>>, vector<1x16x128xf32>,
    %27 = vector.shape_cast %24 : vector<16x128xf32> to vector<2x2x4x128xf32>
    %28 = vector.extract_strided_slice %27 {offsets = [0, 0, 0, 0], sizes = [2, 1, 4, 128], strides = [1, 1, 1, 1]} : vector<2x2x4x128xf32> to vector<2x1x4x128xf32>
    %29 = vector.shape_cast %28 : vector<2x1x4x128xf32> to vector<2x4x128xf32>
    %30 = vector.extract_strided_slice %27 {offsets = [0, 1, 0, 0], sizes = [2, 1, 4, 128], strides = [1, 1, 1, 1]} : vector<2x2x4x128xf32> to vector<2x1x4x128xf32>
    %31 = vector.shape_cast %30 : vector<2x1x4x128xf32> to vector<2x4x128xf32>
    %32 = arith.maximumf %29, %31 : vector<2x4x128xf32>
    %33 = vector.shape_cast %32 : vector<2x4x128xf32> to vector<2x2x2x128xf32>
    %34 = vector.extract_strided_slice %33 {offsets = [0, 0, 0, 0], sizes = [2, 2, 1, 128], strides = [1, 1, 1, 1]} : vector<2x2x2x128xf32> to vector<2x2x1x128xf32>
    %35 = vector.shape_cast %34 : vector<2x2x1x128xf32> to vector<2x2x128xf32>
    %36 = vector.extract_strided_slice %33 {offsets = [0, 0, 1, 0], sizes = [2, 2, 1, 128], strides = [1, 1, 1, 1]} : vector<2x2x2x128xf32> to vector<2x2x1x128xf32>
    %37 = vector.shape_cast %36 : vector<2x2x1x128xf32> to vector<2x2x128xf32>
    %38 = arith.maximumf %35, %37 : vector<2x2x128xf32>
    %39 = vector.shape_cast %38 : vector<2x2x128xf32> to vector<1x4x128xf32>
    %c0_9 = arith.constant 0 : index
    %c0_10 = arith.constant 0 : index
    %c0_11 = arith.constant 0 : index
    %40 = vector.load %arg3[%c0_9, %c0_10, %c0_11] : memref<1x4x128xf32, #tpu.memory_space<vmem>>, vector<1x4x128xf32>
    tpu.vector_store %arg3[%c0_9, %c0_10, %c0_11], %39 {strides = array<i32>} : memref<1x4x128xf32, #tpu.memory_space<vmem>>, vector<1x4x128xf32>,
    return
  }
  func.func @transform_0(%arg0: i32) -> (i32, i32, i32) {
    %c0_i32 = arith.constant 0 : i32
    %c0_i32_0 = arith.constant 0 : i32
    %c0_i32_1 = arith.constant 0 : i32
    return %arg0, %c0_i32, %c0_i32_0 : i32, i32, i32
  }
  func.func @transform_1(%arg0: i32) -> (i32, i32, i32) {
    %c0_i32 = arith.constant 0 : i32
    %c0_i32_0 = arith.constant 0 : i32
    %c0_i32_1 = arith.constant 0 : i32
    return %arg0, %c0_i32, %c0_i32_0 : i32, i32, i32
  }
  func.func @transform_2(%arg0: i32) -> (i32, i32, i32) {
    %c0_i32 = arith.constant 0 : i32
    %c0_i32_0 = arith.constant 0 : i32
    %c0_i32_1 = arith.constant 0 : i32
    return %arg0, %c0_i32, %c0_i32_0 : i32, i32, i32
  }
}

module attributes {stable_mosaic.version = 11 : i64} {
  func.func @_norm_pool_kernel(%arg0: i32, %arg1: memref<1x64x128xf32, #tpu.memory_space<vmem>>, %arg2: memref<1x64x128xf32, #tpu.memory_space<vmem>>, %arg3: memref<1x16x128xf32, #tpu.memory_space<vmem>>) attributes {dimension_semantics = [#tpu.dimension_semantics<parallel>], iteration_bounds = array<i64: 2>, scalar_prefetch = 0 : i64, scratch_operands = 0 : i64, tpu.core_type = #tpu.core_type<tc>, window_params = [{transform_indices = @transform_0, window_bounds = array<i64: 1, 64, 128>}, {transform_indices = @transform_1, window_bounds = array<i64: 1, 64, 128>}, {transform_indices = @transform_2, window_bounds = array<i64: 1, 16, 128>}]} {
    %c0 = arith.constant 0 : index
    %c0_0 = arith.constant 0 : index
    %c0_1 = arith.constant 0 : index
    %0 = vector.load %arg1[%c0, %c0_0, %c0_1] : memref<1x64x128xf32, #tpu.memory_space<vmem>>, vector<1x64x128xf32>
    %1 = vector.shape_cast %0 : vector<1x64x128xf32> to vector<64x128xf32>
    %2 = tpu.iota {dimensions = array<i32: 1>} : vector<64x128xi32>
    %c32_i32 = arith.constant 32 : i32
    %3 = vector.broadcast %c32_i32 : i32 to vector<64x128xi32>
    %4 = arith.cmpi slt, %2, %3 : vector<64x128xi32>
    %5 = arith.extui %4 : vector<64x128xi1> to vector<64x128xi32>
    %6 = arith.sitofp %5 : vector<64x128xi32> to vector<64x128xf32>
    %7 = arith.mulf %1, %6 : vector<64x128xf32>
    %cst = arith.constant dense<0.000000e+00> : vector<64xf32>
    %8 = vector.multi_reduction <add>, %7, %cst [1] : vector<64x128xf32> to vector<64xf32>
    %9 = vector.shape_cast %8 : vector<64xf32> to vector<64x1xf32>
    %cst_2 = arith.constant 3.125000e-02 : f32
    %10 = vector.broadcast %cst_2 : f32 to vector<64x1xf32>
    %11 = arith.mulf %9, %10 : vector<64x1xf32>
    %12 = vector.broadcast %11 : vector<64x1xf32> to vector<64x128xf32>
    %13 = arith.subf %1, %12 : vector<64x128xf32>
    %14 = arith.mulf %13, %6 : vector<64x128xf32>
    %15 = arith.mulf %14, %14 : vector<64x128xf32>
    %cst_3 = arith.constant dense<0.000000e+00> : vector<64xf32>
    %16 = vector.multi_reduction <add>, %15, %cst_3 [1] : vector<64x128xf32> to vector<64xf32>
    %17 = vector.shape_cast %16 : vector<64xf32> to vector<64x1xf32>
    %cst_4 = arith.constant 3.125000e-02 : f32
    %18 = vector.broadcast %cst_4 : f32 to vector<64x1xf32>
    %19 = arith.mulf %17, %18 : vector<64x1xf32>
    %cst_5 = arith.constant 9.99999974E-6 : f32
    %20 = vector.broadcast %cst_5 : f32 to vector<64x1xf32>
    %21 = arith.addf %19, %20 : vector<64x1xf32>
    %22 = math.rsqrt %21 : vector<64x1xf32>
    %23 = vector.broadcast %22 : vector<64x1xf32> to vector<64x128xf32>
    %24 = arith.mulf %14, %23 : vector<64x128xf32>
    %25 = vector.shape_cast %24 : vector<64x128xf32> to vector<1x64x128xf32>
    %c0_6 = arith.constant 0 : index
    %c0_7 = arith.constant 0 : index
    %c0_8 = arith.constant 0 : index
    %26 = vector.load %arg2[%c0_6, %c0_7, %c0_8] : memref<1x64x128xf32, #tpu.memory_space<vmem>>, vector<1x64x128xf32>
    tpu.vector_store %arg2[%c0_6, %c0_7, %c0_8], %25 {strides = array<i32>} : memref<1x64x128xf32, #tpu.memory_space<vmem>>, vector<1x64x128xf32>,
    %27 = vector.shape_cast %24 : vector<64x128xf32> to vector<4x2x8x128xf32>
    %28 = vector.extract_strided_slice %27 {offsets = [0, 0, 0, 0], sizes = [4, 1, 8, 128], strides = [1, 1, 1, 1]} : vector<4x2x8x128xf32> to vector<4x1x8x128xf32>
    %29 = vector.shape_cast %28 : vector<4x1x8x128xf32> to vector<4x8x128xf32>
    %30 = vector.extract_strided_slice %27 {offsets = [0, 1, 0, 0], sizes = [4, 1, 8, 128], strides = [1, 1, 1, 1]} : vector<4x2x8x128xf32> to vector<4x1x8x128xf32>
    %31 = vector.shape_cast %30 : vector<4x1x8x128xf32> to vector<4x8x128xf32>
    %32 = arith.maximumf %29, %31 : vector<4x8x128xf32>
    %33 = vector.shape_cast %32 : vector<4x8x128xf32> to vector<4x4x2x128xf32>
    %34 = vector.extract_strided_slice %33 {offsets = [0, 0, 0, 0], sizes = [4, 4, 1, 128], strides = [1, 1, 1, 1]} : vector<4x4x2x128xf32> to vector<4x4x1x128xf32>
    %35 = vector.shape_cast %34 : vector<4x4x1x128xf32> to vector<4x4x128xf32>
    %36 = vector.extract_strided_slice %33 {offsets = [0, 0, 1, 0], sizes = [4, 4, 1, 128], strides = [1, 1, 1, 1]} : vector<4x4x2x128xf32> to vector<4x4x1x128xf32>
    %37 = vector.shape_cast %36 : vector<4x4x1x128xf32> to vector<4x4x128xf32>
    %38 = arith.maximumf %35, %37 : vector<4x4x128xf32>
    %39 = vector.shape_cast %38 : vector<4x4x128xf32> to vector<1x16x128xf32>
    %c0_9 = arith.constant 0 : index
    %c0_10 = arith.constant 0 : index
    %c0_11 = arith.constant 0 : index
    %40 = vector.load %arg3[%c0_9, %c0_10, %c0_11] : memref<1x16x128xf32, #tpu.memory_space<vmem>>, vector<1x16x128xf32>
    tpu.vector_store %arg3[%c0_9, %c0_10, %c0_11], %39 {strides = array<i32>} : memref<1x16x128xf32, #tpu.memory_space<vmem>>, vector<1x16x128xf32>,
    return
  }
  func.func @transform_0(%arg0: i32) -> (i32, i32, i32) {
    %c0_i32 = arith.constant 0 : i32
    %c0_i32_0 = arith.constant 0 : i32
    %c0_i32_1 = arith.constant 0 : i32
    return %arg0, %c0_i32, %c0_i32_0 : i32, i32, i32
  }
  func.func @transform_1(%arg0: i32) -> (i32, i32, i32) {
    %c0_i32 = arith.constant 0 : i32
    %c0_i32_0 = arith.constant 0 : i32
    %c0_i32_1 = arith.constant 0 : i32
    return %arg0, %c0_i32, %c0_i32_0 : i32, i32, i32
  }
  func.func @transform_2(%arg0: i32) -> (i32, i32, i32) {
    %c0_i32 = arith.constant 0 : i32
    %c0_i32_0 = arith.constant 0 : i32
    %c0_i32_1 = arith.constant 0 : i32
    return %arg0, %c0_i32, %c0_i32_0 : i32, i32, i32
  }
}

</mosaic_0001>

<bundles_post_ra>
// kernel: swt_backbone_forward.6
= control target key start
LH: loop header
LB: loop body
LE: loop exit
PB: predicated region body
PF: predicated region fallthrough
CT: control target
= control target key end

     0   :  { %vm39_vm0 = vcmask 130048   ;;  %v233_v19 = vlaneseq  ;;  %v569_v24 = vmov 0.0   ;;  %s889_s1 = inlined_call_operand.vmem [shape: f32[16,128], index: 1, kind: input, shape index: {}]   ;;  %s890_s0 = inlined_call_operand.vmem [shape: f32[128,16], index: 0, kind: input, shape index: {}]   ;;  %s891_s2 = inlined_call_operand.vmem [shape: f32[1,128], index: 2, kind: input, shape index: {}]   ;;  %s892_s3 = inlined_call_operand.vmem [shape: f32[128,128], index: 3, kind: output, shape index: {}]  }
   0x1   :  { %v30_v0 = vld [vmem:[%s889_s1] sm:$0xff]  ;;  %v31_v1 = vld [vmem:[%s889_s1 + $0x8] sm:$0xff]  ;;  %v16_v7 = vld [vmem:[%s890_s0 + $0x10] sm:$0xff] }
   0x2   :  { %v14_v2 = vld [vmem:[%s890_s0] sm:$0xff]  ;;  %v530_v3 = vpack.c.bf16 %v31_v1, %v30_v0  ;;  %v15_v5 = vld [vmem:[%s890_s0 + $0x8] sm:$0xff]  ;;  %v24_v8 = vld [vmem:[%s890_s0 + $0x50] sm:$0xff]  ;;  %v234_v20 = vand.u32 127, %v233_v19 }
   0x3   :  { %506 = vmatprep.mubr.msk.f32.mxu0 %vm39_vm0, %v14_v2  ;;  %v22_v4 = vld [vmem:[%s890_s0 + $0x40] sm:$0xff]  ;;  %v23_v6 = vld [vmem:[%s890_s0 + $0x48] sm:$0xff]  ;;  %v17_v9 = vld [vmem:[%s890_s0 + $0x18] sm:$0xff] }
   0x4   :  { %518 = vmatprep.mubr.msk.f32.mxu1 %vm39_vm0, %v22_v4  ;;  %531 = vmatprep.subr.bf16.mxu0 %v530_v3  ;;  %v25_v10 = vld [vmem:[%s890_s0 + $0x58] sm:$0xff]  ;;  %v18_v11 = vld [vmem:[%s890_s0 + $0x20] sm:$0xff]  ;;  %v19_v13 = vld [vmem:[%s890_s0 + $0x28] sm:$0xff]  ;;  %vm235_vm1 = vcmp.lt.s32.totalorder %v234_v20, 32 }
   0x5   :  { %534 = vmatprep.subr.bf16.mxu1 %v530_v3  ;;  %533 = vmatpush3.bf16.msra.mxu0 %v530_v3  ;;  %v26_v12 = vld [vmem:[%s890_s0 + $0x60] sm:$0xff]  ;;  %v27_v14 = vld [vmem:[%s890_s0 + $0x68] sm:$0xff]  ;;  %v20_v15 = vld [vmem:[%s890_s0 + $0x30] sm:$0xff]  ;;  %v663_v25 = vsel %vm235_vm1, 1.0, %v569_v24 }
   0x6   :  { %535 = vmatpush3.bf16.msra.mxu1 %v530_v3  ;;  %v28_v16 = vld [vmem:[%s890_s0 + $0x70] sm:$0xff]  ;;  %v21_v17 = vld [vmem:[%s890_s0 + $0x38] sm:$0xff]  ;;  %v466_v21 = vld [vmem:[%s891_s2] ss:$0 sm:$0xff] }
   0x7   :  { %v29_v18 = vld [vmem:[%s890_s0 + $0x78] sm:$0xff] }
   0x8   :  { %507 = vmatmul.mubr.msk.f32.vlgmr.msra.gmra.mrb[0].mxu0 %vm39_vm0, %v15_v5 }
   0x9   :  { %519 = vmatmul.mubr.msk.f32.vlgmr.msra.gmra.mrb[0].mxu1 %vm39_vm0, %v23_v6  ;;  %509 = vmatprep.mubr.msk.f32.mxu0 %vm39_vm0, %v16_v7 }
   0xa   :  { %521 = vmatprep.mubr.msk.f32.mxu1 %vm39_vm0, %v24_v8 }
   0xc   :  { %510 = vmatmul.mubr.msk.f32.gmra.mrb[2].mxu0 %vm39_vm0, %v17_v9 }
   0xd   :  { %522 = vmatmul.mubr.msk.f32.gmra.mrb[2].mxu1 %vm39_vm0, %v25_v10  ;;  %512 = vmatprep.mubr.msk.f32.mxu0 %vm39_vm0, %v18_v11 }
   0xe   :  { %524 = vmatprep.mubr.msk.f32.mxu1 %vm39_vm0, %v26_v12 }
  0x10   :  { %513 = vmatmul.mubr.msk.f32.gmra.mrb[4].mxu0 %vm39_vm0, %v19_v13 }
  0x11   :  { %525 = vmatmul.mubr.msk.f32.gmra.mrb[4].mxu1 %vm39_vm0, %v27_v14  ;;  %515 = vmatprep.mubr.msk.f32.mxu0 %vm39_vm0, %v20_v15 }
  0x12   :  { %527 = vmatprep.mubr.msk.f32.mxu1 %vm39_vm0, %v28_v16 }
  0x14   :  { %516 = vmatmul.mubr.msk.f32.gmra.mrb[6].mxu0 %vm39_vm0, %v21_v17 }
  0x15   :  { %528 = vmatmul.mubr.msk.f32.gmra.mrb[6].mxu1 %vm39_vm0, %v29_v18 }
  0xdb   :  { %v508_v22 = vpop.f32.mrb[0].mxu0 }
  0xdc   :  { %v520_v23 = vpop.f32.mrb[0].mxu1  ;;  %v665_v26 = vadd.f32 %v508_v22, %v466_v21  ;;  %v154_v28 = vpop.f32.mrb[1].mxu0 }
  0xdd   :  { %v667_v27 = vadd.f32 %v520_v23, %v466_v21  ;;  %v194_v29 = vpop.f32.mrb[1].mxu1  ;;  %v669_v30 = vadd.f32 %v466_v21, %v154_v28 }
  0xde   :  { %v239_v32 = vmul.f32 %v663_v25, %v665_v26  ;;  %v679_v39 = vadd.f32 %v466_v21, %v194_v29 }
  0xdf   :  { %v247_v31 = vmul.f32 %v663_v25, %v667_v27  ;;  %v511_v33 = vpop.f32.mrb[2].mxu0  ;;  %v238_v41 = vmul.f32 %v663_v25, %v669_v30 }
  0xe0   :  { %v523_v34 = vpop.f32.mrb[2].mxu1  ;;  %v675_v35 = vadd.f32 %v511_v33, %v466_v21  ;;  %256 = vadd.xlane.f32.xlu0 %v239_v32  ;;  %v164_v36 = vpop.f32.mrb[3].mxu0  ;;  %v246_v49 = vmul.f32 %v663_v25, %v679_v39 }
  0xe1   :  { %272 = vadd.xlane.f32.xlu1 %v247_v31  ;;  %v677_v37 = vadd.f32 %v523_v34, %v466_v21  ;;  %v204_v38 = vpop.f32.mrb[3].mxu1  ;;  %v687_v47 = vadd.f32 %v466_v21, %v164_v36 }
  0xe2   :  { %v241_v40 = vmul.f32 %v663_v25, %v675_v35  ;;  %v689_v48 = vadd.f32 %v466_v21, %v204_v38 }
  0xe3   :  { %v514_v42 = vpop.f32.mrb[4].mxu0  ;;  %v249_v44 = vmul.f32 %v663_v25, %v677_v37  ;;  %v240_v56 = vmul.f32 %v663_v25, %v687_v47 }
  0xe4   :  { %v526_v43 = vpop.f32.mrb[4].mxu1  ;;  %254 = vadd.xlane.f32.xlu0 %v238_v41  ;;  %v174_v45 = vpop.f32.mrb[5].mxu0  ;;  %v693_v52 = vadd.f32 %v514_v42, %v466_v21  ;;  %v248_v57 = vmul.f32 %v663_v25, %v689_v48 }
  0xe5   :  { %260 = vadd.xlane.f32.xlu1 %v241_v40  ;;  %v214_v46 = vpop.f32.mrb[5].mxu1  ;;  %v695_v53 = vadd.f32 %v466_v21, %v174_v45  ;;  %v701_v58 = vadd.f32 %v526_v43, %v466_v21 }
  0xe6   :  { %v703_v59 = vadd.f32 %v466_v21, %v214_v46  ;;  %v243_v60 = vmul.f32 %v663_v25, %v693_v52 }
  0xe7   :  { %v517_v50 = vpop.f32.mrb[6].mxu0  ;;  %v242_v61 = vmul.f32 %v663_v25, %v695_v53  ;;  %v251_v62 = vmul.f32 %v663_v25, %v701_v58 }
  0xe8   :  { %v529_v51 = vpop.f32.mrb[6].mxu1  ;;  %270 = vadd.xlane.f32.xlu0 %v246_v49  ;;  %v184_v54 = vpop.f32.mrb[7].mxu0  ;;  %v711_v63 = vadd.f32 %v517_v50, %v466_v21  ;;  %v250_v1 = vmul.f32 %v663_v25, %v703_v59 }
  0xe9   :  { %276 = vadd.xlane.f32.xlu1 %v249_v44  ;;  %v224_v55 = vpop.f32.mrb[7].mxu1  ;;  %v713_v0 = vadd.f32 %v466_v21, %v184_v54  ;;  %v717_v2 = vadd.f32 %v529_v51, %v466_v21 }
  0xea   :  { %v719_v3 = vadd.f32 %v466_v21, %v224_v55  ;;  %v245_v4 = vmul.f32 %v663_v25, %v711_v63 }
  0xeb   :  { %v244_v5 = vmul.f32 %v663_v25, %v713_v0  ;;  %v253_v6 = vmul.f32 %v663_v25, %v717_v2 }
  0xec   :  { %274 = vadd.xlane.f32.xlu0 %v248_v57  ;;  %v252_v7 = vmul.f32 %v663_v25, %v719_v3 }
  0xed   :  { %258 = vadd.xlane.f32.xlu1 %v240_v56 }
  0xf0   :  { %262 = vadd.xlane.f32.xlu0 %v242_v61 }
  0xf1   :  { %264 = vadd.xlane.f32.xlu1 %v243_v60 }
  0xf4   :  { %278 = vadd.xlane.f32.xlu0 %v250_v1 }
  0xf5   :  { %280 = vadd.xlane.f32.xlu1 %v251_v62 }
  0xf8   :  { %266 = vadd.xlane.f32.xlu0 %v244_v5 }
  0xf9   :  { %268 = vadd.xlane.f32.xlu1 %v245_v4 }
  0xfc   :  { %282 = vadd.xlane.f32.xlu0 %v252_v7 }
  0xfd   :  { %284 = vadd.xlane.f32.xlu1 %v253_v6 }
 0x16d   :  { %v257_v9 = vpop.xlane.xlu0 %256 }
 0x16e   :  { %v273_v8 = vpop.xlane.xlu1 %272  ;;  %v287_v11 = vmul.f32 0.03125, %v257_v9 }
 0x16f   :  { %v295_v10 = vmul.f32 0.03125, %v273_v8 }
 0x170   :  { %v303_v13 = vsub.f32 %v665_v26, %v287_v11 }
 0x171   :  { %v311_v12 = vsub.f32 %v667_v27, %v295_v10  ;;  %v255_v15 = vpop.xlane.xlu0 %254 }
 0x172   :  { %v261_v14 = vpop.xlane.xlu1 %260  ;;  %v286_v17 = vmul.f32 0.03125, %v255_v15  ;;  %v732_v18 = vmul.f32 %v663_v25, %v303_v13 }
 0x173   :  { %v289_v16 = vmul.f32 0.03125, %v261_v14  ;;  %v739_v22 = vmul.f32 %v663_v25, %v311_v12 }
 0x174   :  { %v302_v20 = vsub.f32 %v669_v30, %v286_v17  ;;  %v335_v21 = vmul.f32 %v732_v18, %v732_v18 }
 0x175   :  { %v305_v19 = vsub.f32 %v675_v35, %v289_v16  ;;  %v271_v24 = vpop.xlane.xlu0 %270  ;;  %v343_v32 = vmul.f32 %v739_v22, %v739_v22 }
 0x176   :  { %v277_v23 = vpop.xlane.xlu1 %276  ;;  %v294_v27 = vmul.f32 0.03125, %v271_v24  ;;  %352 = vadd.xlane.f32.xlu1 %v335_v21  ;;  %v742_v28 = vmul.f32 %v663_v25, %v302_v20 }
 0x177   :  { %v297_v26 = vmul.f32 0.03125, %v277_v23  ;;  %v745_v29 = vmul.f32 %v663_v25, %v305_v19 }
 0x178   :  { %v310_v30 = vsub.f32 %v679_v39, %v294_v27  ;;  %v334_v33 = vmul.f32 %v742_v28, %v742_v28 }
 0x179   :  { %v313_v31 = vsub.f32 %v677_v37, %v297_v26  ;;  %v275_v35 = vpop.xlane.xlu0 %274  ;;  %v337_v37 = vmul.f32 %v745_v29, %v745_v29 }
 0x17a   :  { %v259_v34 = vpop.xlane.xlu1 %258  ;;  %v296_v38 = vmul.f32 0.03125, %v275_v35  ;;  %368 = vadd.xlane.f32.xlu1 %v343_v32  ;;  %350 = vadd.xlane.f32.xlu0 %v334_v33  ;;  %v754_v40 = vmul.f32 %v663_v25, %v310_v30 }
 0x17b   :  { %v288_v36 = vmul.f32 0.03125, %v259_v34  ;;  %v763_v43 = vmul.f32 %v663_v25, %v313_v31 }
 0x17c   :  { %v312_v41 = vsub.f32 %v689_v48, %v296_v38  ;;  %v342_v42 = vmul.f32 %v754_v40, %v754_v40 }
 0x17d   :  { %v304_v39 = vsub.f32 %v687_v47, %v288_v36  ;;  %v263_v45 = vpop.xlane.xlu0 %262  ;;  %v345_v54 = vmul.f32 %v763_v43, %v763_v43 }
 0x17e   :  { %v265_v44 = vpop.xlane.xlu1 %264  ;;  %v290_v49 = vmul.f32 0.03125, %v263_v45  ;;  %356 = vadd.xlane.f32.xlu1 %v337_v37  ;;  %366 = vadd.xlane.f32.xlu0 %v342_v42  ;;  %v769_v51 = vmul.f32 %v663_v25, %v312_v41 }
 0x17f   :  { %v291_v46 = vmul.f32 0.03125, %v265_v44  ;;  %v766_v50 = vmul.f32 %v663_v25, %v304_v39 }
 0x180   :  { %v306_v48 = vsub.f32 %v695_v53, %v290_v49 }
 0x181   :  { %v307_v47 = vsub.f32 %v693_v52, %v291_v46  ;;  %v336_v55 = vmul.f32 %v766_v50, %v766_v50  ;;  %v279_v57 = vpop.xlane.xlu0 %278  ;;  %v344_v52 = vmul.f32 %v769_v51, %v769_v51 }
 0x182   :  { %v281_v56 = vpop.xlane.xlu1 %280  ;;  %v298_v61 = vmul.f32 0.03125, %v279_v57  ;;  %372 = vadd.xlane.f32.xlu1 %v345_v54  ;;  %v787_v5 = vmul.f32 %v663_v25, %v306_v48 }
 0x183   :  { %v299_v60 = vmul.f32 0.03125, %v281_v56  ;;  %354 = vadd.xlane.f32.xlu0 %v336_v55  ;;  %v778_v62 = vmul.f32 %v663_v25, %v307_v47 }
 0x184   :  { %v314_v1 = vsub.f32 %v703_v59, %v298_v61  ;;  %v338_v13 = vmul.f32 %v787_v5, %v787_v5 }
 0x185   :  { %v315_v53 = vsub.f32 %v701_v58, %v299_v60  ;;  %v339_v4 = vmul.f32 %v778_v62, %v778_v62  ;;  %v267_v7 = vpop.xlane.xlu0 %266 }
 0x186   :  { %v269_v6 = vpop.xlane.xlu1 %268  ;;  %v292_v9 = vmul.f32 0.03125, %v267_v7  ;;  %v793_v11 = vmul.f32 %v663_v25, %v314_v1 }
 0x187   :  { %v293_v8 = vmul.f32 0.03125, %v269_v6  ;;  %360 = vadd.xlane.f32.xlu1 %v339_v4  ;;  %370 = vadd.xlane.f32.xlu0 %v344_v52  ;;  %v790_v10 = vmul.f32 %v663_v25, %v315_v53 }
 0x188   :  { %v308_v59 = vsub.f32 %v713_v0, %v292_v9 }
 0x189   :  { %v309_v58 = vsub.f32 %v711_v63, %v293_v8  ;;  %v347_v12 = vmul.f32 %v790_v10, %v790_v10  ;;  %v283_v15 = vpop.xlane.xlu0 %282  ;;  %v346_v63 = vmul.f32 %v793_v11, %v793_v11 }
 0x18a   :  { %v285_v14 = vpop.xlane.xlu1 %284  ;;  %v300_v17 = vmul.f32 0.03125, %v283_v15  ;;  %v811_v23 = vmul.f32 %v663_v25, %v308_v59 }
 0x18b   :  { %v301_v16 = vmul.f32 0.03125, %v285_v14  ;;  %376 = vadd.xlane.f32.xlu1 %v347_v12  ;;  %358 = vadd.xlane.f32.xlu0 %v338_v13  ;;  %v802_v19 = vmul.f32 %v663_v25, %v309_v58 }
 0x18c   :  { %v316_v20 = vsub.f32 %v719_v3, %v300_v17  ;;  %v340_v27 = vmul.f32 %v811_v23, %v811_v23 }
 0x18d   :  { %v317_v0 = vsub.f32 %v717_v2, %v301_v16  ;;  %v341_v21 = vmul.f32 %v802_v19, %v802_v19 }
 0x18e   :  { %v821_v2 = vmul.f32 %v663_v25, %v316_v20 }
 0x18f   :  { %364 = vadd.xlane.f32.xlu1 %v341_v21  ;;  %374 = vadd.xlane.f32.xlu0 %v346_v63  ;;  %v814_v24 = vmul.f32 %v663_v25, %v317_v0 }
 0x190   :  { %v348_v3 = vmul.f32 %v821_v2, %v821_v2 }
 0x191   :  { %v349_v26 = vmul.f32 %v814_v24, %v814_v24 }
 0x193   :  { %380 = vadd.xlane.f32.xlu1 %v349_v26  ;;  %362 = vadd.xlane.f32.xlu0 %v340_v27 }
 0x197   :  { %378 = vadd.xlane.f32.xlu0 %v348_v3 }
 0x203   :  { %v353_v31 = vpop.xlane.xlu1 %352 }
 0x204   :  { %v383_v30 = vmul.f32 0.03125, %v353_v31 }
 0x206   :  { %v399_v32 = vadd.f32 1e-05, %v383_v30 }
 0x207   :  { %v369_v33 = vpop.xlane.xlu1 %368  ;;  %v351_v34 = vpop.xlane.xlu0 %350 }
 0x208   :  { %537 = vrsqrt.f32 %v399_v32  ;;  %v391_v35 = vmul.f32 0.03125, %v369_v33  ;;  %v382_v36 = vmul.f32 0.03125, %v351_v34 }
 0x20a   :  { %v407_v38 = vadd.f32 1e-05, %v391_v35  ;;  %v398_v37 = vadd.f32 1e-05, %v382_v36 }
 0x20b   :  { %v357_v39 = vpop.xlane.xlu1 %356  ;;  %v367_v41 = vpop.xlane.xlu0 %366 }
 0x20c   :  { %539 = vrsqrt.f32 %v407_v38  ;;  %v385_v25 = vmul.f32 0.03125, %v357_v39  ;;  %v390_v42 = vmul.f32 0.03125, %v367_v41 }
 0x20d   :  { %541 = vrsqrt.f32 %v398_v37 }
 0x20e   :  { %v401_v44 = vadd.f32 1e-05, %v385_v25  ;;  %v406_v45 = vadd.f32 1e-05, %v390_v42 }
 0x20f   :  { %v373_v46 = vpop.xlane.xlu1 %372 }
 0x210   :  { %v355_v49 = vpop.xlane.xlu0 %354  ;;  %543 = vrsqrt.f32 %v401_v44  ;;  %v393_v47 = vmul.f32 0.03125, %v373_v46 }
 0x211   :  { %v384_v48 = vmul.f32 0.03125, %v355_v49  ;;  %545 = vrsqrt.f32 %v406_v45 }
 0x212   :  { %v538_v54 = vpop.eup %537  ;;  %v409_v55 = vadd.f32 1e-05, %v393_v47 }
 0x213   :  { %v400_v56 = vadd.f32 1e-05, %v384_v48  ;;  %v431_v57 = vmul.f32 %v538_v54, %v732_v18 }
 0x214   :  { %v361_v60 = vpop.xlane.xlu1 %360  ;;  %v371_v61 = vpop.xlane.xlu0 %370  ;;  %547 = vrsqrt.f32 %v409_v55 }
 0x215   :  { %v387_v52 = vmul.f32 0.03125, %v361_v60  ;;  %v392_v53 = vmul.f32 0.03125, %v371_v61  ;;  %447 = vst [vmem:[%s892_s3 + $0x8] sm:$0xff] %v431_v57  ;;  %549 = vrsqrt.f32 %v400_v56 }
 0x216   :  { %v540_v1 = vpop.eup %539 }
 0x217   :  { %v403_v4 = vadd.f32 1e-05, %v387_v52  ;;  %v408_v6 = vadd.f32 1e-05, %v392_v53  ;;  %v542_v7 = vpop.eup %541  ;;  %v439_v8 = vmul.f32 %v540_v1, %v739_v22 }
 0x218   :  { %v377_v9 = vpop.xlane.xlu1 %376  ;;  %v359_v58 = vpop.xlane.xlu0 %358  ;;  %v430_v18 = vmul.f32 %v542_v7, %v742_v28 }
 0x219   :  { %551 = vrsqrt.f32 %v403_v4  ;;  %v395_v59 = vmul.f32 0.03125, %v377_v9  ;;  %v386_v12 = vmul.f32 0.03125, %v359_v58  ;;  %455 = vst [vmem:[%s892_s3 + $0x48] sm:$0xff] %v439_v8 }
 0x21a   :  { %553 = vrsqrt.f32 %v408_v6  ;;  %v544_v13 = vpop.eup %543  ;;  %446 = vst [vmem:[%s892_s3] sm:$0xff] %v430_v18 }
 0x21b   :  { %v411_v14 = vadd.f32 1e-05, %v395_v59  ;;  %v402_v15 = vadd.f32 1e-05, %v386_v12  ;;  %v546_v22 = vpop.eup %545  ;;  %v433_v16 = vmul.f32 %v544_v13, %v745_v29 }
 0x21c   :  { %v365_v17 = vpop.xlane.xlu1 %364  ;;  %v375_v28 = vpop.xlane.xlu0 %374  ;;  %v438_v63 = vmul.f32 %v546_v22, %v754_v40 }
 0x21d   :  { %555 = vrsqrt.f32 %v411_v14  ;;  %v389_v0 = vmul.f32 0.03125, %v365_v17  ;;  %v394_v20 = vmul.f32 0.03125, %v375_v28  ;;  %449 = vst [vmem:[%s892_s3 + $0x18] sm:$0xff] %v433_v16 }
 0x21e   :  { %557 = vrsqrt.f32 %v402_v15  ;;  %v548_v21 = vpop.eup %547  ;;  %454 = vst [vmem:[%s892_s3 + $0x40] sm:$0xff] %v438_v63 }
 0x21f   :  { %v405_v26 = vadd.f32 1e-05, %v389_v0  ;;  %v410_v27 = vadd.f32 1e-05, %v394_v20  ;;  %v550_v29 = vpop.eup %549  ;;  %v441_v3 = vmul.f32 %v548_v21, %v763_v43 }
 0x220   :  { %v381_v31 = vpop.xlane.xlu1 %380  ;;  %v363_v40 = vpop.xlane.xlu0 %362  ;;  %v432_v30 = vmul.f32 %v550_v29, %v766_v50 }
 0x221   :  { %559 = vrsqrt.f32 %v405_v26  ;;  %v397_v32 = vmul.f32 0.03125, %v381_v31  ;;  %v388_v33 = vmul.f32 0.03125, %v363_v40  ;;  %457 = vst [vmem:[%s892_s3 + $0x58] sm:$0xff] %v441_v3 }
 0x222   :  { %561 = vrsqrt.f32 %v410_v27  ;;  %448 = vst [vmem:[%s892_s3 + $0x10] sm:$0xff] %v432_v30 }
 0x223   :  { %v552_v34 = vpop.eup %551  ;;  %v413_v35 = vadd.f32 1e-05, %v397_v32  ;;  %v404_v36 = vadd.f32 1e-05, %v388_v33 }
 0x224   :  { %v554_v43 = vpop.eup %553  ;;  %v435_v38 = vmul.f32 %v552_v34, %v778_v62  ;;  %v379_v37 = vpop.xlane.xlu0 %378 }
 0x225   :  { %v440_v50 = vmul.f32 %v554_v43, %v769_v51  ;;  %563 = vrsqrt.f32 %v413_v35  ;;  %v396_v39 = vmul.f32 0.03125, %v379_v37 }
 0x226   :  { %451 = vst [vmem:[%s892_s3 + $0x28] sm:$0xff] %v435_v38  ;;  %565 = vrsqrt.f32 %v404_v36 }
 0x227   :  { %v556_v41 = vpop.eup %555  ;;  %456 = vst [vmem:[%s892_s3 + $0x50] sm:$0xff] %v440_v50  ;;  %v412_v25 = vadd.f32 1e-05, %v396_v39 }
 0x228   :  { %v558_v42 = vpop.eup %557  ;;  %v443_v44 = vmul.f32 %v556_v41, %v790_v10 }
 0x229   :  { %v434_v62 = vmul.f32 %v558_v42, %v787_v5  ;;  %567 = vrsqrt.f32 %v412_v25 }
 0x22a   :  { %459 = vst [vmem:[%s892_s3 + $0x68] sm:$0xff] %v443_v44 }
 0x22b   :  { %v560_v51 = vpop.eup %559  ;;  %450 = vst [vmem:[%s892_s3 + $0x20] sm:$0xff] %v434_v62 }
 0x22c   :  { %v562_v45 = vpop.eup %561  ;;  %v437_v46 = vmul.f32 %v560_v51, %v802_v19 }
 0x22d   :  { %v442_v49 = vmul.f32 %v562_v45, %v793_v11 }
 0x22e   :  { %453 = vst [vmem:[%s892_s3 + $0x38] sm:$0xff] %v437_v46 }
 0x22f   :  { %v564_v5 = vpop.eup %563  ;;  %458 = vst [vmem:[%s892_s3 + $0x60] sm:$0xff] %v442_v49 }
 0x230   :  { %v566_v10 = vpop.eup %565  ;;  %v445_v47 = vmul.f32 %v564_v5, %v814_v24 }
 0x231   :  { %v436_v48 = vmul.f32 %v566_v10, %v811_v23 }
 0x232   :  { %461 = vst [vmem:[%s892_s3 + $0x78] sm:$0xff] %v445_v47 }
 0x233   :  { %v568_v19 = vpop.eup %567  ;;  %452 = vst [vmem:[%s892_s3 + $0x30] sm:$0xff] %v436_v48 }
 0x234   :  { %v444_v11 = vmul.f32 %v568_v19, %v821_v2 }
 0x236   :  { %460 = vst [vmem:[%s892_s3 + $0x70] sm:$0xff] %v444_v11 }

// kernel: swt_backbone_forward.8
= control target key start
LH: loop header
LB: loop body
LE: loop exit
PB: predicated region body
PF: predicated region fallthrough
CT: control target
= control target key end

     0   :  { %s775_s1 = inlined_call_operand.vmem [shape: f32[512,128], index: 1, kind: input, shape index: {}]   ;;  %s776_s0 = inlined_call_operand.vmem [shape: f32[32,512], index: 0, kind: input, shape index: {}]   ;;  %s777_s2 = inlined_call_operand.vmem [shape: f32[1,128], index: 2, kind: input, shape index: {}]   ;;  %s778_s3 = inlined_call_operand.vmem [shape: f32[32,128], index: 3, kind: output, shape index: {}]  }
   0x1   :  { %v46_v0 = vld [vmem:[%s775_s1 + $0x80] sm:$0xff]  ;;  %v47_v1 = vld [vmem:[%s775_s1 + $0x88] sm:$0xff]  ;;  %v48_v11 = vld [vmem:[%s775_s1 + $0x90] sm:$0xff] }
   0x2   :  { %v30_v2 = vld [vmem:[%s775_s1] sm:$0xff]  ;;  %v426_v3 = vpack.c.bf16 %v47_v1, %v46_v0  ;;  %v31_v4 = vld [vmem:[%s775_s1 + $0x8] sm:$0xff]  ;;  %v49_v13 = vld [vmem:[%s775_s1 + $0x98] sm:$0xff] }
   0x3   :  { %v78_v5 = vld [vmem:[%s775_s1 + $0x180] sm:$0xff]  ;;  %v79_v6 = vld [vmem:[%s775_s1 + $0x188] sm:$0xff]  ;;  %v428_v7 = vpack.c.bf16 %v31_v4, %v30_v2  ;;  %v32_v14 = vld [vmem:[%s775_s1 + $0x10] sm:$0xff]  ;;  %v430_v16 = vpack.c.bf16 %v49_v13, %v48_v11 }
   0x4   :  { %v458_v8 = vpack.c.bf16 %v79_v6, %v78_v5  ;;  %v62_v9 = vld [vmem:[%s775_s1 + $0x100] sm:$0xff]  ;;  %v63_v10 = vld [vmem:[%s775_s1 + $0x108] sm:$0xff]  ;;  %427 = vmatprep.subr.bf16.mxu0 %v426_v3  ;;  %v33_v15 = vld [vmem:[%s775_s1 + $0x18] sm:$0xff] }
   0x5   :  { %v460_v12 = vpack.c.bf16 %v63_v10, %v62_v9  ;;  %429 = vmatpush3.bf16.msra.mxu0 %v428_v7  ;;  %v432_v17 = vpack.c.bf16 %v33_v15, %v32_v14  ;;  %v80_v18 = vld [vmem:[%s775_s1 + $0x190] sm:$0xff]  ;;  %v81_v19 = vld [vmem:[%s775_s1 + $0x198] sm:$0xff]  ;;  %v50_v23 = vld [vmem:[%s775_s1 + $0xa0] sm:$0xff] }
   0x6   :  { %459 = vmatprep.subr.bf16.mxu1 %v458_v8  ;;  %v64_v20 = vld [vmem:[%s775_s1 + $0x110] sm:$0xff]  ;;  %v462_v21 = vpack.c.bf16 %v81_v19, %v80_v18  ;;  %v65_v22 = vld [vmem:[%s775_s1 + $0x118] sm:$0xff]  ;;  %v51_v24 = vld [vmem:[%s775_s1 + $0xa8] sm:$0xff]  ;;  %431 = vmatprep.subr.bf16.mxu0 %v430_v16 }
   0x7   :  { %461 = vmatpush3.bf16.msra.mxu1 %v460_v12  ;;  %v464_v25 = vpack.c.bf16 %v65_v22, %v64_v20  ;;  %v434_v26 = vpack.c.bf16 %v51_v24, %v50_v23  ;;  %v34_v27 = vld [vmem:[%s775_s1 + $0x20] sm:$0xff]  ;;  %v35_v28 = vld [vmem:[%s775_s1 + $0x28] sm:$0xff]  ;;  %v52_v35 = vld [vmem:[%s775_s1 + $0xb0] sm:$0xff] }
   0x8   :  { %v82_v29 = vld [vmem:[%s775_s1 + $0x1a0] sm:$0xff]  ;;  %463 = vmatprep.subr.bf16.mxu1 %v462_v21  ;;  %v83_v30 = vld [vmem:[%s775_s1 + $0x1a8] sm:$0xff]  ;;  %v436_v33 = vpack.c.bf16 %v35_v28, %v34_v27  ;;  %v53_v36 = vld [vmem:[%s775_s1 + $0xb8] sm:$0xff] }
   0x9   :  { %v66_v31 = vld [vmem:[%s775_s1 + $0x120] sm:$0xff]  ;;  %v67_v32 = vld [vmem:[%s775_s1 + $0x128] sm:$0xff]  ;;  %433 = vmatpush3.bf16.msra.mxu0 %v432_v17  ;;  %v466_v34 = vpack.c.bf16 %v83_v30, %v82_v29  ;;  %v36_v37 = vld [vmem:[%s775_s1 + $0x30] sm:$0xff]  ;;  %v438_v39 = vpack.c.bf16 %v53_v36, %v52_v35 }
   0xa   :  { %435 = vmatprep.subr.bf16.mxu0 %v434_v26  ;;  %v468_v38 = vpack.c.bf16 %v67_v32, %v66_v31  ;;  %v37_v40 = vld [vmem:[%s775_s1 + $0x38] sm:$0xff]  ;;  %v84_v41 = vld [vmem:[%s775_s1 + $0x1b0] sm:$0xff]  ;;  %v54_v46 = vld [vmem:[%s775_s1 + $0xc0] sm:$0xff] }
   0xb   :  { %465 = vmatpush3.bf16.msra.mxu1 %v464_v25  ;;  %v85_v42 = vld [vmem:[%s775_s1 + $0x1b8] sm:$0xff]  ;;  %v68_v44 = vld [vmem:[%s775_s1 + $0x130] sm:$0xff]  ;;  %v55_v47 = vld [vmem:[%s775_s1 + $0xc8] sm:$0xff]  ;;  %v440_v48 = vpack.c.bf16 %v37_v40, %v36_v37 }
   0xc   :  { %467 = vmatprep.subr.bf16.mxu1 %v466_v34  ;;  %v470_v43 = vpack.c.bf16 %v85_v42, %v84_v41  ;;  %v69_v45 = vld [vmem:[%s775_s1 + $0x138] sm:$0xff]  ;;  %v86_v49 = vld [vmem:[%s775_s1 + $0x1c0] sm:$0xff]  ;;  %v87_v50 = vld [vmem:[%s775_s1 + $0x1c8] sm:$0xff]  ;;  %v442_v52 = vpack.c.bf16 %v55_v47, %v54_v46 }
   0xd   :  { %437 = vmatpush3.bf16.msra.mxu0 %v436_v33  ;;  %v472_v51 = vpack.c.bf16 %v69_v45, %v68_v44  ;;  %v38_v53 = vld [vmem:[%s775_s1 + $0x40] sm:$0xff]  ;;  %v39_v54 = vld [vmem:[%s775_s1 + $0x48] sm:$0xff]  ;;  %v474_v56 = vpack.c.bf16 %v87_v50, %v86_v49  ;;  %v56_v58 = vld [vmem:[%s775_s1 + $0xd0] sm:$0xff] }
   0xe   :  { %439 = vmatprep.subr.bf16.mxu0 %v438_v39  ;;  %v70_v55 = vld [vmem:[%s775_s1 + $0x140] sm:$0xff]  ;;  %v71_v57 = vld [vmem:[%s775_s1 + $0x148] sm:$0xff]  ;;  %v57_v59 = vld [vmem:[%s775_s1 + $0xd8] sm:$0xff]  ;;  %v444_v62 = vpack.c.bf16 %v39_v54, %v38_v53 }
   0xf   :  { %469 = vmatpush3.bf16.msra.mxu1 %v468_v38  ;;  %v88_v60 = vld [vmem:[%s775_s1 + $0x1d0] sm:$0xff]  ;;  %v89_v61 = vld [vmem:[%s775_s1 + $0x1d8] sm:$0xff]  ;;  %v476_v63 = vpack.c.bf16 %v71_v57, %v70_v55  ;;  %v446_v0 = vpack.c.bf16 %v57_v59, %v56_v58  ;;  %v58_v6 = vld [vmem:[%s775_s1 + $0xe0] sm:$0xff] }
  0x10   :  { %471 = vmatprep.subr.bf16.mxu1 %v470_v43  ;;  %v40_v1 = vld [vmem:[%s775_s1 + $0x50] sm:$0xff]  ;;  %v41_v2 = vld [vmem:[%s775_s1 + $0x58] sm:$0xff]  ;;  %v478_v4 = vpack.c.bf16 %v89_v61, %v88_v60  ;;  %v59_v7 = vld [vmem:[%s775_s1 + $0xe8] sm:$0xff]  ;;  %v499_v61 = vmov 0.0  }
  0x11   :  { %441 = vmatpush3.bf16.msra.mxu0 %v440_v48  ;;  %v72_v3 = vld [vmem:[%s775_s1 + $0x150] sm:$0xff]  ;;  %v73_v5 = vld [vmem:[%s775_s1 + $0x158] sm:$0xff]  ;;  %v90_v8 = vld [vmem:[%s775_s1 + $0x1e0] sm:$0xff]  ;;  %v448_v10 = vpack.c.bf16 %v41_v2, %v40_v1  ;;  %v450_v14 = vpack.c.bf16 %v59_v7, %v58_v6  ;;  %v271_v48 = vlaneseq }
  0x12   :  { %443 = vmatprep.subr.bf16.mxu0 %v442_v52  ;;  %v91_v9 = vld [vmem:[%s775_s1 + $0x1e8] sm:$0xff]  ;;  %v42_v11 = vld [vmem:[%s775_s1 + $0x60] sm:$0xff]  ;;  %v480_v13 = vpack.c.bf16 %v73_v5, %v72_v3  ;;  %v60_v19 = vld [vmem:[%s775_s1 + $0xf0] sm:$0xff] }
  0x13   :  { %473 = vmatpush3.bf16.msra.mxu1 %v472_v51  ;;  %v43_v12 = vld [vmem:[%s775_s1 + $0x68] sm:$0xff]  ;;  %v74_v15 = vld [vmem:[%s775_s1 + $0x160] sm:$0xff]  ;;  %v482_v18 = vpack.c.bf16 %v91_v9, %v90_v8  ;;  %v61_v20 = vld [vmem:[%s775_s1 + $0xf8] sm:$0xff]  ;;  %v272_v49 = vand.u32 127, %v271_v48 }
  0x14   :  { %475 = vmatprep.subr.bf16.mxu1 %v474_v56  ;;  %v75_v16 = vld [vmem:[%s775_s1 + $0x168] sm:$0xff]  ;;  %v17_v21 = vld [vmem:[%s776_s0 + $0x18] sm:$0xff]  ;;  %v92_v22 = vld [vmem:[%s775_s1 + $0x1f0] sm:$0xff]  ;;  %v452_v24 = vpack.c.bf16 %v43_v12, %v42_v11  ;;  %v454_v26 = vpack.c.bf16 %v61_v20, %v60_v19 }
  0x15   :  { %445 = vmatpush3.bf16.msra.mxu0 %v444_v62  ;;  %v15_v17 = vld [vmem:[%s776_s0 + $0x8] sm:$0xff]  ;;  %v93_v23 = vld [vmem:[%s775_s1 + $0x1f8] sm:$0xff]  ;;  %250 = vmatprep.mubr.f32.mxu1 %v17_v21  ;;  %v484_v25 = vpack.c.bf16 %v75_v16, %v74_v15  ;;  %v44_v27 = vld [vmem:[%s775_s1 + $0x70] sm:$0xff]  ;;  %vm273_vm0 = vcmp.lt.s32.totalorder %v272_v49, 64 }
  0x16   :  { %447 = vmatprep.subr.bf16.mxu0 %v446_v0  ;;  %165 = vmatprep.mubr.f32.mxu0 %v15_v17  ;;  %v45_v28 = vld [vmem:[%s775_s1 + $0x78] sm:$0xff]  ;;  %v486_v29 = vpack.c.bf16 %v93_v23, %v92_v22  ;;  %v76_v30 = vld [vmem:[%s775_s1 + $0x170] sm:$0xff]  ;;  %v14_v34 = vld [vmem:[%s776_s0] sm:$0xff]  ;;  %v337_v62 = vsel %vm273_vm0, 1.0, %v499_v61 }
  0x17   :  { %477 = vmatpush3.bf16.msra.mxu1 %v476_v63  ;;  %v77_v31 = vld [vmem:[%s775_s1 + $0x178] sm:$0xff]  ;;  %v456_v32 = vpack.c.bf16 %v45_v28, %v44_v27  ;;  %v16_v35 = vld [vmem:[%s776_s0 + $0x10] sm:$0xff]  ;;  %v19_v36 = vld [vmem:[%s776_s0 + $0x28] sm:$0xff] }
  0x18   :  { %479 = vmatprep.subr.bf16.mxu1 %v478_v4  ;;  %v488_v33 = vpack.c.bf16 %v77_v31, %v76_v30  ;;  %v21_v37 = vld [vmem:[%s776_s0 + $0x38] sm:$0xff]  ;;  %v18_v38 = vld [vmem:[%s776_s0 + $0x20] sm:$0xff]  ;;  %v20_v39 = vld [vmem:[%s776_s0 + $0x30] sm:$0xff] }
  0x19   :  { %449 = vmatpush3.bf16.msra.mxu0 %v448_v10  ;;  %v23_v40 = vld [vmem:[%s776_s0 + $0x48] sm:$0xff]  ;;  %v25_v41 = vld [vmem:[%s776_s0 + $0x58] sm:$0xff]  ;;  %v22_v42 = vld [vmem:[%s776_s0 + $0x40] sm:$0xff] }
  0x1a   :  { %451 = vmatprep.subr.bf16.mxu0 %v450_v14  ;;  %v24_v43 = vld [vmem:[%s776_s0 + $0x50] sm:$0xff]  ;;  %v27_v44 = vld [vmem:[%s776_s0 + $0x68] sm:$0xff]  ;;  %v29_v45 = vld [vmem:[%s776_s0 + $0x78] sm:$0xff] }
  0x1b   :  { %481 = vmatpush3.bf16.msra.mxu1 %v480_v13  ;;  %v26_v46 = vld [vmem:[%s776_s0 + $0x60] sm:$0xff]  ;;  %v28_v47 = vld [vmem:[%s776_s0 + $0x70] sm:$0xff] }
  0x1c   :  { %483 = vmatprep.subr.bf16.mxu1 %v482_v18  ;;  %v336_v51 = vld [vmem:[%s777_s2] ss:$0 sm:$0xff] }
  0x1d   :  { %453 = vmatpush3.bf16.msra.mxu0 %v452_v24 }
  0x1e   :  { %455 = vmatprep.subr.bf16.mxu0 %v454_v26 }
  0x1f   :  { %485 = vmatpush3.bf16.msra.mxu1 %v484_v25 }
  0x20   :  { %487 = vmatprep.subr.bf16.mxu1 %v486_v29 }
  0x21   :  { %457 = vmatpush3.bf16.msra.mxu0 %v456_v32 }
  0x23   :  { %489 = vmatpush3.bf16.msra.mxu1 %v488_v33 }
  0x24   :  { %166 = vmatmul.mubr.f32.vlgmr.msra.gmra.mrb[0].mxu0 %v14_v34 }
  0x25   :  { %170 = vmatprep.mubr.f32.mxu0 %v19_v36 }
  0x26   :  { %251 = vmatmul.mubr.f32.vlgmr.msra.gmra.mrb[0].mxu1 %v16_v35 }
  0x27   :  { %255 = vmatprep.mubr.f32.mxu1 %v21_v37 }
  0x28   :  { %171 = vmatmul.mubr.f32.gmra.mrb[2].mxu0 %v18_v38 }
  0x29   :  { %175 = vmatprep.mubr.f32.mxu0 %v23_v40 }
  0x2a   :  { %256 = vmatmul.mubr.f32.gmra.mrb[2].mxu1 %v20_v39 }
  0x2b   :  { %260 = vmatprep.mubr.f32.mxu1 %v25_v41 }
  0x2c   :  { %176 = vmatmul.mubr.f32.gmra.mrb[4].mxu0 %v22_v42 }
  0x2d   :  { %180 = vmatprep.mubr.f32.mxu0 %v27_v44 }
  0x2e   :  { %261 = vmatmul.mubr.f32.gmra.mrb[4].mxu1 %v24_v43 }
  0x2f   :  { %265 = vmatprep.mubr.f32.mxu1 %v29_v45 }
  0x30   :  { %181 = vmatmul.mubr.f32.gmra.mrb[6].mxu0 %v26_v46 }
  0x32   :  { %266 = vmatmul.mubr.f32.gmra.mrb[6].mxu1 %v28_v47 }
  0xf7   :  { %v370_v50 = vpop.f32.mrb[0].mxu0 }
  0xf8   :  { %v371_v52 = vpop.f32.mrb[1].mxu0 }
  0xf9   :  { %v414_v53 = vpop.f32.mrb[0].mxu1  ;;  %v372_v54 = vadd.f32 %v371_v52, %v370_v50 }
  0xfa   :  { %v415_v55 = vpop.f32.mrb[1].mxu1 }
  0xfb   :  { %v416_v56 = vadd.f32 %v415_v55, %v414_v53  ;;  %v168_v57 = vadd.f32 %v372_v54, %v336_v51  ;;  %v373_v58 = vpop.f32.mrb[2].mxu0 }
  0xfc   :  { %v374_v59 = vpop.f32.mrb[3].mxu0 }
  0xfd   :  { %v417_v60 = vpop.f32.mrb[2].mxu1  ;;  %v375_v63 = vadd.f32 %v374_v59, %v373_v58  ;;  %v253_v1 = vadd.f32 %v416_v56, %v168_v57 }
  0xfe   :  { %v418_v0 = vpop.f32.mrb[3].mxu1 }
  0xff   :  { %v419_v2 = vadd.f32 %v418_v0, %v417_v60  ;;  %v173_v3 = vadd.f32 %v375_v63, %v336_v51  ;;  %v376_v4 = vpop.f32.mrb[4].mxu0  ;;  %v276_v5 = vmul.f32 %v337_v62, %v253_v1 }
 0x100   :  { %v377_v6 = vpop.f32.mrb[5].mxu0 }
 0x101   :  { %v420_v7 = vpop.f32.mrb[4].mxu1  ;;  %v258_v8 = vadd.f32 %v419_v2, %v173_v3  ;;  %v378_v9 = vadd.f32 %v377_v6, %v376_v4  ;;  %280 = vadd.xlane.f32.xlu0 %v276_v5 }
 0x102   :  { %v421_v10 = vpop.f32.mrb[5].mxu1 }
 0x103   :  { %v422_v11 = vadd.f32 %v421_v10, %v420_v7  ;;  %v178_v12 = vadd.f32 %v378_v9, %v336_v51  ;;  %v379_v13 = vpop.f32.mrb[6].mxu0  ;;  %v277_v14 = vmul.f32 %v337_v62, %v258_v8 }
 0x104   :  { %v380_v15 = vpop.f32.mrb[7].mxu0 }
 0x105   :  { %v423_v16 = vpop.f32.mrb[6].mxu1  ;;  %v381_v17 = vadd.f32 %v380_v15, %v379_v13  ;;  %282 = vadd.xlane.f32.xlu0 %v277_v14  ;;  %v263_v19 = vadd.f32 %v422_v11, %v178_v12 }
 0x106   :  { %v424_v18 = vpop.f32.mrb[7].mxu1 }
 0x107   :  { %v425_v20 = vadd.f32 %v424_v18, %v423_v16  ;;  %v183_v21 = vadd.f32 %v381_v17, %v336_v51  ;;  %v278_v22 = vmul.f32 %v337_v62, %v263_v19 }
 0x109   :  { %v268_v23 = vadd.f32 %v425_v20, %v183_v21  ;;  %284 = vadd.xlane.f32.xlu1 %v278_v22 }
 0x10b   :  { %v279_v24 = vmul.f32 %v337_v62, %v268_v23 }
 0x10d   :  { %286 = vadd.xlane.f32.xlu1 %v279_v24 }
 0x18e   :  { %v281_v25 = vpop.xlane.xlu0 %280 }
 0x18f   :  { %v288_v26 = vmul.f32 0.015625, %v281_v25 }
 0x191   :  { %v292_v27 = vsub.f32 %v253_v1, %v288_v26 }
 0x192   :  { %v283_v28 = vpop.xlane.xlu0 %282 }
 0x193   :  { %v289_v29 = vmul.f32 0.015625, %v283_v28  ;;  %v296_v30 = vmul.f32 %v337_v62, %v292_v27 }
 0x195   :  { %v293_v31 = vsub.f32 %v258_v8, %v289_v29  ;;  %v300_v32 = vmul.f32 %v296_v30, %v296_v30 }
 0x196   :  { %v285_v33 = vpop.xlane.xlu1 %284 }
 0x197   :  { %v290_v34 = vmul.f32 0.015625, %v285_v33  ;;  %304 = vadd.xlane.f32.xlu0 %v300_v32  ;;  %v297_v35 = vmul.f32 %v337_v62, %v293_v31 }
 0x199   :  { %v294_v36 = vsub.f32 %v263_v19, %v290_v34  ;;  %v301_v37 = vmul.f32 %v297_v35, %v297_v35 }
 0x19a   :  { %v287_v38 = vpop.xlane.xlu1 %286 }
 0x19b   :  { %v291_v39 = vmul.f32 0.015625, %v287_v38  ;;  %306 = vadd.xlane.f32.xlu1 %v301_v37  ;;  %v298_v40 = vmul.f32 %v337_v62, %v294_v36 }
 0x19d   :  { %v295_v41 = vsub.f32 %v268_v23, %v291_v39  ;;  %v302_v42 = vmul.f32 %v298_v40, %v298_v40 }
 0x19f   :  { %308 = vadd.xlane.f32.xlu0 %v302_v42  ;;  %v299_v43 = vmul.f32 %v337_v62, %v295_v41 }
 0x1a1   :  { %v303_v44 = vmul.f32 %v299_v43, %v299_v43 }
 0x1a3   :  { %310 = vadd.xlane.f32.xlu1 %v303_v44 }
 0x224   :  { %v305_v45 = vpop.xlane.xlu0 %304 }
 0x225   :  { %v312_v46 = vmul.f32 0.015625, %v305_v45 }
 0x227   :  { %v316_v47 = vadd.f32 1e-05, %v312_v46 }
 0x228   :  { %v307_v48 = vpop.xlane.xlu1 %306 }
 0x229   :  { %491 = vrsqrt.f32 %v316_v47  ;;  %v313_v49 = vmul.f32 0.015625, %v307_v48 }
 0x22b   :  { %v317_v50 = vadd.f32 1e-05, %v313_v49 }
 0x22c   :  { %v309_v51 = vpop.xlane.xlu0 %308 }
 0x22d   :  { %493 = vrsqrt.f32 %v317_v50  ;;  %v314_v52 = vmul.f32 0.015625, %v309_v51 }
 0x22f   :  { %v318_v53 = vadd.f32 1e-05, %v314_v52 }
 0x230   :  { %v311_v54 = vpop.xlane.xlu1 %310 }
 0x231   :  { %495 = vrsqrt.f32 %v318_v53  ;;  %v315_v55 = vmul.f32 0.015625, %v311_v54 }
 0x233   :  { %v492_v56 = vpop.eup %491  ;;  %v319_v57 = vadd.f32 1e-05, %v315_v55 }
 0x234   :  { %v324_v58 = vmul.f32 %v492_v56, %v296_v30 }
 0x235   :  { %497 = vrsqrt.f32 %v319_v57 }
 0x236   :  { %328 = vst [vmem:[%s778_s3] sm:$0xff] %v324_v58 }
 0x237   :  { %v494_v59 = vpop.eup %493 }
 0x238   :  { %v325_v60 = vmul.f32 %v494_v59, %v297_v35 }
 0x23a   :  { %329 = vst [vmem:[%s778_s3 + $0x8] sm:$0xff] %v325_v60 }
 0x23b   :  { %v496_v61 = vpop.eup %495 }
 0x23c   :  { %v326_v62 = vmul.f32 %v496_v61, %v298_v40 }
 0x23e   :  { %330 = vst [vmem:[%s778_s3 + $0x10] sm:$0xff] %v326_v62 }
 0x23f   :  { %v498_v63 = vpop.eup %497 }
 0x240   :  { %v327_v0 = vmul.f32 %v498_v63, %v299_v43 }
 0x242   :  { %331 = vst [vmem:[%s778_s3 + $0x18] sm:$0xff] %v327_v0 }

// kernel: swt_backbone_forward.7
= control target key start
LH: loop header
LB: loop body
LE: loop exit
PB: predicated region body
PF: predicated region fallthrough
CT: control target
= control target key end

     0   :  { %v36_v0 = vlaneseq  ;;  %v1089_v4 = vmov 0.0   ;;  %s1692_s0 = inlined_call_operand.vmem [shape: f32[128,128], index: 0, kind: input, shape index: {}]   ;;  %s1693_s1 = inlined_call_operand.vmem [shape: f32[128,128], index: 1, kind: input, shape index: {}]   ;;  %s1694_s3 = inlined_call_operand.vmem [shape: f32[128,128], index: 3, kind: input, shape index: {}]   ;;  %s1695_s2 = inlined_call_operand.vmem [shape: f32[1,128], index: 2, kind: input, shape index: {}]   ;;  %s1696_s4 = inlined_call_operand.vmem [shape: f32[1,128], index: 4, kind: input, shape index: {}]   ;;  %s1697_s5 = inlined_call_operand.vmem [shape: f32[128,128], index: 5, kind: output, shape index: {}]  }
   0x1   :  { %v1123_v2 = vld [vmem:[%s1692_s0] sm:$0xff]  ;;  %v1128_v3 = vld [vmem:[%s1692_s0 + $0x10] sm:$0xff]  ;;  %v1135_v6 = vld [vmem:[%s1692_s0 + $0x8] sm:$0xff] }
   0x2   :  { %v37_v1 = vand.u32 127, %v36_v0  ;;  %v1140_v7 = vld [vmem:[%s1692_s0 + $0x18] sm:$0xff]  ;;  %v1153_v12 = vld [vmem:[%s1692_s0 + $0x20] sm:$0xff]  ;;  %v1158_v13 = vld [vmem:[%s1692_s0 + $0x28] sm:$0xff] }
   0x3   :  { %v1167_v16 = vld [vmem:[%s1692_s0 + $0x30] sm:$0xff]  ;;  %v1172_v17 = vld [vmem:[%s1692_s0 + $0x38] sm:$0xff]  ;;  %v1181_v20 = vld [vmem:[%s1692_s0 + $0x40] sm:$0xff] }
   0x4   :  { %vm38_vm0 = vcmp.lt.s32.totalorder %v37_v1, 32  ;;  %v1186_v21 = vld [vmem:[%s1692_s0 + $0x48] sm:$0xff]  ;;  %v1195_v24 = vld [vmem:[%s1692_s0 + $0x50] sm:$0xff]  ;;  %v1200_v25 = vld [vmem:[%s1692_s0 + $0x58] sm:$0xff] }
   0x5   :  { %v1130_v5 = vsel %vm38_vm0, 1.0, %v1089_v4  ;;  %v1209_v28 = vld [vmem:[%s1692_s0 + $0x60] sm:$0xff]  ;;  %v1214_v29 = vld [vmem:[%s1692_s0 + $0x68] sm:$0xff]  ;;  %v1223_v32 = vld [vmem:[%s1692_s0 + $0x70] sm:$0xff] }
   0x6   :  { %v41_v8 = vmul.f32 %v1130_v5, %v1123_v2  ;;  %v43_v9 = vmul.f32 %v1130_v5, %v1128_v3  ;;  %v42_v10 = vmul.f32 %v1130_v5, %v1135_v6  ;;  %v44_v11 = vmul.f32 %v1130_v5, %v1140_v7  ;;  %v1228_v33 = vld [vmem:[%s1692_s0 + $0x78] sm:$0xff]  ;;  %v249_v36 = vld [vmem:[%s1693_s1] sm:$0xff]  ;;  %v250_v37 = vld [vmem:[%s1693_s1 + $0x8] sm:$0xff] }
   0x7   :  { %v45_v14 = vmul.f32 %v1130_v5, %v1153_v12  ;;  %v46_v15 = vmul.f32 %v1130_v5, %v1158_v13  ;;  %v47_v18 = vmul.f32 %v1130_v5, %v1167_v16  ;;  %v48_v19 = vmul.f32 %v1130_v5, %v1172_v17  ;;  %v251_v38 = vld [vmem:[%s1693_s1 + $0x10] sm:$0xff]  ;;  %v252_v40 = vld [vmem:[%s1693_s1 + $0x18] sm:$0xff]  ;;  %v253_v42 = vld [vmem:[%s1693_s1 + $0x20] sm:$0xff] }
   0x8   :  { %57 = vadd.xlane.f32.xlu0 %v41_v8  ;;  %61 = vadd.xlane.f32.xlu1 %v43_v9  ;;  %v49_v22 = vmul.f32 %v1130_v5, %v1181_v20  ;;  %v50_v23 = vmul.f32 %v1130_v5, %v1186_v21  ;;  %v51_v26 = vmul.f32 %v1130_v5, %v1195_v24  ;;  %v254_v43 = vld [vmem:[%s1693_s1 + $0x28] sm:$0xff] }
   0x9   :  { %v52_v27 = vmul.f32 %v1130_v5, %v1200_v25  ;;  %v53_v30 = vmul.f32 %v1130_v5, %v1209_v28  ;;  %v54_v31 = vmul.f32 %v1130_v5, %v1214_v29  ;;  %v55_v34 = vmul.f32 %v1130_v5, %v1223_v32 }
   0xa   :  { %v56_v35 = vmul.f32 %v1130_v5, %v1228_v33  ;;  %v944_v39 = vpack.c.bf16 %v250_v37, %v249_v36  ;;  %v948_v41 = vpack.c.bf16 %v252_v40, %v251_v38  ;;  %v952_v44 = vpack.c.bf16 %v254_v43, %v253_v42 }
   0xc   :  { %59 = vadd.xlane.f32.xlu0 %v42_v10  ;;  %63 = vadd.xlane.f32.xlu1 %v44_v11 }
   0xd   :  { %945 = vmatprep.subr.bf16.mxu0 %v944_v39 }
   0xe   :  { %947 = vmatpush3.bf16.msra.mxu0 %v944_v39 }
   0xf   :  { %949 = vmatprep.subr.bf16.mxu0 %v948_v41 }
  0x10   :  { %65 = vadd.xlane.f32.xlu0 %v45_v14  ;;  %67 = vadd.xlane.f32.xlu1 %v46_v15 }
  0x12   :  { %951 = vmatpush3.bf16.msra.mxu0 %v948_v41 }
  0x13   :  { %953 = vmatprep.subr.bf16.mxu0 %v952_v44 }
  0x14   :  { %69 = vadd.xlane.f32.xlu0 %v47_v18  ;;  %71 = vadd.xlane.f32.xlu1 %v48_v19 }
  0x16   :  { %955 = vmatpush3.bf16.msra.mxu0 %v952_v44 }
  0x18   :  { %73 = vadd.xlane.f32.xlu0 %v49_v22  ;;  %75 = vadd.xlane.f32.xlu1 %v50_v23 }
  0x1c   :  { %77 = vadd.xlane.f32.xlu0 %v51_v26  ;;  %79 = vadd.xlane.f32.xlu1 %v52_v27 }
  0x20   :  { %81 = vadd.xlane.f32.xlu0 %v53_v30  ;;  %83 = vadd.xlane.f32.xlu1 %v54_v31 }
  0x24   :  { %85 = vadd.xlane.f32.xlu0 %v55_v34  ;;  %87 = vadd.xlane.f32.xlu1 %v56_v35 }
  0x95   :  { %v58_v45 = vpop.xlane.xlu0 %57  ;;  %v62_v46 = vpop.xlane.xlu1 %61 }
  0x96   :  { %v89_v47 = vmul.f32 0.03125, %v58_v45  ;;  %v91_v48 = vmul.f32 0.03125, %v62_v46 }
  0x98   :  { %v105_v49 = vsub.f32 %v1123_v2, %v89_v47  ;;  %v107_v50 = vsub.f32 %v1128_v3, %v91_v48 }
  0x99   :  { %v60_v51 = vpop.xlane.xlu0 %59  ;;  %v64_v52 = vpop.xlane.xlu1 %63 }
  0x9a   :  { %v90_v53 = vmul.f32 0.03125, %v60_v51  ;;  %v92_v54 = vmul.f32 0.03125, %v64_v52  ;;  %v1255_v55 = vmul.f32 %v1130_v5, %v105_v49  ;;  %v1258_v56 = vmul.f32 %v1130_v5, %v107_v50  ;;  %v258_v52 = vld [vmem:[%s1693_s1 + $0x48] sm:$0xff] }
  0x9c   :  { %v106_v57 = vsub.f32 %v1135_v6, %v90_v53  ;;  %v108_v58 = vsub.f32 %v1140_v7, %v92_v54  ;;  %v137_v59 = vmul.f32 %v1255_v55, %v1255_v55  ;;  %v139_v62 = vmul.f32 %v1258_v56, %v1258_v56 }
  0x9d   :  { %v66_v60 = vpop.xlane.xlu0 %65  ;;  %v68_v61 = vpop.xlane.xlu1 %67 }
  0x9e   :  { %v93_v63 = vmul.f32 0.03125, %v66_v60  ;;  %153 = vadd.xlane.f32.xlu0 %v137_v59  ;;  %v94_v0 = vmul.f32 0.03125, %v68_v61  ;;  %v1267_v1 = vmul.f32 %v1130_v5, %v106_v57  ;;  %v1270_v2 = vmul.f32 %v1130_v5, %v108_v58 }
  0xa0   :  { %v109_v3 = vsub.f32 %v1153_v12, %v93_v63  ;;  %v110_v4 = vsub.f32 %v1158_v13, %v94_v0  ;;  %v138_v6 = vmul.f32 %v1267_v1, %v1267_v1  ;;  %v140_v9 = vmul.f32 %v1270_v2, %v1270_v2 }
  0xa1   :  { %v70_v7 = vpop.xlane.xlu0 %69  ;;  %v72_v8 = vpop.xlane.xlu1 %71 }
  0xa2   :  { %v95_v10 = vmul.f32 0.03125, %v70_v7  ;;  %157 = vadd.xlane.f32.xlu0 %v139_v62  ;;  %155 = vadd.xlane.f32.xlu1 %v138_v6  ;;  %v96_v11 = vmul.f32 0.03125, %v72_v8  ;;  %v1279_v14 = vmul.f32 %v1130_v5, %v109_v3  ;;  %v1282_v15 = vmul.f32 %v1130_v5, %v110_v4  ;;  %v260_v3 = vld [vmem:[%s1693_s1 + $0x58] sm:$0xff] }
  0xa4   :  { %v111_v12 = vsub.f32 %v1167_v16, %v95_v10  ;;  %v112_v13 = vsub.f32 %v1172_v17, %v96_v11  ;;  %v141_v18 = vmul.f32 %v1279_v14, %v1279_v14  ;;  %v142_v23 = vmul.f32 %v1282_v15, %v1282_v15 }
  0xa5   :  { %v74_v19 = vpop.xlane.xlu0 %73  ;;  %v76_v22 = vpop.xlane.xlu1 %75 }
  0xa6   :  { %v97_v26 = vmul.f32 0.03125, %v74_v19  ;;  %159 = vadd.xlane.f32.xlu1 %v140_v9  ;;  %161 = vadd.xlane.f32.xlu0 %v141_v18  ;;  %v98_v27 = vmul.f32 0.03125, %v76_v22  ;;  %v1291_v30 = vmul.f32 %v1130_v5, %v111_v12  ;;  %v1294_v31 = vmul.f32 %v1130_v5, %v112_v13  ;;  %v263_v18 = vld [vmem:[%s1693_s1 + $0x70] sm:$0xff]  ;;  %v264_v19 = vld [vmem:[%s1693_s1 + $0x78] sm:$0xff] }
  0xa7   :  { %v972_v22 = vpack.c.bf16 %v264_v19, %v263_v18 }
  0xa8   :  { %v113_v16 = vsub.f32 %v1181_v20, %v97_v26  ;;  %v114_v17 = vsub.f32 %v1186_v21, %v98_v27  ;;  %v143_v34 = vmul.f32 %v1291_v30, %v1291_v30  ;;  %v144_v37 = vmul.f32 %v1294_v31, %v1294_v31  ;;  %v255_v20 = vld [vmem:[%s1693_s1 + $0x30] sm:$0xff]  ;;  %v256_v21 = vld [vmem:[%s1693_s1 + $0x38] sm:$0xff] }
  0xa9   :  { %v78_v35 = vpop.xlane.xlu0 %77  ;;  %v80_v36 = vpop.xlane.xlu1 %79  ;;  %v956_v42 = vpack.c.bf16 %v256_v21, %v255_v20 }
  0xaa   :  { %v99_v38 = vmul.f32 0.03125, %v78_v35  ;;  %163 = vadd.xlane.f32.xlu1 %v142_v23  ;;  %165 = vadd.xlane.f32.xlu0 %v143_v34  ;;  %v100_v39 = vmul.f32 0.03125, %v80_v36  ;;  %v1303_v40 = vmul.f32 %v1130_v5, %v113_v16  ;;  %v1306_v41 = vmul.f32 %v1130_v5, %v114_v17 }
  0xab   :  { %957 = vmatprep.subr.bf16.mxu0 %v956_v42 }
  0xac   :  { %v115_v43 = vsub.f32 %v1195_v24, %v99_v38  ;;  %v116_v44 = vsub.f32 %v1200_v25, %v100_v39  ;;  %v145_v45 = vmul.f32 %v1303_v40, %v1303_v40  ;;  %v146_v48 = vmul.f32 %v1306_v41, %v1306_v41  ;;  %959 = vmatpush3.bf16.msra.mxu0 %v956_v42  ;;  %v257_v25 = vld [vmem:[%s1693_s1 + $0x40] sm:$0xff] }
  0xad   :  { %v82_v46 = vpop.xlane.xlu0 %81  ;;  %v84_v47 = vpop.xlane.xlu1 %83  ;;  %v960_v61 = vpack.c.bf16 %v258_v52, %v257_v25 }
  0xae   :  { %v101_v49 = vmul.f32 0.03125, %v82_v46  ;;  %167 = vadd.xlane.f32.xlu1 %v144_v37  ;;  %169 = vadd.xlane.f32.xlu0 %v145_v45  ;;  %v102_v50 = vmul.f32 0.03125, %v84_v47  ;;  %v1321_v51 = vmul.f32 %v1130_v5, %v115_v43  ;;  %v1324_v24 = vmul.f32 %v1130_v5, %v116_v44 }
  0xaf   :  { %961 = vmatprep.subr.bf16.mxu0 %v960_v61 }
  0xb0   :  { %v117_v53 = vsub.f32 %v1209_v28, %v101_v49  ;;  %v118_v54 = vsub.f32 %v1214_v29, %v102_v50  ;;  %v147_v57 = vmul.f32 %v1321_v51, %v1321_v51  ;;  %v148_v60 = vmul.f32 %v1324_v24, %v1324_v24  ;;  %v259_v29 = vld [vmem:[%s1693_s1 + $0x50] sm:$0xff]  ;;  %963 = vmatpush3.bf16.msra.mxu0 %v960_v61 }
  0xb1   :  { %v86_v58 = vpop.xlane.xlu0 %85  ;;  %v88_v59 = vpop.xlane.xlu1 %87  ;;  %v964_v8 = vpack.c.bf16 %v260_v3, %v259_v29 }
  0xb2   :  { %v103_v62 = vmul.f32 0.03125, %v86_v58  ;;  %171 = vadd.xlane.f32.xlu1 %v146_v48  ;;  %173 = vadd.xlane.f32.xlu0 %v147_v57  ;;  %v104_v63 = vmul.f32 0.03125, %v88_v59  ;;  %v1339_v0 = vmul.f32 %v1130_v5, %v117_v53  ;;  %v1342_v28 = vmul.f32 %v1130_v5, %v118_v54 }
  0xb3   :  { %965 = vmatprep.subr.bf16.mxu0 %v964_v8 }
  0xb4   :  { %v119_v4 = vsub.f32 %v1223_v32, %v103_v62  ;;  %v120_v6 = vsub.f32 %v1228_v33, %v104_v63  ;;  %v149_v7 = vmul.f32 %v1339_v0, %v1339_v0  ;;  %v150_v9 = vmul.f32 %v1342_v28, %v1342_v28  ;;  %v261_v32 = vld [vmem:[%s1693_s1 + $0x60] sm:$0xff]  ;;  %v262_v33 = vld [vmem:[%s1693_s1 + $0x68] sm:$0xff]  ;;  %967 = vmatpush3.bf16.msra.mxu0 %v964_v8 }
  0xb5   :  { %v968_v13 = vpack.c.bf16 %v262_v33, %v261_v32 }
  0xb6   :  { %175 = vadd.xlane.f32.xlu1 %v148_v60  ;;  %177 = vadd.xlane.f32.xlu0 %v149_v7  ;;  %v1357_v10 = vmul.f32 %v1130_v5, %v119_v4  ;;  %v1360_v11 = vmul.f32 %v1130_v5, %v120_v6 }
  0xb7   :  { %969 = vmatprep.subr.bf16.mxu0 %v968_v13 }
  0xb8   :  { %v151_v12 = vmul.f32 %v1357_v10, %v1357_v10  ;;  %v152_v5 = vmul.f32 %v1360_v11, %v1360_v11  ;;  %971 = vmatpush3.bf16.msra.mxu0 %v968_v13 }
  0xb9   :  { %973 = vmatprep.subr.bf16.mxu0 %v972_v22 }
  0xba   :  { %179 = vadd.xlane.f32.xlu1 %v150_v9  ;;  %181 = vadd.xlane.f32.xlu0 %v151_v12 }
  0xbc   :  { %975 = vmatpush3.bf16.msra.mxu0 %v972_v22 }
  0xbe   :  { %183 = vadd.xlane.f32.xlu1 %v152_v5 }
 0x12b   :  { %v154_v23 = vpop.xlane.xlu0 %153 }
 0x12c   :  { %v185_v26 = vmul.f32 0.03125, %v154_v23 }
 0x12e   :  { %v201_v27 = vadd.f32 1e-05, %v185_v26 }
 0x12f   :  { %v156_v16 = vpop.xlane.xlu1 %155  ;;  %v158_v17 = vpop.xlane.xlu0 %157 }
 0x130   :  { %1009 = vrsqrt.f32 %v201_v27  ;;  %v186_v34 = vmul.f32 0.03125, %v156_v16  ;;  %v187_v35 = vmul.f32 0.03125, %v158_v17 }
 0x132   :  { %v202_v36 = vadd.f32 1e-05, %v186_v34  ;;  %v203_v37 = vadd.f32 1e-05, %v187_v35 }
 0x133   :  { %v160_v38 = vpop.xlane.xlu1 %159  ;;  %v162_v39 = vpop.xlane.xlu0 %161 }
 0x134   :  { %1011 = vrsqrt.f32 %v202_v36  ;;  %v188_v20 = vmul.f32 0.03125, %v160_v38  ;;  %v189_v21 = vmul.f32 0.03125, %v162_v39 }
 0x135   :  { %1013 = vrsqrt.f32 %v203_v37 }
 0x136   :  { %v204_v42 = vadd.f32 1e-05, %v188_v20  ;;  %v205_v43 = vadd.f32 1e-05, %v189_v21 }
 0x137   :  { %v164_v44 = vpop.xlane.xlu1 %163  ;;  %v166_v45 = vpop.xlane.xlu0 %165 }
 0x138   :  { %1015 = vrsqrt.f32 %v204_v42  ;;  %v190_v46 = vmul.f32 0.03125, %v164_v44  ;;  %v191_v47 = vmul.f32 0.03125, %v166_v45 }
 0x139   :  { %1017 = vrsqrt.f32 %v205_v43 }
 0x13a   :  { %v1010_v48 = vpop.eup %1009  ;;  %v206_v49 = vadd.f32 1e-05, %v190_v46  ;;  %v207_v50 = vadd.f32 1e-05, %v191_v47 }
 0x13b   :  { %v168_v25 = vpop.xlane.xlu1 %167  ;;  %v170_v52 = vpop.xlane.xlu0 %169  ;;  %v233_v53 = vmul.f32 %v1010_v48, %v1255_v55 }
 0x13c   :  { %1019 = vrsqrt.f32 %v206_v49  ;;  %v192_v54 = vmul.f32 0.03125, %v168_v25  ;;  %v193_v57 = vmul.f32 0.03125, %v170_v52  ;;  %v565_v25 = vld [vmem:[%s1694_s3 + $0x20] sm:$0xff]  ;;  %v566_v52 = vld [vmem:[%s1694_s3 + $0x28] sm:$0xff] }
 0x13d   :  { %1021 = vrsqrt.f32 %v207_v50  ;;  %864 = vmatprep.mubr.f32.mxu0 %v233_v53  ;;  %v984_v53 = vpack.c.bf16 %v566_v52, %v565_v25 }
 0x13e   :  { %v1012_v58 = vpop.eup %1011  ;;  %v208_v59 = vadd.f32 1e-05, %v192_v54  ;;  %v209_v60 = vadd.f32 1e-05, %v193_v57  ;;  %v567_v54 = vld [vmem:[%s1694_s3 + $0x30] sm:$0xff]  ;;  %v568_v57 = vld [vmem:[%s1694_s3 + $0x38] sm:$0xff] }
 0x13f   :  { %v1014_v61 = vpop.eup %1013  ;;  %v172_v62 = vpop.xlane.xlu1 %171  ;;  %v234_v29 = vmul.f32 %v1012_v58, %v1267_v1  ;;  %v988_v58 = vpack.c.bf16 %v568_v57, %v567_v54 }
 0x140   :  { %v174_v63 = vpop.xlane.xlu0 %173  ;;  %1023 = vrsqrt.f32 %v208_v59  ;;  %v194_v3 = vmul.f32 0.03125, %v172_v62  ;;  %v235_v6 = vmul.f32 %v1014_v61, %v1258_v56  ;;  %v569_v59 = vld [vmem:[%s1694_s3 + $0x40] sm:$0xff]  ;;  %v571_v62 = vld [vmem:[%s1694_s3 + $0x50] sm:$0xff] }
 0x141   :  { %v195_v4 = vmul.f32 0.03125, %v174_v63  ;;  %1025 = vrsqrt.f32 %v209_v60  ;;  %865 = vmatmul.mubr.f32.vlgmr.msra.gmra.mrb[0].mxu0 %v234_v29  ;;  %v570_v60 = vld [vmem:[%s1694_s3 + $0x48] sm:$0xff]  ;;  %v572_v63 = vld [vmem:[%s1694_s3 + $0x58] sm:$0xff] }
 0x142   :  { %v1016_v55 = vpop.eup %1015  ;;  %v210_v7 = vadd.f32 1e-05, %v194_v3  ;;  %867 = vmatprep.mubr.f32.mxu0 %v235_v6  ;;  %v992_v61 = vpack.c.bf16 %v570_v60, %v569_v59  ;;  %v996_v29 = vpack.c.bf16 %v572_v63, %v571_v62  ;;  %v573_v3 = vld [vmem:[%s1694_s3 + $0x60] sm:$0xff] }
 0x143   :  { %v211_v8 = vadd.f32 1e-05, %v195_v4  ;;  %v1018_v9 = vpop.eup %1017  ;;  %v176_v32 = vpop.xlane.xlu1 %175  ;;  %v236_v12 = vmul.f32 %v1016_v55, %v1270_v2  ;;  %v574_v4 = vld [vmem:[%s1694_s3 + $0x68] sm:$0xff]  ;;  %v575_v55 = vld [vmem:[%s1694_s3 + $0x70] sm:$0xff] }
 0x144   :  { %v178_v33 = vpop.xlane.xlu0 %177  ;;  %1027 = vrsqrt.f32 %v210_v7  ;;  %v196_v13 = vmul.f32 0.03125, %v176_v32  ;;  %v237_v1 = vmul.f32 %v1018_v9, %v1279_v14  ;;  %v1000_v6 = vpack.c.bf16 %v574_v4, %v573_v3  ;;  %v576_v7 = vld [vmem:[%s1694_s3 + $0x78] sm:$0xff]  ;;  %v1445_v9 = vld [vmem:[%s1695_s2] ss:$0 sm:$0xff] }
 0x145   :  { %v197_v5 = vmul.f32 0.03125, %v178_v33  ;;  %1029 = vrsqrt.f32 %v211_v8  ;;  %868 = vmatmul.mubr.f32.gmra.mrb[2].mxu0 %v236_v12  ;;  %v1004_v8 = vpack.c.bf16 %v576_v7, %v575_v55 }
 0x146   :  { %v1020_v18 = vpop.eup %1019  ;;  %v212_v56 = vadd.f32 1e-05, %v196_v13  ;;  %870 = vmatprep.mubr.f32.mxu0 %v237_v1 }
 0x147   :  { %v213_v19 = vadd.f32 1e-05, %v197_v5  ;;  %v1022_v22 = vpop.eup %1021  ;;  %v180_v23 = vpop.xlane.xlu1 %179  ;;  %v238_v27 = vmul.f32 %v1020_v18, %v1282_v15 }
 0x148   :  { %v182_v26 = vpop.xlane.xlu0 %181  ;;  %1031 = vrsqrt.f32 %v212_v56  ;;  %v198_v16 = vmul.f32 0.03125, %v180_v23  ;;  %v239_v2 = vmul.f32 %v1022_v22, %v1291_v30 }
 0x149   :  { %v199_v17 = vmul.f32 0.03125, %v182_v26  ;;  %1033 = vrsqrt.f32 %v213_v19  ;;  %871 = vmatmul.mubr.f32.gmra.mrb[4].mxu0 %v238_v27 }
 0x14a   :  { %v1024_v34 = vpop.eup %1023  ;;  %v214_v14 = vadd.f32 1e-05, %v198_v16  ;;  %873 = vmatprep.mubr.f32.mxu0 %v239_v2 }
 0x14b   :  { %v215_v35 = vadd.f32 1e-05, %v199_v17  ;;  %v1026_v36 = vpop.eup %1025  ;;  %v184_v37 = vpop.xlane.xlu1 %183  ;;  %v240_v38 = vmul.f32 %v1024_v34, %v1294_v31 }
 0x14c   :  { %1035 = vrsqrt.f32 %v214_v14  ;;  %v200_v39 = vmul.f32 0.03125, %v184_v37  ;;  %v241_v20 = vmul.f32 %v1026_v36, %v1303_v40 }
 0x14d   :  { %1037 = vrsqrt.f32 %v215_v35  ;;  %874 = vmatmul.mubr.f32.gmra.mrb[6].mxu0 %v240_v38 }
 0x14e   :  { %v1028_v15 = vpop.eup %1027  ;;  %v216_v21 = vadd.f32 1e-05, %v200_v39  ;;  %876 = vmatprep.mubr.f32.mxu0 %v241_v20 }
 0x14f   :  { %v1030_v30 = vpop.eup %1029  ;;  %v242_v42 = vmul.f32 %v1028_v15, %v1306_v41 }
 0x150   :  { %1039 = vrsqrt.f32 %v216_v21  ;;  %v243_v43 = vmul.f32 %v1030_v30, %v1321_v51 }
 0x151   :  { %877 = vmatmul.mubr.f32.gmra.mrb[8].mxu0 %v242_v42 }
 0x152   :  { %v1032_v44 = vpop.eup %1031  ;;  %879 = vmatprep.mubr.f32.mxu0 %v243_v43 }
 0x153   :  { %v1034_v45 = vpop.eup %1033  ;;  %v244_v31 = vmul.f32 %v1032_v44, %v1324_v24  ;;  %v561_v24 = vld [vmem:[%s1694_s3] sm:$0xff] }
 0x154   :  { %v245_v46 = vmul.f32 %v1034_v45, %v1339_v0  ;;  %v562_v0 = vld [vmem:[%s1694_s3 + $0x8] sm:$0xff] }
 0x155   :  { %880 = vmatmul.mubr.f32.gmra.mrb[10].mxu0 %v244_v31  ;;  %v976_v50 = vpack.c.bf16 %v562_v0, %v561_v24 }
 0x156   :  { %v1036_v40 = vpop.eup %1035  ;;  %882 = vmatprep.mubr.f32.mxu0 %v245_v46 }
 0x157   :  { %v1038_v47 = vpop.eup %1037  ;;  %v246_v48 = vmul.f32 %v1036_v40, %v1342_v28  ;;  %977 = vmatprep.subr.bf16.mxu1 %v976_v50  ;;  %v563_v28 = vld [vmem:[%s1694_s3 + $0x10] sm:$0xff] }
 0x158   :  { %v247_v49 = vmul.f32 %v1038_v47, %v1357_v10  ;;  %979 = vmatpush3.bf16.msra.mxu1 %v976_v50  ;;  %v564_v10 = vld [vmem:[%s1694_s3 + $0x18] sm:$0xff] }
 0x159   :  { %883 = vmatmul.mubr.f32.gmra.mrb[12].mxu0 %v246_v48 }
 0x15a   :  { %v1040_v41 = vpop.eup %1039  ;;  %885 = vmatprep.mubr.f32.mxu0 %v247_v49 }
 0x15b   :  { %v248_v51 = vmul.f32 %v1040_v41, %v1360_v11  ;;  %v980_v11 = vpack.c.bf16 %v564_v10, %v563_v28 }
 0x15d   :  { %886 = vmatmul.mubr.f32.gmra.mrb[14].mxu0 %v248_v51  ;;  %981 = vmatprep.subr.bf16.mxu1 %v980_v11 }
 0x15e   :  { %983 = vmatpush3.bf16.msra.mxu1 %v980_v11 }
 0x15f   :  { %985 = vmatprep.subr.bf16.mxu1 %v984_v53 }
 0x162   :  { %987 = vmatpush3.bf16.msra.mxu1 %v984_v53 }
 0x163   :  { %989 = vmatprep.subr.bf16.mxu1 %v988_v58 }
 0x166   :  { %991 = vmatpush3.bf16.msra.mxu1 %v988_v58 }
 0x167   :  { %993 = vmatprep.subr.bf16.mxu1 %v992_v61 }
 0x16a   :  { %995 = vmatpush3.bf16.msra.mxu1 %v992_v61 }
 0x16b   :  { %997 = vmatprep.subr.bf16.mxu1 %v996_v29 }
 0x16e   :  { %999 = vmatpush3.bf16.msra.mxu1 %v996_v29 }
 0x16f   :  { %1001 = vmatprep.subr.bf16.mxu1 %v1000_v6 }
 0x172   :  { %1003 = vmatpush3.bf16.msra.mxu1 %v1000_v6 }
 0x173   :  { %1005 = vmatprep.subr.bf16.mxu1 %v1004_v8 }
 0x176   :  { %1007 = vmatpush3.bf16.msra.mxu1 %v1004_v8 }
 0x214   :  { %v866_v32 = vpop.f32.mrb[0].mxu0 }
 0x215   :  { %v1448_v33 = vadd.f32 %v866_v32, %v1445_v9  ;;  %v338_v12 = vpop.f32.mrb[1].mxu0 }
 0x216   :  { %v1451_v13 = vadd.f32 %v1445_v9, %v338_v12 }
 0x217   :  { %v418_v5 = vmul.f32 %v1448_v33, %v1448_v33 }
 0x218   :  { %v417_v1 = vmul.f32 %v1451_v13, %v1451_v13  ;;  %v869_v18 = vpop.f32.mrb[2].mxu0 }
 0x219   :  { %v434_v56 = vmul.f32 %v418_v5, %v1448_v33  ;;  %v1459_v19 = vadd.f32 %v869_v18, %v1445_v9  ;;  %v348_v22 = vpop.f32.mrb[3].mxu0 }
 0x21a   :  { %v433_v23 = vmul.f32 %v417_v1, %v1451_v13  ;;  %v1463_v26 = vadd.f32 %v1445_v9, %v348_v22 }
 0x21b   :  { %v450_v27 = vmul.f32 0.044715, %v434_v56  ;;  %v420_v16 = vmul.f32 %v1459_v19, %v1459_v19 }
 0x21c   :  { %v419_v17 = vmul.f32 %v1463_v26, %v1463_v26  ;;  %v872_v2 = vpop.f32.mrb[4].mxu0  ;;  %v449_v34 = vmul.f32 0.044715, %v433_v23 }
 0x21d   :  { %v466_v14 = vadd.f32 %v450_v27, %v1448_v33  ;;  %v436_v35 = vmul.f32 %v420_v16, %v1459_v19  ;;  %v1472_v36 = vadd.f32 %v872_v2, %v1445_v9  ;;  %v358_v37 = vpop.f32.mrb[5].mxu0 }
 0x21e   :  { %v435_v38 = vmul.f32 %v419_v17, %v1463_v26  ;;  %v1476_v39 = vadd.f32 %v1445_v9, %v358_v37  ;;  %v465_v20 = vadd.f32 %v449_v34, %v1451_v13 }
 0x21f   :  { %v482_v15 = vmul.f32 0.7978846, %v466_v14  ;;  %v452_v21 = vmul.f32 0.044715, %v436_v35  ;;  %v422_v30 = vmul.f32 %v1472_v36, %v1472_v36 }
 0x220   :  { %v451_v42 = vmul.f32 0.044715, %v435_v38  ;;  %v421_v43 = vmul.f32 %v1476_v39, %v1476_v39  ;;  %v875_v44 = vpop.f32.mrb[6].mxu0  ;;  %v481_v45 = vmul.f32 0.7978846, %v465_v20 }
 0x221   :  { %v468_v31 = vadd.f32 %v452_v21, %v1459_v19  ;;  %v438_v46 = vmul.f32 %v422_v30, %v1472_v36  ;;  %v1486_v40 = vadd.f32 %v875_v44, %v1445_v9  ;;  %v368_v47 = vpop.f32.mrb[7].mxu0  ;;  %1041 = vtanh.f32 %v482_v15 }
 0x222   :  { %v467_v48 = vadd.f32 %v451_v42, %v1463_v26  ;;  %v437_v49 = vmul.f32 %v421_v43, %v1476_v39  ;;  %v1491_v41 = vadd.f32 %v1445_v9, %v368_v47  ;;  %1043 = vtanh.f32 %v481_v45 }
 0x223   :  { %v484_v51 = vmul.f32 0.7978846, %v468_v31  ;;  %v454_v24 = vmul.f32 0.044715, %v438_v46  ;;  %v424_v0 = vmul.f32 %v1486_v40, %v1486_v40 }
 0x224   :  { %v483_v50 = vmul.f32 0.7978846, %v467_v48  ;;  %v453_v28 = vmul.f32 0.044715, %v437_v49  ;;  %v423_v10 = vmul.f32 %v1491_v41, %v1491_v41  ;;  %v878_v11 = vpop.f32.mrb[8].mxu0 }
 0x225   :  { %v470_v25 = vadd.f32 %v454_v24, %v1472_v36  ;;  %v440_v52 = vmul.f32 %v424_v0, %v1486_v40  ;;  %v1500_v53 = vadd.f32 %v878_v11, %v1445_v9  ;;  %v378_v54 = vpop.f32.mrb[9].mxu0  ;;  %1045 = vtanh.f32 %v484_v51 }
 0x226   :  { %v469_v57 = vadd.f32 %v453_v28, %v1476_v39  ;;  %v439_v58 = vmul.f32 %v423_v10, %v1491_v41  ;;  %v1505_v59 = vadd.f32 %v1445_v9, %v378_v54  ;;  %1047 = vtanh.f32 %v483_v50 }
 0x227   :  { %v486_v60 = vmul.f32 0.7978846, %v470_v25  ;;  %v456_v61 = vmul.f32 0.044715, %v440_v52  ;;  %v426_v62 = vmul.f32 %v1500_v53, %v1500_v53 }
 0x228   :  { %v485_v63 = vmul.f32 0.7978846, %v469_v57  ;;  %v455_v29 = vmul.f32 0.044715, %v439_v58  ;;  %v425_v3 = vmul.f32 %v1505_v59, %v1505_v59  ;;  %v881_v4 = vpop.f32.mrb[10].mxu0 }
 0x229   :  { %v442_v6 = vmul.f32 %v426_v62, %v1500_v53  ;;  %v1513_v55 = vadd.f32 %v881_v4, %v1445_v9  ;;  %v388_v7 = vpop.f32.mrb[11].mxu0  ;;  %1049 = vtanh.f32 %v486_v60  ;;  %v472_v8 = vadd.f32 %v456_v61, %v1486_v40 }
 0x22a   :  { %v441_v32 = vmul.f32 %v425_v3, %v1505_v59  ;;  %v1518_v12 = vadd.f32 %v1445_v9, %v388_v7  ;;  %1051 = vtanh.f32 %v485_v63  ;;  %v471_v1 = vadd.f32 %v455_v29, %v1491_v41 }
 0x22b   :  { %v1042_v5 = vpop.eup %1041  ;;  %v458_v18 = vmul.f32 0.044715, %v442_v6  ;;  %v428_v56 = vmul.f32 %v1513_v55, %v1513_v55  ;;  %v488_v38 = vmul.f32 0.7978846, %v472_v8 }
 0x22c   :  { %v1044_v22 = vpop.eup %1043  ;;  %v457_v23 = vmul.f32 0.044715, %v441_v32  ;;  %v427_v27 = vmul.f32 %v1518_v12, %v1518_v12  ;;  %v884_v16 = vpop.f32.mrb[12].mxu0  ;;  %v514_v17 = vadd.f32 1.0, %v1042_v5  ;;  %v487_v42 = vmul.f32 0.7978846, %v471_v1 }
 0x22d   :  { %v474_v2 = vadd.f32 %v458_v18, %v1500_v53  ;;  %v444_v34 = vmul.f32 %v428_v56, %v1513_v55  ;;  %v1528_v14 = vadd.f32 %v884_v16, %v1445_v9  ;;  %v398_v35 = vpop.f32.mrb[13].mxu0  ;;  %v513_v37 = vadd.f32 1.0, %v1044_v22 }
 0x22e   :  { %v443_v20 = vmul.f32 %v427_v27, %v1518_v12  ;;  %v1532_v15 = vadd.f32 %v1445_v9, %v398_v35  ;;  %v530_v21 = vmul.f32 0.5, %v514_v17  ;;  %v473_v43 = vadd.f32 %v457_v23, %v1505_v59 }
 0x22f   :  { %v1046_v30 = vpop.eup %1045  ;;  %v430_v44 = vmul.f32 %v1528_v14, %v1528_v14  ;;  %v529_v45 = vmul.f32 0.5, %v513_v37  ;;  %v490_v46 = vmul.f32 0.7978846, %v474_v2  ;;  %v460_v51 = vmul.f32 0.044715, %v444_v34 }
 0x230   :  { %v1048_v31 = vpop.eup %1047  ;;  %v459_v47 = vmul.f32 0.044715, %v443_v20  ;;  %v429_v48 = vmul.f32 %v1532_v15, %v1532_v15  ;;  %v887_v49 = vpop.f32.mrb[14].mxu0  ;;  %v546_v25 = vmul.f32 %v530_v21, %v1448_v33  ;;  %v489_v57 = vmul.f32 0.7978846, %v473_v43 }
 0x231   :  { %v446_v24 = vmul.f32 %v430_v44, %v1528_v14  ;;  %v1541_v0 = vadd.f32 %v887_v49, %v1445_v9  ;;  %v408_v50 = vpop.f32.mrb[15].mxu0  ;;  %v545_v28 = vmul.f32 %v529_v45, %v1451_v13  ;;  %v515_v52 = vadd.f32 1.0, %v1048_v31 }
 0x232   :  { %v445_v10 = vmul.f32 %v429_v48, %v1532_v15  ;;  %v1546_v11 = vadd.f32 %v1445_v9, %v408_v50  ;;  %v516_v61 = vadd.f32 1.0, %v1046_v30  ;;  %v475_v63 = vadd.f32 %v459_v47, %v1518_v12 }
 0x233   :  { %v1050_v54 = vpop.eup %1049  ;;  %v462_v58 = vmul.f32 0.044715, %v446_v24  ;;  %v432_v60 = vmul.f32 %v1541_v0, %v1541_v0  ;;  %920 = vmatprep.mubr.f32.mxu1 %v545_v28  ;;  %v531_v9 = vmul.f32 0.5, %v515_v52  ;;  %v476_v33 = vadd.f32 %v460_v51, %v1513_v55 }
 0x234   :  { %v1052_v62 = vpop.eup %1051  ;;  %v461_v13 = vmul.f32 0.044715, %v445_v10  ;;  %v431_v29 = vmul.f32 %v1546_v11, %v1546_v11  ;;  %921 = vmatmul.mubr.f32.vlgmr.msra.gmra.mrb[0].mxu1 %v546_v25  ;;  %v532_v4 = vmul.f32 0.5, %v516_v61  ;;  %v518_v5 = vadd.f32 1.0, %v1050_v54 }
 0x235   :  { %v448_v3 = vmul.f32 %v432_v60, %v1541_v0  ;;  %v517_v6 = vadd.f32 1.0, %v1052_v62  ;;  %v547_v32 = vmul.f32 %v531_v9, %v1463_v26  ;;  %v478_v1 = vadd.f32 %v462_v58, %v1528_v14 }
 0x236   :  { %v477_v7 = vadd.f32 %v461_v13, %v1532_v15  ;;  %v447_v8 = vmul.f32 %v431_v29, %v1546_v11  ;;  %v548_v56 = vmul.f32 %v532_v4, %v1459_v19  ;;  %v491_v23 = vmul.f32 0.7978846, %v475_v63 }
 0x237   :  { %v464_v18 = vmul.f32 0.044715, %v448_v3  ;;  %v533_v22 = vmul.f32 0.5, %v517_v6  ;;  %923 = vmatprep.mubr.f32.mxu1 %v547_v32  ;;  %v534_v16 = vmul.f32 0.5, %v518_v5  ;;  %1053 = vtanh.f32 %v487_v42 }
 0x238   :  { %v463_v27 = vmul.f32 0.044715, %v447_v8  ;;  %v492_v17 = vmul.f32 0.7978846, %v476_v33  ;;  %924 = vmatmul.mubr.f32.gmra.mrb[2].mxu1 %v548_v56  ;;  %1055 = vtanh.f32 %v488_v38  ;;  %v493_v34 = vmul.f32 0.7978846, %v477_v7 }
 0x239   :  { %v549_v2 = vmul.f32 %v533_v22, %v1476_v39  ;;  %1057 = vtanh.f32 %v489_v57  ;;  %v494_v35 = vmul.f32 0.7978846, %v478_v1  ;;  %v480_v37 = vadd.f32 %v464_v18, %v1541_v0 }
 0x23a   :  { %v479_v26 = vadd.f32 %v463_v27, %v1546_v11  ;;  %v550_v19 = vmul.f32 %v534_v16, %v1472_v36  ;;  %1059 = vtanh.f32 %v490_v46  ;;  %v1075_v27 = vld [vmem:[%s1692_s0 + $0x18] sm:$0xff] }
 0x23b   :  { %926 = vmatprep.mubr.f32.mxu1 %v549_v2  ;;  %1061 = vtanh.f32 %v491_v23  ;;  %v496_v21 = vmul.f32 0.7978846, %v480_v37 }
 0x23c   :  { %v495_v20 = vmul.f32 0.7978846, %v479_v26  ;;  %927 = vmatmul.mubr.f32.gmra.mrb[4].mxu1 %v550_v19  ;;  %1063 = vtanh.f32 %v492_v17  ;;  %v1076_v17 = vld [vmem:[%s1692_s0 + $0x10] sm:$0xff]  ;;  %v1077_v19 = vld [vmem:[%s1692_s0 + $0x28] sm:$0xff] }
 0x23d   :  { %1065 = vtanh.f32 %v493_v34 }
 0x23e   :  { %1067 = vtanh.f32 %v494_v35 }
 0x23f   :  { %1069 = vtanh.f32 %v495_v20 }
 0x240   :  { %1071 = vtanh.f32 %v496_v21  ;;  %v1078_v21 = vld [vmem:[%s1692_s0 + $0x20] sm:$0xff] }
 0x241   :  { %v1054_v39 = vpop.eup %1053 }
 0x242   :  { %v1056_v38 = vpop.eup %1055  ;;  %v519_v30 = vadd.f32 1.0, %v1054_v39 }
 0x243   :  { %v1058_v42 = vpop.eup %1057  ;;  %v520_v43 = vadd.f32 1.0, %v1056_v38 }
 0x244   :  { %v1060_v44 = vpop.eup %1059  ;;  %v535_v45 = vmul.f32 0.5, %v519_v30  ;;  %v521_v31 = vadd.f32 1.0, %v1058_v42 }
 0x245   :  { %v1062_v47 = vpop.eup %1061  ;;  %v536_v36 = vmul.f32 0.5, %v520_v43  ;;  %v522_v46 = vadd.f32 1.0, %v1060_v44  ;;  %v1079_v44 = vld [vmem:[%s1692_s0 + $0x38] sm:$0xff] }
 0x246   :  { %v1064_v48 = vpop.eup %1063  ;;  %v551_v49 = vmul.f32 %v535_v45, %v1491_v41  ;;  %v537_v51 = vmul.f32 0.5, %v521_v31  ;;  %v523_v24 = vadd.f32 1.0, %v1062_v47  ;;  %v1080_v31 = vld [vmem:[%s1692_s0 + $0x30] sm:$0xff] }
 0x247   :  { %v1066_v50 = vpop.eup %1065  ;;  %v552_v28 = vmul.f32 %v536_v36, %v1486_v40  ;;  %v538_v10 = vmul.f32 0.5, %v522_v46  ;;  %v524_v25 = vadd.f32 1.0, %v1064_v48 }
 0x248   :  { %v1068_v52 = vpop.eup %1067  ;;  %929 = vmatprep.mubr.f32.mxu1 %v551_v49  ;;  %v553_v54 = vmul.f32 %v537_v51, %v1505_v59  ;;  %v539_v57 = vmul.f32 0.5, %v523_v24  ;;  %v525_v58 = vadd.f32 1.0, %v1066_v50  ;;  %v1081_v51 = vld [vmem:[%s1692_s0 + $0x48] sm:$0xff]  ;;  %v1082_v50 = vld [vmem:[%s1692_s0 + $0x40] sm:$0xff] }
 0x249   :  { %v1070_v60 = vpop.eup %1069  ;;  %930 = vmatmul.mubr.f32.gmra.mrb[6].mxu1 %v552_v28  ;;  %v554_v63 = vmul.f32 %v538_v10, %v1500_v53  ;;  %v540_v13 = vmul.f32 0.5, %v524_v25  ;;  %v526_v29 = vadd.f32 1.0, %v1068_v52 }
 0x24a   :  { %932 = vmatprep.mubr.f32.mxu1 %v553_v54  ;;  %v555_v61 = vmul.f32 %v539_v57, %v1518_v12  ;;  %v541_v62 = vmul.f32 0.5, %v525_v58  ;;  %v527_v41 = vadd.f32 1.0, %v1070_v60  ;;  %v1072_v40 = vpop.eup %1071  ;;  %v1083_v57 = vld [vmem:[%s1692_s0 + $0x58] sm:$0xff]  ;;  %v1084_v60 = vld [vmem:[%s1692_s0 + $0x50] sm:$0xff] }
 0x24b   :  { %v556_v59 = vmul.f32 %v540_v13, %v1513_v55  ;;  %v542_v3 = vmul.f32 0.5, %v526_v29  ;;  %v528_v4 = vadd.f32 1.0, %v1072_v40  ;;  %v1085_v29 = vld [vmem:[%s1692_s0 + $0x68] sm:$0xff] }
 0x24c   :  { %v557_v9 = vmul.f32 %v541_v62, %v1532_v15  ;;  %v543_v33 = vmul.f32 0.5, %v527_v41  ;;  %v1578_v15 = vld [vmem:[%s1696_s4] ss:$0 sm:$0xff] }
 0x24d   :  { %933 = vmatmul.mubr.f32.gmra.mrb[8].mxu1 %v554_v63  ;;  %v558_v6 = vmul.f32 %v542_v3, %v1528_v14  ;;  %v544_v7 = vmul.f32 0.5, %v528_v4  ;;  %v1073_v14 = vld [vmem:[%s1692_s0 + $0x8] sm:$0xff] }
 0x24e   :  { %935 = vmatprep.mubr.f32.mxu1 %v555_v61  ;;  %v559_v12 = vmul.f32 %v543_v33, %v1546_v11 }
 0x24f   :  { %v560_v53 = vmul.f32 %v544_v7, %v1541_v0  ;;  %v1074_v0 = vld [vmem:[%s1692_s0] sm:$0xff] }
 0x251   :  { %936 = vmatmul.mubr.f32.gmra.mrb[10].mxu1 %v556_v59 }
 0x252   :  { %938 = vmatprep.mubr.f32.mxu1 %v557_v9  ;;  %v1086_v9 = vld [vmem:[%s1692_s0 + $0x60] sm:$0xff] }
 0x255   :  { %939 = vmatmul.mubr.f32.gmra.mrb[12].mxu1 %v558_v6  ;;  %v1087_v6 = vld [vmem:[%s1692_s0 + $0x78] sm:$0xff] }
 0x256   :  { %941 = vmatprep.mubr.f32.mxu1 %v559_v12 }
 0x259   :  { %942 = vmatmul.mubr.f32.gmra.mrb[14].mxu1 %v560_v53  ;;  %v1088_v53 = vld [vmem:[%s1692_s0 + $0x70] sm:$0xff] }
 0x307   :  { %v922_v55 = vpop.f32.mrb[0].mxu1 }
 0x308   :  { %v656_v8 = vadd.f32 %v922_v55, %v1578_v15  ;;  %v650_v32 = vpop.f32.mrb[1].mxu1 }
 0x309   :  { %v651_v5 = vadd.f32 %v1578_v15, %v650_v32 }
 0x30a   :  { %v730_v11 = vadd.f32 %v1073_v14, %v656_v8 }
 0x30b   :  { %v729_v1 = vadd.f32 %v1074_v0, %v651_v5  ;;  %v925_v18 = vpop.f32.mrb[2].mxu1 }
 0x30c   :  { %746 = vst [vmem:[%s1697_s5 + $0x8] sm:$0xff] %v730_v11  ;;  %v666_v56 = vadd.f32 %v925_v18, %v1578_v15  ;;  %v660_v22 = vpop.f32.mrb[3].mxu1 }
 0x30d   :  { %745 = vst [vmem:[%s1697_s5] sm:$0xff] %v729_v1  ;;  %v661_v23 = vadd.f32 %v1578_v15, %v660_v22 }
 0x30e   :  { %v732_v16 = vadd.f32 %v1075_v27, %v666_v56 }
 0x30f   :  { %v731_v2 = vadd.f32 %v1076_v17, %v661_v23  ;;  %v928_v34 = vpop.f32.mrb[4].mxu1 }
 0x310   :  { %748 = vst [vmem:[%s1697_s5 + $0x18] sm:$0xff] %v732_v16  ;;  %v676_v26 = vadd.f32 %v928_v34, %v1578_v15  ;;  %v670_v35 = vpop.f32.mrb[5].mxu1 }
 0x311   :  { %747 = vst [vmem:[%s1697_s5 + $0x10] sm:$0xff] %v731_v2  ;;  %v671_v37 = vadd.f32 %v1578_v15, %v670_v35 }
 0x312   :  { %v734_v20 = vadd.f32 %v1077_v19, %v676_v26 }
 0x313   :  { %v733_v39 = vadd.f32 %v1078_v21, %v671_v37 }
 0x314   :  { %750 = vst [vmem:[%s1697_s5 + $0x28] sm:$0xff] %v734_v20 }
 0x315   :  { %749 = vst [vmem:[%s1697_s5 + $0x20] sm:$0xff] %v733_v39 }
 0x31c   :  { %v931_v38 = vpop.f32.mrb[6].mxu1 }
 0x31d   :  { %v686_v30 = vadd.f32 %v931_v38, %v1578_v15  ;;  %v680_v42 = vpop.f32.mrb[7].mxu1 }
 0x31e   :  { %v681_v43 = vadd.f32 %v1578_v15, %v680_v42 }
 0x31f   :  { %v736_v45 = vadd.f32 %v1079_v44, %v686_v30 }
 0x320   :  { %v735_v47 = vadd.f32 %v1080_v31, %v681_v43  ;;  %v934_v36 = vpop.f32.mrb[8].mxu1 }
 0x321   :  { %752 = vst [vmem:[%s1697_s5 + $0x38] sm:$0xff] %v736_v45  ;;  %v696_v46 = vadd.f32 %v934_v36, %v1578_v15  ;;  %v690_v48 = vpop.f32.mrb[9].mxu1 }
 0x322   :  { %751 = vst [vmem:[%s1697_s5 + $0x30] sm:$0xff] %v735_v47  ;;  %v691_v49 = vadd.f32 %v1578_v15, %v690_v48 }
 0x323   :  { %v738_v24 = vadd.f32 %v1081_v51, %v696_v46 }
 0x324   :  { %v737_v28 = vadd.f32 %v1082_v50, %v691_v49  ;;  %v937_v10 = vpop.f32.mrb[10].mxu1 }
 0x325   :  { %754 = vst [vmem:[%s1697_s5 + $0x48] sm:$0xff] %v738_v24  ;;  %v706_v25 = vadd.f32 %v937_v10, %v1578_v15  ;;  %v700_v52 = vpop.f32.mrb[11].mxu1 }
 0x326   :  { %753 = vst [vmem:[%s1697_s5 + $0x40] sm:$0xff] %v737_v28  ;;  %v701_v54 = vadd.f32 %v1578_v15, %v700_v52 }
 0x327   :  { %v740_v58 = vadd.f32 %v1083_v57, %v706_v25 }
 0x328   :  { %v739_v61 = vadd.f32 %v1084_v60, %v701_v54  ;;  %v940_v62 = vpop.f32.mrb[12].mxu1 }
 0x329   :  { %756 = vst [vmem:[%s1697_s5 + $0x58] sm:$0xff] %v740_v58  ;;  %v716_v41 = vadd.f32 %v940_v62, %v1578_v15  ;;  %v710_v63 = vpop.f32.mrb[13].mxu1 }
 0x32a   :  { %755 = vst [vmem:[%s1697_s5 + $0x50] sm:$0xff] %v739_v61  ;;  %v711_v13 = vadd.f32 %v1578_v15, %v710_v63 }
 0x32b   :  { %v742_v40 = vadd.f32 %v1085_v29, %v716_v41 }
 0x32c   :  { %v741_v33 = vadd.f32 %v1086_v9, %v711_v13  ;;  %v943_v59 = vpop.f32.mrb[14].mxu1 }
 0x32d   :  { %758 = vst [vmem:[%s1697_s5 + $0x68] sm:$0xff] %v742_v40  ;;  %v726_v3 = vadd.f32 %v943_v59, %v1578_v15  ;;  %v720_v4 = vpop.f32.mrb[15].mxu1 }
 0x32e   :  { %757 = vst [vmem:[%s1697_s5 + $0x60] sm:$0xff] %v741_v33  ;;  %v721_v12 = vadd.f32 %v1578_v15, %v720_v4 }
 0x32f   :  { %v744_v7 = vadd.f32 %v1087_v6, %v726_v3 }
 0x330   :  { %v743_v55 = vadd.f32 %v1088_v53, %v721_v12 }
 0x331   :  { %760 = vst [vmem:[%s1697_s5 + $0x78] sm:$0xff] %v744_v7 }
 0x332   :  { %759 = vst [vmem:[%s1697_s5 + $0x70] sm:$0xff] %v743_v55 }

// kernel: swt_backbone_forward.9
= control target key start
LH: loop header
LB: loop body
LE: loop exit
PB: predicated region body
PF: predicated region fallthrough
CT: control target
= control target key end

     0   :  { %v24_v0 = vlaneseq  ;;  %v545_v4 = vmov 0.0   ;;  %s722_s0 = inlined_call_operand.vmem [shape: f32[32,128], index: 0, kind: input, shape index: {}]   ;;  %s723_s1 = inlined_call_operand.vmem [shape: f32[128,128], index: 1, kind: input, shape index: {}]   ;;  %s724_s3 = inlined_call_operand.vmem [shape: f32[128,128], index: 3, kind: input, shape index: {}]   ;;  %s725_s2 = inlined_call_operand.vmem [shape: f32[1,128], index: 2, kind: input, shape index: {}]   ;;  %s726_s4 = inlined_call_operand.vmem [shape: f32[1,128], index: 4, kind: input, shape index: {}]   ;;  %s727_s5 = inlined_call_operand.vmem [shape: f32[32,128], index: 5, kind: output, shape index: {}]  }
   0x1   :  { %v579_v2 = vld [vmem:[%s722_s0] sm:$0xff]  ;;  %v584_v3 = vld [vmem:[%s722_s0 + $0x10] sm:$0xff]  ;;  %v589_v6 = vld [vmem:[%s722_s0 + $0x8] sm:$0xff] }
   0x2   :  { %v25_v1 = vand.u32 127, %v24_v0  ;;  %v594_v7 = vld [vmem:[%s722_s0 + $0x18] sm:$0xff]  ;;  %v81_v12 = vld [vmem:[%s723_s1] sm:$0xff]  ;;  %v82_v13 = vld [vmem:[%s723_s1 + $0x8] sm:$0xff] }
   0x3   :  { %v83_v14 = vld [vmem:[%s723_s1 + $0x10] sm:$0xff]  ;;  %v464_v15 = vpack.c.bf16 %v82_v13, %v81_v12  ;;  %v84_v16 = vld [vmem:[%s723_s1 + $0x18] sm:$0xff]  ;;  %v85_v18 = vld [vmem:[%s723_s1 + $0x20] sm:$0xff] }
   0x4   :  { %vm26_vm0 = vcmp.lt.s32.totalorder %v25_v1, 64  ;;  %v468_v17 = vpack.c.bf16 %v84_v16, %v83_v14  ;;  %v86_v19 = vld [vmem:[%s723_s1 + $0x28] sm:$0xff]  ;;  %v87_v41 = vld [vmem:[%s723_s1 + $0x30] sm:$0xff]  ;;  %v88_v42 = vld [vmem:[%s723_s1 + $0x38] sm:$0xff] }
   0x5   :  { %v345_v5 = vsel %vm26_vm0, 1.0, %v545_v4  ;;  %465 = vmatprep.subr.bf16.mxu0 %v464_v15  ;;  %v472_v20 = vpack.c.bf16 %v86_v19, %v85_v18  ;;  %v476_v43 = vpack.c.bf16 %v88_v42, %v87_v41  ;;  %v89_v44 = vld [vmem:[%s723_s1 + $0x40] sm:$0xff]  ;;  %v90_v45 = vld [vmem:[%s723_s1 + $0x48] sm:$0xff]  ;;  %v91_v47 = vld [vmem:[%s723_s1 + $0x50] sm:$0xff] }
   0x6   :  { %v29_v8 = vmul.f32 %v345_v5, %v579_v2  ;;  %v31_v9 = vmul.f32 %v345_v5, %v584_v3  ;;  %v30_v10 = vmul.f32 %v345_v5, %v589_v6  ;;  %v32_v11 = vmul.f32 %v345_v5, %v594_v7  ;;  %467 = vmatpush3.bf16.msra.mxu0 %v464_v15  ;;  %v92_v48 = vld [vmem:[%s723_s1 + $0x58] sm:$0xff]  ;;  %v93_v50 = vld [vmem:[%s723_s1 + $0x60] sm:$0xff]  ;;  %v94_v51 = vld [vmem:[%s723_s1 + $0x68] sm:$0xff] }
   0x7   :  { %469 = vmatprep.subr.bf16.mxu0 %v468_v17  ;;  %v480_v46 = vpack.c.bf16 %v90_v45, %v89_v44  ;;  %v484_v49 = vpack.c.bf16 %v92_v48, %v91_v47  ;;  %v488_v52 = vpack.c.bf16 %v94_v51, %v93_v50  ;;  %v95_v53 = vld [vmem:[%s723_s1 + $0x70] sm:$0xff]  ;;  %v96_v54 = vld [vmem:[%s723_s1 + $0x78] sm:$0xff]  ;;  %v225_v16 = vld [vmem:[%s724_s3] sm:$0xff] }
   0x8   :  { %33 = vadd.xlane.f32.xlu0 %v29_v8  ;;  %37 = vadd.xlane.f32.xlu1 %v31_v9  ;;  %v492_v55 = vpack.c.bf16 %v96_v54, %v95_v53  ;;  %v227_v19 = vld [vmem:[%s724_s3 + $0x10] sm:$0xff] }
   0xa   :  { %471 = vmatpush3.bf16.msra.mxu0 %v468_v17  ;;  %v226_v17 = vld [vmem:[%s724_s3 + $0x8] sm:$0xff] }
   0xb   :  { %473 = vmatprep.subr.bf16.mxu0 %v472_v20  ;;  %v496_v18 = vpack.c.bf16 %v226_v17, %v225_v16 }
   0xc   :  { %35 = vadd.xlane.f32.xlu0 %v30_v10  ;;  %39 = vadd.xlane.f32.xlu1 %v32_v11 }
   0xd   :  { %497 = vmatprep.subr.bf16.mxu1 %v496_v18 }
   0xe   :  { %475 = vmatpush3.bf16.msra.mxu0 %v472_v20  ;;  %499 = vmatpush3.bf16.msra.mxu1 %v496_v18  ;;  %v228_v20 = vld [vmem:[%s724_s3 + $0x18] sm:$0xff] }
   0xf   :  { %477 = vmatprep.subr.bf16.mxu0 %v476_v43 }
  0x12   :  { %479 = vmatpush3.bf16.msra.mxu0 %v476_v43 }
  0x13   :  { %481 = vmatprep.subr.bf16.mxu0 %v480_v46 }
  0x16   :  { %483 = vmatpush3.bf16.msra.mxu0 %v480_v46 }
  0x17   :  { %485 = vmatprep.subr.bf16.mxu0 %v484_v49 }
  0x1a   :  { %487 = vmatpush3.bf16.msra.mxu0 %v484_v49 }
  0x1b   :  { %489 = vmatprep.subr.bf16.mxu0 %v488_v52 }
  0x1e   :  { %491 = vmatpush3.bf16.msra.mxu0 %v488_v52 }
  0x1f   :  { %493 = vmatprep.subr.bf16.mxu0 %v492_v55 }
  0x22   :  { %495 = vmatpush3.bf16.msra.mxu0 %v492_v55 }
  0x95   :  { %v34_v21 = vpop.xlane.xlu0 %33  ;;  %v38_v22 = vpop.xlane.xlu1 %37 }
  0x96   :  { %v41_v23 = vmul.f32 0.015625, %v34_v21  ;;  %v43_v24 = vmul.f32 0.015625, %v38_v22  ;;  %v500_v21 = vpack.c.bf16 %v228_v20, %v227_v19  ;;  %v229_v22 = vld [vmem:[%s724_s3 + $0x20] sm:$0xff] }
  0x98   :  { %v45_v25 = vsub.f32 %v579_v2, %v41_v23  ;;  %v47_v26 = vsub.f32 %v584_v3, %v43_v24  ;;  %501 = vmatprep.subr.bf16.mxu1 %v500_v21  ;;  %v230_v23 = vld [vmem:[%s724_s3 + $0x28] sm:$0xff] }
  0x99   :  { %v36_v27 = vpop.xlane.xlu0 %35  ;;  %v40_v28 = vpop.xlane.xlu1 %39  ;;  %503 = vmatpush3.bf16.msra.mxu1 %v500_v21  ;;  %v504_v24 = vpack.c.bf16 %v230_v23, %v229_v22 }
  0x9a   :  { %v42_v29 = vmul.f32 0.015625, %v36_v27  ;;  %v44_v30 = vmul.f32 0.015625, %v40_v28  ;;  %v49_v31 = vmul.f32 %v345_v5, %v45_v25  ;;  %v51_v32 = vmul.f32 %v345_v5, %v47_v26  ;;  %v231_v25 = vld [vmem:[%s724_s3 + $0x30] sm:$0xff]  ;;  %v232_v26 = vld [vmem:[%s724_s3 + $0x38] sm:$0xff]  ;;  %v233_v28 = vld [vmem:[%s724_s3 + $0x40] sm:$0xff] }
  0x9b   :  { %505 = vmatprep.subr.bf16.mxu1 %v504_v24  ;;  %v508_v27 = vpack.c.bf16 %v232_v26, %v231_v25  ;;  %v347_v25 = vld [vmem:[%s726_s4] ss:$0 sm:$0xff] }
  0x9c   :  { %v46_v33 = vsub.f32 %v589_v6, %v42_v29  ;;  %v48_v34 = vsub.f32 %v594_v7, %v44_v30  ;;  %v53_v35 = vmul.f32 %v49_v31, %v49_v31  ;;  %v55_v36 = vmul.f32 %v51_v32, %v51_v32  ;;  %v234_v29 = vld [vmem:[%s724_s3 + $0x48] sm:$0xff] }
  0x9d   :  { %507 = vmatpush3.bf16.msra.mxu1 %v504_v24  ;;  %v512_v30 = vpack.c.bf16 %v234_v29, %v233_v28 }
  0x9e   :  { %57 = vadd.xlane.f32.xlu0 %v53_v35  ;;  %v50_v37 = vmul.f32 %v345_v5, %v46_v33  ;;  %v52_v38 = vmul.f32 %v345_v5, %v48_v34  ;;  %509 = vmatprep.subr.bf16.mxu1 %v508_v27  ;;  %v237_v33 = vld [vmem:[%s724_s3 + $0x60] sm:$0xff]  ;;  %v238_v35 = vld [vmem:[%s724_s3 + $0x68] sm:$0xff] }
  0xa0   :  { %v54_v39 = vmul.f32 %v50_v37, %v50_v37  ;;  %v56_v40 = vmul.f32 %v52_v38, %v52_v38 }
  0xa1   :  { %511 = vmatpush3.bf16.msra.mxu1 %v508_v27 }
  0xa2   :  { %61 = vadd.xlane.f32.xlu0 %v55_v36  ;;  %59 = vadd.xlane.f32.xlu1 %v54_v39  ;;  %v520_v36 = vpack.c.bf16 %v238_v35, %v237_v33 }
  0xa3   :  { %513 = vmatprep.subr.bf16.mxu1 %v512_v30 }
  0xa5   :  { %515 = vmatpush3.bf16.msra.mxu1 %v512_v30 }
  0xa6   :  { %63 = vadd.xlane.f32.xlu1 %v56_v40  ;;  %v346_v40 = vld [vmem:[%s725_s2] ss:$0 sm:$0xff] }
 0x12b   :  { %v58_v56 = vpop.xlane.xlu0 %57 }
 0x12c   :  { %v65_v57 = vmul.f32 0.015625, %v58_v56 }
 0x12e   :  { %v69_v58 = vadd.f32 1e-05, %v65_v57 }
 0x12f   :  { %v60_v59 = vpop.xlane.xlu1 %59  ;;  %v62_v60 = vpop.xlane.xlu0 %61 }
 0x130   :  { %529 = vrsqrt.f32 %v69_v58  ;;  %v66_v61 = vmul.f32 0.015625, %v60_v59  ;;  %v67_v62 = vmul.f32 0.015625, %v62_v60 }
 0x132   :  { %v70_v63 = vadd.f32 1e-05, %v66_v61  ;;  %v71_v0 = vadd.f32 1e-05, %v67_v62 }
 0x133   :  { %v64_v1 = vpop.xlane.xlu1 %63 }
 0x134   :  { %531 = vrsqrt.f32 %v70_v63  ;;  %v68_v4 = vmul.f32 0.015625, %v64_v1 }
 0x135   :  { %533 = vrsqrt.f32 %v71_v0 }
 0x136   :  { %v72_v5 = vadd.f32 1e-05, %v68_v4 }
 0x138   :  { %535 = vrsqrt.f32 %v72_v5 }
 0x13a   :  { %v530_v8 = vpop.eup %529 }
 0x13b   :  { %v77_v9 = vmul.f32 %v530_v8, %v49_v31  ;;  %v235_v31 = vld [vmem:[%s724_s3 + $0x50] sm:$0xff] }
 0x13d   :  { %420 = vmatprep.mubr.f32.mxu0 %v77_v9 }
 0x13e   :  { %v532_v10 = vpop.eup %531 }
 0x13f   :  { %v534_v11 = vpop.eup %533  ;;  %v78_v12 = vmul.f32 %v532_v10, %v50_v37  ;;  %v239_v37 = vld [vmem:[%s724_s3 + $0x70] sm:$0xff] }
 0x140   :  { %v79_v13 = vmul.f32 %v534_v11, %v51_v32  ;;  %v236_v32 = vld [vmem:[%s724_s3 + $0x58] sm:$0xff] }
 0x141   :  { %421 = vmatmul.mubr.f32.vlgmr.msra.gmra.mrb[0].mxu0 %v78_v12  ;;  %v516_v34 = vpack.c.bf16 %v236_v32, %v235_v31 }
 0x142   :  { %v536_v14 = vpop.eup %535  ;;  %423 = vmatprep.mubr.f32.mxu0 %v79_v13 }
 0x143   :  { %v80_v15 = vmul.f32 %v536_v14, %v52_v38  ;;  %517 = vmatprep.subr.bf16.mxu1 %v516_v34  ;;  %v240_v38 = vld [vmem:[%s724_s3 + $0x78] sm:$0xff] }
 0x144   :  { %519 = vmatpush3.bf16.msra.mxu1 %v516_v34  ;;  %v524_v39 = vpack.c.bf16 %v240_v38, %v239_v37 }
 0x145   :  { %424 = vmatmul.mubr.f32.gmra.mrb[2].mxu0 %v80_v15  ;;  %521 = vmatprep.subr.bf16.mxu1 %v520_v36 }
 0x148   :  { %523 = vmatpush3.bf16.msra.mxu1 %v520_v36 }
 0x149   :  { %525 = vmatprep.subr.bf16.mxu1 %v524_v39 }
 0x14c   :  { %527 = vmatpush3.bf16.msra.mxu1 %v524_v39 }
 0x214   :  { %v422_v41 = vpop.f32.mrb[0].mxu0 }
 0x215   :  { %v176_v42 = vadd.f32 %v422_v41, %v346_v40  ;;  %v170_v43 = vpop.f32.mrb[1].mxu0 }
 0x216   :  { %v171_v44 = vadd.f32 %v346_v40, %v170_v43 }
 0x217   :  { %v190_v45 = vmul.f32 %v176_v42, %v176_v42 }
 0x218   :  { %v189_v46 = vmul.f32 %v171_v44, %v171_v44  ;;  %v425_v47 = vpop.f32.mrb[2].mxu0 }
 0x219   :  { %v194_v48 = vmul.f32 %v190_v45, %v176_v42  ;;  %v186_v49 = vadd.f32 %v425_v47, %v346_v40  ;;  %v180_v50 = vpop.f32.mrb[3].mxu0 }
 0x21a   :  { %v193_v51 = vmul.f32 %v189_v46, %v171_v44  ;;  %v181_v52 = vadd.f32 %v346_v40, %v180_v50 }
 0x21b   :  { %v198_v53 = vmul.f32 0.044715, %v194_v48  ;;  %v192_v54 = vmul.f32 %v186_v49, %v186_v49 }
 0x21c   :  { %v191_v55 = vmul.f32 %v181_v52, %v181_v52  ;;  %v197_v56 = vmul.f32 0.044715, %v193_v51 }
 0x21d   :  { %v202_v57 = vadd.f32 %v198_v53, %v176_v42  ;;  %v196_v58 = vmul.f32 %v192_v54, %v186_v49 }
 0x21e   :  { %v195_v59 = vmul.f32 %v191_v55, %v181_v52  ;;  %v201_v60 = vadd.f32 %v197_v56, %v171_v44 }
 0x21f   :  { %v206_v61 = vmul.f32 0.7978846, %v202_v57  ;;  %v200_v62 = vmul.f32 0.044715, %v196_v58 }
 0x220   :  { %v199_v63 = vmul.f32 0.044715, %v195_v59  ;;  %v205_v0 = vmul.f32 0.7978846, %v201_v60 }
 0x221   :  { %v204_v1 = vadd.f32 %v200_v62, %v186_v49  ;;  %537 = vtanh.f32 %v206_v61 }
 0x222   :  { %v203_v4 = vadd.f32 %v199_v63, %v181_v52  ;;  %539 = vtanh.f32 %v205_v0 }
 0x223   :  { %v208_v5 = vmul.f32 0.7978846, %v204_v1 }
 0x224   :  { %v207_v8 = vmul.f32 0.7978846, %v203_v4 }
 0x225   :  { %541 = vtanh.f32 %v208_v5 }
 0x226   :  { %543 = vtanh.f32 %v207_v8 }
 0x22b   :  { %v538_v9 = vpop.eup %537 }
 0x22c   :  { %v540_v10 = vpop.eup %539  ;;  %v214_v11 = vadd.f32 1.0, %v538_v9 }
 0x22d   :  { %v213_v12 = vadd.f32 1.0, %v540_v10 }
 0x22e   :  { %v218_v13 = vmul.f32 0.5, %v214_v11 }
 0x22f   :  { %v542_v14 = vpop.eup %541  ;;  %v217_v15 = vmul.f32 0.5, %v213_v12 }
 0x230   :  { %v544_v16 = vpop.eup %543  ;;  %v216_v17 = vadd.f32 1.0, %v542_v14  ;;  %v222_v20 = vmul.f32 %v218_v13, %v176_v42 }
 0x231   :  { %v221_v18 = vmul.f32 %v217_v15, %v171_v44  ;;  %v215_v19 = vadd.f32 1.0, %v544_v16 }
 0x232   :  { %v220_v21 = vmul.f32 0.5, %v216_v17 }
 0x233   :  { %458 = vmatprep.mubr.f32.mxu1 %v221_v18  ;;  %v219_v22 = vmul.f32 0.5, %v215_v19 }
 0x234   :  { %459 = vmatmul.mubr.f32.vlgmr.msra.gmra.mrb[0].mxu1 %v222_v20  ;;  %v224_v24 = vmul.f32 %v220_v21, %v186_v49 }
 0x235   :  { %v223_v23 = vmul.f32 %v219_v22, %v181_v52 }
 0x237   :  { %461 = vmatprep.mubr.f32.mxu1 %v223_v23 }
 0x238   :  { %462 = vmatmul.mubr.f32.gmra.mrb[2].mxu1 %v224_v24 }
 0x307   :  { %v460_v26 = vpop.f32.mrb[0].mxu1 }
 0x308   :  { %v320_v27 = vadd.f32 %v460_v26, %v347_v25  ;;  %v314_v28 = vpop.f32.mrb[1].mxu1 }
 0x309   :  { %v315_v29 = vadd.f32 %v347_v25, %v314_v28 }
 0x30a   :  { %v334_v30 = vadd.f32 %v320_v27, %v589_v6 }
 0x30b   :  { %v333_v31 = vadd.f32 %v315_v29, %v579_v2  ;;  %v463_v32 = vpop.f32.mrb[2].mxu1 }
 0x30c   :  { %338 = vst [vmem:[%s727_s5 + $0x8] sm:$0xff] %v334_v30  ;;  %v330_v33 = vadd.f32 %v463_v32, %v347_v25  ;;  %v324_v34 = vpop.f32.mrb[3].mxu1 }
 0x30d   :  { %337 = vst [vmem:[%s727_s5] sm:$0xff] %v333_v31  ;;  %v325_v35 = vadd.f32 %v347_v25, %v324_v34 }
 0x30e   :  { %v336_v36 = vadd.f32 %v330_v33, %v594_v7 }
 0x30f   :  { %v335_v37 = vadd.f32 %v325_v35, %v584_v3 }
 0x310   :  { %340 = vst [vmem:[%s727_s5 + $0x18] sm:$0xff] %v336_v36 }
 0x311   :  { %339 = vst [vmem:[%s727_s5 + $0x10] sm:$0xff] %v335_v37 }

// kernel: swt_backbone_forward.11
= control target key start
LH: loop header
LB: loop body
LE: loop exit
PB: predicated region body
PF: predicated region fallthrough
CT: control target
= control target key end

     0   :  { %8 = vsyncpa [#allocation3], 0  ;;  %s716_s0 = inlined_call_operand.vmem [shape: f32[2,16,128], index: 0, kind: input, shape index: {}]   ;;  %s717_s1 = inlined_call_operand.hbm [shape: f32[2,16,128], index: 1, kind: output, shape index: {0}]   ;;  %s718_s2 = inlined_call_operand.hbm [shape: f32[2,4,128], index: 2, kind: output, shape index: {1}]  }
   0x1   :  { %10 = vsyncpa [#allocation3 + $0x1], 0 }
   0x2   :  { %11 = vsyncpa [#allocation5], 0 }
   0x3   :  { %13 = vsyncpa [#allocation5 + $0x1], 0  ;;  %s579_s9 = smov 0   ;;  %s581_s10 = smov 0  }
   0x4   :  { %s583_s11 = smov 0   ;;  %s585_s12 = smov 0  }
   0x5 LB: > { %s600_s13 = sadd.s32 4294967295, %s556_s12   ;;  %s388_s14 = sadd.s32 4294967294, %s556_s12   ;;  %s556_s12 = sphi %s585_s12, %s724_s12   ;;  %s552_s11 = sphi %s583_s11, %s723_s11   ;;  %s548_s10 = sphi %s581_s10, %s722_s10   ;;  %s544_s9 = sphi %s579_s9, %s721_s9  }
   0x6   : > { %s604_s15 = sadd.s32 1, %s556_s12   ;;  %s52_s16 = sadd.s32 1, %s552_s11 }
   0x7   : > { %s49_s17 = ssub.s32 %s556_s12, %s604_s15  ;;  %p62_p0 = scmp.ne.s32.totalorder %s552_s11, %s548_s10 }
   0x8   : > { %p50_p1 = scmp.eq.s32.totalorder %s49_s17, 0  ;;  %p63_p2 = scmp.eq.s32.totalorder %s600_s13, 1 }
   0x9   : > { %p68_p3 = scmp.ne.s32.totalorder %s548_s10, %s544_s9  ;;  %p69_p4 = scmp.eq.s32.totalorder %s388_s14, 1 }
   0xa   : > { %s615_s18 = scalar_select %p50_p1, %s552_s11, %s52_s16  }
   0xb   : > { %p617_p5 = por %p63_p2, %p62_p0  ;;  %p621_p6 = por %p69_p4, %p68_p3 }
   0xc   : > { %p391_p7 = scmp.ge.s32.totalorder %s556_s12, 1  ;;  %p121_p8 = scmp.lt.s32.totalorder %s556_s12, 3 }
   0xe   : > { %p122_p9 = pnand %p391_p7, %p121_p8 }
   0xf   : > { %p148_p10 = scmp.lt.s32.totalorder (!%p122_p9), %s600_s13, 1  ;;  %v155_v0 = vlaneseq (!%p122_p9)  ;;  %v558_v2 = vmov (!%p122_p9), 0.0   ;;  %s633_s26 = sand.u32 (!%p122_p9), 1, %s548_s10   ;;  %v559_v24 = vmov (!%p122_p9), 1983009808  }
  0x10   : > { %125 = sbr.rel (%p122_p9) target bundleno = 383 (0x17f), region = 24  ;;  %v199_v25 = vunpack.c.l.s4 (!%p122_p9), %v559_v24  ;;  %s392_s27 = sshll.u32 (!%p122_p9), %s633_s26, 4 }
  0x11   : > { %v156_v1 = vand.u32 (!%p122_p9), 127, %v155_v0  ;;  %v202_v27 = vshrl.u32 (!%p122_p9), %v155_v0, 7  ;;  %s409_s28 = sshll.u32 (!%p122_p9), %s600_s13, 8  ;;  %s140_s29 = scalar_lea.vmem (!%p122_p9), [#allocation2], %s392_s27 }
  0x12   : > { %v200_v26 = vunpack.c.0.s8 (!%p122_p9), %v199_v25  ;;  %s281_s30 = sshll.u32 (!%p122_p9), %s140_s29, 4  ;;  %s640_s5 = scalar_lea.hbm (!%p122_p9), %s717_s1, %s409_s28  ;;  %s642_s30 = int_to_ptr.vmem [resolvable:$true] %s281_s30 }
  0x13   : > { %vm157_vm0 = vcmp.lt.s32.totalorder (!%p122_p9), %v156_v1, 64  ;;  %s263_s6 = scalar_lea.sflag (!%p122_p9), [#allocation3], %s633_s26  ;;  %s462_s7 = scalar_lea.vmem (!%p122_p9), %s642_s30, 256 }
  0x14   : > { %v396_v3 = vsel (!%p122_p9), %vm157_vm0, 1.0, %v558_v2  ;;  %v203_v30 = vsub.s32 (!%p122_p9), %v200_v26, %v202_v27  ;;  %p463_p11 = scmp.ne.s32.totalorder (!%p122_p9), %s642_s30, %s462_s7  ;;  %s560_s8 = smov (!%p122_p9), [#allocation2]  }
  0x15   : > { %s466_s14 = sshll.u32 (!%p122_p9), %s560_s8, 4  ;;  %s467_s14 = int_to_ptr.vmem [resolvable:$false] %s466_s14 }
  0x16   : > { %p464_p12 = pnand (!%p122_p9), %p463_p11, %p617_p5  ;;  %s468_s16 = scalar_lea.vmem (!%p122_p9), %s467_s14, 512 }
  0x17   : > { %s149_s21 = scalar_select %p148_p10, %s600_s13, 1 }
  0x18   : > { %p465_p13 = pneg %p464_p12  ;;  %p469_p0 = scmp.lt.s32.totalorder %s642_s30, %s467_s14 }
  0x19   : > { %s408_s22 = sshll.u32 %s149_s21, 4  ;;  %p470_p1 = scmp.lt.s32.totalorder %s468_s16, %s462_s7 }
  0x1a   : > { %s152_s25 = scalar_lea.vmem %s716_s0, %s408_s22 }
  0x1b   : > { %v153_v4 = vld [vmem:[%s152_s25] sm:$0xff]  ;;  %v154_v5 = vld [vmem:[%s152_s25 + $0x8] sm:$0xff]  ;;  %p471_p2 = por %p470_p1, %p469_p0 }
  0x1c   : > { %v160_v6 = vmul.f32 %v396_v3, %v153_v4  ;;  %v161_v7 = vmul.f32 %v396_v3, %v154_v5 }
  0x1d   : > { %p472_p3 = pnand %p471_p2, %p465_p13 }
  0x1e   : > { %162 = vadd.xlane.f32.xlu0 %v160_v6 }
  0x22   : > { %164 = vadd.xlane.f32.xlu0 %v161_v7 }
  0xab   : > { %v163_v8 = vpop.xlane.xlu0 %162 }
  0xac   : > { %v166_v9 = vmul.f32 0.015625, %v163_v8 }
  0xae   : > { %v168_v10 = vsub.f32 %v153_v4, %v166_v9 }
  0xaf   : > { %v165_v11 = vpop.xlane.xlu0 %164 }
  0xb0   : > { %v167_v12 = vmul.f32 0.015625, %v165_v11  ;;  %v170_v13 = vmul.f32 %v396_v3, %v168_v10 }
  0xb2   : > { %v169_v14 = vsub.f32 %v154_v5, %v167_v12  ;;  %v172_v15 = vmul.f32 %v170_v13, %v170_v13 }
  0xb4   : > { %174 = vadd.xlane.f32.xlu1 %v172_v15  ;;  %v171_v16 = vmul.f32 %v396_v3, %v169_v14 }
  0xb6   : > { %v173_v17 = vmul.f32 %v171_v16, %v171_v16 }
  0xb8   : > { %176 = vadd.xlane.f32.xlu1 %v173_v17 }
 0x141   : > { %v175_v18 = vpop.xlane.xlu1 %174 }
 0x142   : > { %v178_v19 = vmul.f32 0.015625, %v175_v18 }
 0x144   : > { %v180_v20 = vadd.f32 1e-05, %v178_v19 }
 0x145   : > { %v177_v21 = vpop.xlane.xlu1 %176 }
 0x146   : > { %458 = vrsqrt.f32 %v180_v20  ;;  %v179_v22 = vmul.f32 0.015625, %v177_v21 }
 0x148   : > { %v181_v23 = vadd.f32 1e-05, %v179_v22 }
 0x14a   : > { %460 = vrsqrt.f32 %v181_v23 }
 0x150   : > { %v459_v28 = vpop.eup %458 }
 0x151   : > { %v184_v29 = vmul.f32 %v459_v28, %v170_v13 }
 0x153   : > { %v190_v31 = vcombine.high %v184_v29, %v184_v29  ;;  %186 = vst [vmem:[%s140_s29] sm:$0xff] %v184_v29 }
 0x154   : > { %v461_v32 = vpop.eup %460 }
 0x155   : > { %v194_v33 = vmax.f32 %v184_v29, %v190_v31  ;;  %v185_v34 = vmul.f32 %v461_v32, %v171_v16 }
 0x157   : > { %v204_v35 = vrot.slane %v194_v33, %v203_v30  ;;  %v191_v36 = vcombine.high %v185_v34, %v185_v34  ;;  %187 = vst [vmem:[%s140_s29 + $0x8] sm:$0xff] %v185_v34 }
 0x158   : > { %475 = shalt.err (!%p472_p3)
}
 0x159   : > { %s476_s17 = scalar_lea.hbm %s640_s5, 256  ;;  %s480_s23 = scalar_lea.hbm %s717_s1, 512 }
 0x15a   : > { %p477_p4 = scmp.ne.s32.totalorder %s640_s5, %s476_s17  ;;  %p481_p9 = scmp.lt.u32.totalorder %s640_s5, %s717_s1 }
 0x15b   : > { %p482_p10 = scmp.lt.u32.totalorder %s480_s23, %s476_s17  ;;  %p484_p12 = scmp.lt.u32.totalorder %s476_s17, %s640_s5 }
 0x15c   : > { %p478_p7 = pnand %p477_p4, %p617_p5 }
 0x15d   : > { %p483_p11 = por %p482_p10, %p481_p9 }
 0x15e   : > { %p479_p8 = pneg %p478_p7 }
 0x15f   : > { %p485_p13 = por %p484_p12, %p483_p11 }
 0x161   : > { %p486_p0 = pnand %p485_p13, %p479_p8 }
 0x163   : > { %489 = shalt.err (!%p486_p0)
}
 0x164   : > { %s561_s27 = smov 128   ;;  %s562_s28 = smov 8   ;;  %v195_v37 = vmax.f32 %v185_v34, %v191_v36  ;;  %v205_v38 = vcombine.high %v204_v35, %v204_v35  ;;  %v397_v39 = vrot.slane %v204_v35, 9  ;;  %v240_v40 = vsub.s32 0, %v202_v27 }
 0x165   : > { %410 = dma.vmem_to_hbm [thread:$0]  (%p617_p5), %s642_s30, 256, %s640_s5, %s263_s6, %s561_s27, %s561_s27, %s562_s28   ;;  %vm254_vm1 = vcmask 1041409   ;;  %vm256_vm2 = vcmask 1042434   ;;  %vm258_vm3 = vcmask 1043459  }
 0x166   : > { %s393_s29 = sshll.u32 %s633_s26, 2  ;;  %v212_v41 = vrot.slane %v195_v37, %v203_v30  ;;  %v398_v42 = vrot.slane %v205_v38, 9  ;;  %v230_v43 = vmax.f32 %v204_v35, %v397_v39  ;;  %s405_s30 = sshll.u32 %s600_s13, 6 }
 0x167   : > { %s147_s3 = scalar_lea.vmem [#allocation4], %s393_s29  ;;  %s673_s7 = scalar_lea.hbm %s718_s2, %s405_s30 }
 0x168   : > { %v213_v44 = vcombine.high %v212_v41, %v212_v41  ;;  %v399_v45 = vrot.slane %v212_v41, 9  ;;  %v231_v46 = vmax.f32 %v205_v38, %v398_v42  ;;  %v241_v49 = vrot.slane %v230_v43, %v240_v40  ;;  %s297_s4 = sshll.u32 %s147_s3, 4  ;;  %s268_s8 = scalar_lea.sflag [#allocation5], %s633_s26  ;;  %s675_s4 = int_to_ptr.vmem [resolvable:$true] %s297_s4 }
 0x169   : > { %s490_s14 = scalar_lea.vmem %s675_s4, 64  ;;  %s563_s13 = smov [#allocation4]  }
 0x16a   : > { %v400_v47 = vrot.slane %v213_v44, 9  ;;  %v232_v48 = vmax.f32 %v212_v41, %v399_v45  ;;  %v245_v50 = vrot.slane %v231_v46, %v240_v40  ;;  %p491_p1 = scmp.ne.s32.totalorder %s675_s4, %s490_s14  ;;  %s494_s16 = sshll.u32 %s563_s13, 4  ;;  %s495_s16 = int_to_ptr.vmem [resolvable:$false] %s494_s16 }
 0x16b   : > { %s496_s17 = scalar_lea.vmem %s495_s16, 128  ;;  %p497_p4 = scmp.lt.s32.totalorder %s675_s4, %s495_s16 }
 0x16c   : > { %v233_v51 = vmax.f32 %v213_v44, %v400_v47  ;;  %v249_v52 = vrot.slane %v232_v48, %v240_v40  ;;  %v255_v53 = vsel %vm254_vm1, %v245_v50, %v241_v49  ;;  %p492_p2 = pnand %p491_p1, %p617_p5  ;;  %p498_p7 = scmp.lt.s32.totalorder %s496_s17, %s490_s14 }
 0x16e   : > { %v253_v54 = vrot.slane %v233_v51, %v240_v40  ;;  %v257_v55 = vsel %vm256_vm2, %v249_v52, %v255_v53  ;;  %p493_p3 = pneg %p492_p2  ;;  %p499_p8 = por %p498_p7, %p497_p4 }
 0x170   : > { %v259_v56 = vsel %vm258_vm3, %v253_v54, %v257_v55  ;;  %p500_p9 = pnand %p499_p8, %p493_p3 }
 0x171   : > { %261 = vst [vmem:[%s147_s3] sm:$0xf] %v259_v56 }
 0x172   : > { %503 = shalt.err (!%p500_p9)
}
 0x173   : > { %s504_s26 = scalar_lea.hbm %s673_s7, 64  ;;  %s508_s23 = scalar_lea.hbm %s718_s2, 128 }
 0x174   : > { %p505_p10 = scmp.ne.s32.totalorder %s673_s7, %s504_s26  ;;  %p509_p13 = scmp.lt.u32.totalorder %s673_s7, %s718_s2 }
 0x175   : > { %p510_p0 = scmp.lt.u32.totalorder %s508_s23, %s504_s26  ;;  %p512_p2 = scmp.lt.u32.totalorder %s504_s26, %s673_s7 }
 0x176   : > { %p506_p11 = pnand %p505_p10, %p617_p5 }
 0x177   : > { %p511_p1 = por %p510_p0, %p509_p13 }
 0x178   : > { %p507_p12 = pneg %p506_p11 }
 0x179   : > { %p513_p3 = por %p512_p2, %p511_p1 }
 0x17b   : > { %p514_p4 = pnand %p513_p3, %p507_p12 }
 0x17d   : > { %517 = shalt.err (!%p514_p4)
}
 0x17e   : > { %411 = dma.vmem_to_hbm [thread:$0]  (%p617_p5), %s675_s4, 64, %s673_s7, %s268_s8  }
 0x17f PF: > { %p421_p7 = scmp.ge.s32.totalorder %s556_s12, 2  ;;  %s309_s27 = sand.u32 1, %s544_s9  }
 0x180   : > { %s310_s28 = scalar_lea.sflag [#allocation3], %s309_s27 }
 0x181   : > { %p415_p8 = pnand %p421_p7, %p621_p6 }
 0x183   : > { %535 = dma.done.wait (!%p415_p8), %s310_s28, 256  }
 0x184   : > { %537 = vsyncadd (!%p415_p8), %s310_s28, 4294967040  ;;  %s319_s29 = scalar_lea.sflag [#allocation5], %s309_s27 }
 0x185   : > { %539 = dma.done.wait (!%p415_p8), %s319_s29, 64  }
 0x186   : > { %541 = vsyncadd (!%p415_p8), %s319_s29, 4294967232  ;;  %p16_p5 = scmp.ge.s32.totalorder %s604_s15, 4   ;;  %s721_s9 = smov %s548_s10 }
 0x187   : > { %s722_s10 = smov %s552_s11  ;;  %s723_s11 = smov %s615_s18 }
 0x188   : > { %s724_s12 = smov %s604_s15  ;;  %18 = sbr.rel (!%p16_p5) target bundleno = 5 (0x5), region = 76 }
 0x18f   :  { %324 = vsyncpa [#allocation3], 1 }
 0x190   :  { %326 = vsyncpa [#allocation3 + $0x1], 1 }
 0x191   :  { %327 = vsyncpa [#allocation5], 1 }
 0x192   :  { %329 = vsyncpa [#allocation5 + $0x1], 1 }

// kernel: swt_backbone_forward.10
= control target key start
LH: loop header
LB: loop body
LE: loop exit
PB: predicated region body
PF: predicated region fallthrough
CT: control target
= control target key end

     0   :  { %8 = vsyncpa [#allocation3], 0  ;;  %s1066_s0 = inlined_call_operand.vmem [shape: f32[2,64,128], index: 0, kind: input, shape index: {}]   ;;  %s1067_s1 = inlined_call_operand.vmem [shape: f32[2,64,128], index: 1, kind: output, shape index: {0}]   ;;  %s1068_s2 = inlined_call_operand.hbm [shape: f32[2,16,128], index: 2, kind: output, shape index: {1}]  }
   0x1   :  { %10 = vsyncpa [#allocation3 + $0x1], 0  ;;  %s827_s9 = smov 0   ;;  %s829_s10 = smov 0  }
   0x2   :  { %s831_s11 = smov 0   ;;  %s833_s12 = smov 0  }
   0x3 LB: > { %s848_s13 = sadd.s32 4294967295, %s805_s12   ;;  %s650_s14 = sadd.s32 4294967294, %s805_s12   ;;  %s805_s12 = sphi %s833_s12, %s1074_s12   ;;  %s801_s11 = sphi %s831_s11, %s1073_s11   ;;  %s797_s10 = sphi %s829_s10, %s1072_s10   ;;  %s793_s9 = sphi %s827_s9, %s1071_s9  }
   0x4   : > { %s852_s15 = sadd.s32 1, %s805_s12   ;;  %s75_s16 = sadd.s32 1, %s801_s11 }
   0x5   : > { %s72_s17 = ssub.s32 %s805_s12, %s852_s15  ;;  %p85_p0 = scmp.ne.s32.totalorder %s801_s11, %s797_s10 }
   0x6   : > { %p73_p1 = scmp.eq.s32.totalorder %s72_s17, 0  ;;  %p86_p2 = scmp.eq.s32.totalorder %s848_s13, 1 }
   0x7   : > { %p91_p3 = scmp.ne.s32.totalorder %s797_s10, %s793_s9  ;;  %p92_p4 = scmp.eq.s32.totalorder %s650_s14, 1 }
   0x8   : > { %s863_s18 = scalar_select %p73_p1, %s801_s11, %s75_s16  }
   0x9   : > { %p865_p5 = por %p86_p2, %p85_p0  ;;  %p869_p6 = por %p92_p4, %p91_p3 }
   0xa   : > { %p653_p7 = scmp.ge.s32.totalorder %s805_s12, 1  ;;  %p118_p8 = scmp.lt.s32.totalorder %s805_s12, 3 }
   0xc   : > { %p119_p9 = pnand %p653_p7, %p118_p8 }
   0xd   : > { %p145_p10 = scmp.lt.s32.totalorder (!%p119_p9), %s848_s13, 1  ;;  %v163_v0 = vlaneseq (!%p119_p9)  ;;  %v807_v2 = vmov (!%p119_p9), 0.0   ;;  %vm516_vm1 = vcmask (!%p119_p9), 1041409   ;;  %vm518_vm2 = vcmask (!%p119_p9), 1042434   ;;  %s142_s29 = sand.u32 (!%p119_p9), 1, %s797_s10  }
   0xe   : > { %122 = sbr.rel (%p119_p9) target bundleno = 385 (0x181), region = 24  ;;  %vm520_vm3 = vcmask (!%p119_p9), 1043459   ;;  %vm522_vm4 = vcmask (!%p119_p9), 1044484   ;;  %vm524_vm5 = vcmask (!%p119_p9), 1045509   ;;  %vm526_vm6 = vcmask (!%p119_p9), 1046534   ;;  %s654_s30 = sshll.u32 (!%p119_p9), %s142_s29, 4 }
   0xf   : > { %v164_v1 = vand.u32 (!%p119_p9), 127, %v163_v0  ;;  %s683_s3 = sshll.u32 (!%p119_p9), %s848_s13, 8  ;;  %s144_s4 = scalar_lea.vmem (!%p119_p9), [#allocation2], %s654_s30  ;;  %vm528_vm7 = vcmask (!%p119_p9), 1047559  }
  0x10   : > { %s563_s5 = sshll.u32 (!%p119_p9), %s144_s4, 4  ;;  %s1018_s8 = scalar_lea.hbm (!%p119_p9), %s1068_s2, %s683_s3  ;;  %s1020_s5 = int_to_ptr.vmem [resolvable:$true] %s563_s5 }
  0x11   : > { %vm165_vm0 = vcmp.lt.s32.totalorder (!%p119_p9), %v164_v1, 32  ;;  %s743_s14 = scalar_lea.vmem (!%p119_p9), %s1020_s5, 256  ;;  %s809_s16 = smov (!%p119_p9), [#allocation2]  }
  0x12   : > { %v886_v3 = vsel (!%p119_p9), %vm165_vm0, 1.0, %v807_v2  ;;  %p744_p11 = scmp.ne.s32.totalorder (!%p119_p9), %s1020_s5, %s743_s14  ;;  %s747_s17 = sshll.u32 (!%p119_p9), %s809_s16, 4  ;;  %s748_s17 = int_to_ptr.vmem [resolvable:$false] %s747_s17 }
  0x13   : > { %p750_p0 = scmp.lt.s32.totalorder (!%p119_p9), %s1020_s5, %s748_s17 }
  0x14   : > { %p745_p12 = pnand (!%p119_p9), %p744_p11, %p865_p5 }
  0x15   : > { %s877_s21 = scalar_select %p145_p10, %s848_s13, 1 }
  0x16   : > { %s1025_s13 = scalar_lea.sflag [#allocation3], %s142_s29  ;;  %p746_p13 = pneg %p745_p12 }
  0x17   : > { %s681_s22 = sshll.u32 %s877_s21, 6  ;;  %s749_s21 = scalar_lea.vmem %s748_s17, 512 }
  0x18   : > { %s149_s25 = scalar_lea.vmem %s1066_s0, %s681_s22  ;;  %s941_s28 = scalar_lea.vmem %s1067_s1, %s681_s22 }
  0x19   : > { %v155_v4 = vld [vmem:[%s149_s25] sm:$0xff]  ;;  %v156_v6 = vld [vmem:[%s149_s25 + $0x8] sm:$0xff]  ;;  %v157_v12 = vld [vmem:[%s149_s25 + $0x10] sm:$0xff]  ;;  %p751_p1 = scmp.lt.s32.totalorder %s749_s21, %s743_s14 }
  0x1a   : > { %v159_v5 = vld [vmem:[%s149_s25 + $0x20] sm:$0xff]  ;;  %v168_v7 = vmul.f32 %v886_v3, %v155_v4  ;;  %v160_v9 = vld [vmem:[%s149_s25 + $0x28] sm:$0xff]  ;;  %v169_v10 = vmul.f32 %v886_v3, %v156_v6  ;;  %v158_v13 = vld [vmem:[%s149_s25 + $0x18] sm:$0xff]  ;;  %v170_v14 = vmul.f32 %v886_v3, %v157_v12 }
  0x1b   : > { %v172_v8 = vmul.f32 %v886_v3, %v159_v5  ;;  %v173_v11 = vmul.f32 %v886_v3, %v160_v9  ;;  %v171_v15 = vmul.f32 %v886_v3, %v158_v13  ;;  %v161_v16 = vld [vmem:[%s149_s25 + $0x30] sm:$0xff]  ;;  %v162_v17 = vld [vmem:[%s149_s25 + $0x38] sm:$0xff]  ;;  %p752_p2 = por %p751_p1, %p750_p0 }
  0x1c   : > { %176 = vadd.xlane.f32.xlu0 %v168_v7  ;;  %v174_v18 = vmul.f32 %v886_v3, %v161_v16  ;;  %v175_v19 = vmul.f32 %v886_v3, %v162_v17 }
  0x1d   : > { %184 = vadd.xlane.f32.xlu1 %v172_v8  ;;  %p753_p3 = pnand %p752_p2, %p746_p13 }
  0x20   : > { %178 = vadd.xlane.f32.xlu0 %v169_v10 }
  0x21   : > { %186 = vadd.xlane.f32.xlu1 %v173_v11 }
  0x24   : > { %180 = vadd.xlane.f32.xlu0 %v170_v14 }
  0x25   : > { %182 = vadd.xlane.f32.xlu1 %v171_v15 }
  0x28   : > { %188 = vadd.xlane.f32.xlu0 %v174_v18 }
  0x29   : > { %190 = vadd.xlane.f32.xlu1 %v175_v19 }
  0xa9   : > { %v177_v20 = vpop.xlane.xlu0 %176 }
  0xaa   : > { %v185_v21 = vpop.xlane.xlu1 %184  ;;  %v192_v22 = vmul.f32 0.03125, %v177_v20 }
  0xab   : > { %v196_v23 = vmul.f32 0.03125, %v185_v21 }
  0xac   : > { %v200_v24 = vsub.f32 %v155_v4, %v192_v22 }
  0xad   : > { %v204_v25 = vsub.f32 %v159_v5, %v196_v23  ;;  %v179_v26 = vpop.xlane.xlu0 %178  ;;  %v293_v23 = vshrl.u32 %v163_v0, 7 }
  0xae   : > { %v187_v27 = vpop.xlane.xlu1 %186  ;;  %v193_v28 = vmul.f32 0.03125, %v179_v26  ;;  %v897_v30 = vmul.f32 %v886_v3, %v200_v24 }
  0xaf   : > { %v197_v29 = vmul.f32 0.03125, %v187_v27  ;;  %v900_v31 = vmul.f32 %v886_v3, %v204_v25 }
  0xb0   : > { %v201_v32 = vsub.f32 %v156_v6, %v193_v28  ;;  %v216_v34 = vmul.f32 %v897_v30, %v897_v30 }
  0xb1   : > { %v205_v33 = vsub.f32 %v160_v9, %v197_v29  ;;  %v181_v35 = vpop.xlane.xlu0 %180  ;;  %v220_v37 = vmul.f32 %v900_v31, %v900_v31 }
  0xb2   : > { %v183_v36 = vpop.xlane.xlu1 %182  ;;  %v194_v38 = vmul.f32 0.03125, %v181_v35  ;;  %224 = vadd.xlane.f32.xlu0 %v216_v34  ;;  %v907_v40 = vmul.f32 %v886_v3, %v201_v32 }
  0xb3   : > { %v195_v39 = vmul.f32 0.03125, %v183_v36  ;;  %v910_v41 = vmul.f32 %v886_v3, %v205_v33 }
  0xb4   : > { %v202_v42 = vsub.f32 %v157_v12, %v194_v38  ;;  %v217_v44 = vmul.f32 %v907_v40, %v907_v40  ;;  %v808_v12 = vmov 1983009808   ;;  %v954_v38 = vsub.s32 0, %v293_v23 }
  0xb5   : > { %v203_v43 = vsub.f32 %v158_v13, %v195_v39  ;;  %v189_v45 = vpop.xlane.xlu0 %188  ;;  %v221_v47 = vmul.f32 %v910_v41, %v910_v41  ;;  %v290_v13 = vunpack.c.l.s4 %v808_v12 }
  0xb6   : > { %v191_v46 = vpop.xlane.xlu1 %190  ;;  %v198_v48 = vmul.f32 0.03125, %v189_v45  ;;  %232 = vadd.xlane.f32.xlu0 %v220_v37  ;;  %226 = vadd.xlane.f32.xlu1 %v217_v44  ;;  %v917_v50 = vmul.f32 %v886_v3, %v202_v42 }
  0xb7   : > { %v199_v49 = vmul.f32 0.03125, %v191_v46  ;;  %v920_v51 = vmul.f32 %v886_v3, %v203_v43  ;;  %v291_v22 = vunpack.c.0.s8 %v290_v13 }
  0xb8   : > { %v206_v52 = vsub.f32 %v161_v16, %v198_v48  ;;  %v218_v54 = vmul.f32 %v917_v50, %v917_v50 }
  0xb9   : > { %v207_v53 = vsub.f32 %v162_v17, %v199_v49  ;;  %v219_v55 = vmul.f32 %v920_v51, %v920_v51  ;;  %v946_v29 = vsub.s32 %v291_v22, %v293_v23 }
  0xba   : > { %234 = vadd.xlane.f32.xlu1 %v221_v47  ;;  %228 = vadd.xlane.f32.xlu0 %v218_v54  ;;  %v927_v56 = vmul.f32 %v886_v3, %v206_v52 }
  0xbb   : > { %v930_v57 = vmul.f32 %v886_v3, %v207_v53 }
  0xbc   : > { %v222_v58 = vmul.f32 %v927_v56, %v927_v56 }
  0xbd   : > { %v223_v59 = vmul.f32 %v930_v57, %v930_v57 }
  0xbe   : > { %230 = vadd.xlane.f32.xlu1 %v219_v55  ;;  %236 = vadd.xlane.f32.xlu0 %v222_v58 }
  0xc2   : > { %238 = vadd.xlane.f32.xlu1 %v223_v59 }
 0x13f   : > { %v225_v60 = vpop.xlane.xlu0 %224 }
 0x140   : > { %v240_v61 = vmul.f32 0.03125, %v225_v60 }
 0x142   : > { %v248_v62 = vadd.f32 1e-05, %v240_v61 }
 0x143   : > { %v227_v63 = vpop.xlane.xlu1 %226  ;;  %v233_v1 = vpop.xlane.xlu0 %232 }
 0x144   : > { %727 = vrsqrt.f32 %v248_v62  ;;  %v241_v2 = vmul.f32 0.03125, %v227_v63  ;;  %v244_v4 = vmul.f32 0.03125, %v233_v1 }
 0x146   : > { %v249_v5 = vadd.f32 1e-05, %v241_v2  ;;  %v252_v3 = vadd.f32 1e-05, %v244_v4 }
 0x147   : > { %v235_v6 = vpop.xlane.xlu1 %234  ;;  %v229_v7 = vpop.xlane.xlu0 %228 }
 0x148   : > { %729 = vrsqrt.f32 %v249_v5  ;;  %v245_v8 = vmul.f32 0.03125, %v235_v6  ;;  %v242_v9 = vmul.f32 0.03125, %v229_v7 }
 0x149   : > { %731 = vrsqrt.f32 %v252_v3 }
 0x14a   : > { %v253_v10 = vadd.f32 1e-05, %v245_v8  ;;  %v250_v11 = vadd.f32 1e-05, %v242_v9 }
 0x14b   : > { %v231_v14 = vpop.xlane.xlu1 %230  ;;  %v237_v15 = vpop.xlane.xlu0 %236 }
 0x14c   : > { %733 = vrsqrt.f32 %v253_v10  ;;  %v243_v16 = vmul.f32 0.03125, %v231_v14  ;;  %v246_v17 = vmul.f32 0.03125, %v237_v15 }
 0x14d   : > { %735 = vrsqrt.f32 %v250_v11 }
 0x14e   : > { %v728_v18 = vpop.eup %727  ;;  %v251_v19 = vadd.f32 1e-05, %v243_v16  ;;  %v254_v20 = vadd.f32 1e-05, %v246_v17 }
 0x14f   : > { %v264_v21 = vmul.f32 %v728_v18, %v897_v30  ;;  %v239_v24 = vpop.xlane.xlu1 %238 }
 0x150   : > { %737 = vrsqrt.f32 %v251_v19  ;;  %v247_v25 = vmul.f32 0.03125, %v239_v24 }
 0x151   : > { %272 = vst [vmem:[%s941_s28] sm:$0xff] %v264_v21  ;;  %739 = vrsqrt.f32 %v254_v20 }
 0x152   : > { %v730_v26 = vpop.eup %729  ;;  %v255_v27 = vadd.f32 1e-05, %v247_v25 }
 0x153   : > { %v732_v28 = vpop.eup %731  ;;  %v265_v32 = vmul.f32 %v730_v26, %v907_v40 }
 0x154   : > { %v268_v33 = vmul.f32 %v732_v28, %v900_v31  ;;  %741 = vrsqrt.f32 %v255_v27 }
 0x155   : > { %273 = vst [vmem:[%s941_s28 + $0x8] sm:$0xff] %v265_v32  ;;  %v280_v0 = vmax.f32 %v264_v21, %v265_v32 }
 0x156   : > { %v734_v30 = vpop.eup %733  ;;  %276 = vst [vmem:[%s941_s28 + $0x20] sm:$0xff] %v268_v33 }
 0x157   : > { %v736_v34 = vpop.eup %735  ;;  %v288_v35 = vcombine.high %v280_v0, %v280_v0  ;;  %v295_v36 = vrot.slane %v280_v0, %v946_v29  ;;  %v269_v37 = vmul.f32 %v734_v30, %v910_v41 }
 0x158   : > { %v266_v39 = vmul.f32 %v736_v34, %v917_v50 }
 0x159   : > { %v302_v40 = vrot.slane %v288_v35, %v946_v29  ;;  %v303_v42 = vcombine.high %v295_v36, %v295_v36  ;;  %v660_v31 = vrot.slane %v295_v36, 9  ;;  %277 = vst [vmem:[%s941_s28 + $0x28] sm:$0xff] %v269_v37  ;;  %v282_v43 = vmax.f32 %v268_v33, %v269_v37 }
 0x15a   : > { %v738_v44 = vpop.eup %737  ;;  %274 = vst [vmem:[%s941_s28 + $0x10] sm:$0xff] %v266_v39 }
 0x15b   : > { %v740_v45 = vpop.eup %739  ;;  %v304_v46 = vcombine.high %v302_v40, %v302_v40  ;;  %v661_v47 = vrot.slane %v303_v42, 9  ;;  %v662_v48 = vrot.slane %v302_v40, 9  ;;  %v960_v49 = vmax.f32 %v295_v36, %v660_v31 }
 0x15c   : > { %v322_v41 = vcombine.high %v282_v43, %v282_v43  ;;  %v329_v52 = vrot.slane %v282_v43, %v946_v29  ;;  %v267_v50 = vmul.f32 %v738_v44, %v920_v51  ;;  %v270_v53 = vmul.f32 %v740_v45, %v927_v56 }
 0x15d   : > { %v663_v54 = vrot.slane %v304_v46, 9  ;;  %v965_v55 = vmax.f32 %v303_v42, %v661_v47  ;;  %v967_v58 = vmax.f32 %v302_v40, %v662_v48  ;;  %v455_v59 = vrot.slane %v960_v49, %v954_v38 }
 0x15e   : > { %v742_v60 = vpop.eup %741  ;;  %v336_v61 = vrot.slane %v322_v41, %v946_v29  ;;  %v337_v62 = vcombine.high %v329_v52, %v329_v52  ;;  %v668_v63 = vrot.slane %v329_v52, 9  ;;  %275 = vst [vmem:[%s941_s28 + $0x18] sm:$0xff] %v267_v50  ;;  %v281_v1 = vmax.f32 %v266_v39, %v267_v50  ;;  %278 = vst [vmem:[%s941_s28 + $0x30] sm:$0xff] %v270_v53 }
 0x15f   : > { %v974_v51 = vmax.f32 %v304_v46, %v663_v54  ;;  %v459_v56 = vrot.slane %v965_v55, %v954_v38  ;;  %v463_v2 = vrot.slane %v967_v58, %v954_v38  ;;  %v271_v4 = vmul.f32 %v742_v60, %v930_v57 }
 0x160   : > { %v338_v5 = vcombine.high %v336_v61, %v336_v61  ;;  %v669_v3 = vrot.slane %v337_v62, 9  ;;  %v670_v6 = vrot.slane %v336_v61, 9  ;;  %v428_v7 = vmax.f32 %v329_v52, %v668_v63 }
 0x161   : > { %v305_v8 = vcombine.high %v281_v1, %v281_v1  ;;  %v312_v9 = vrot.slane %v281_v1, %v946_v29  ;;  %279 = vst [vmem:[%s941_s28 + $0x38] sm:$0xff] %v271_v4  ;;  %v283_v10 = vmax.f32 %v270_v53, %v271_v4  ;;  %v467_v11 = vrot.slane %v974_v51, %v954_v38 }
 0x162   : > { %v671_v12 = vrot.slane %v338_v5, 9  ;;  %v429_v13 = vmax.f32 %v337_v62, %v669_v3  ;;  %v430_v14 = vmax.f32 %v336_v61, %v670_v6  ;;  %v487_v15 = vrot.slane %v428_v7, %v954_v38 }
 0x163   : > { %v319_v57 = vrot.slane %v305_v8, %v946_v29  ;;  %v320_v16 = vcombine.high %v312_v9, %v312_v9  ;;  %v664_v17 = vrot.slane %v312_v9, 9  ;;  %v339_v18 = vcombine.high %v283_v10, %v283_v10 }
 0x164   : > { %v431_v19 = vmax.f32 %v338_v5, %v671_v12  ;;  %v491_v20 = vrot.slane %v429_v13, %v954_v38  ;;  %v495_v21 = vrot.slane %v430_v14, %v954_v38  ;;  %v346_v22 = vrot.slane %v283_v10, %v946_v29 }
 0x165   : > { %v665_v23 = vrot.slane %v320_v16, 9  ;;  %v666_v24 = vrot.slane %v319_v57, 9  ;;  %v424_v25 = vmax.f32 %v312_v9, %v664_v17  ;;  %v353_v26 = vrot.slane %v339_v18, %v946_v29 }
 0x166   : > { %v354_v27 = vcombine.high %v346_v22, %v346_v22  ;;  %v672_v28 = vrot.slane %v346_v22, 9  ;;  %v321_v32 = vcombine.high %v319_v57, %v319_v57  ;;  %v499_v33 = vrot.slane %v431_v19, %v954_v38 }
 0x167   : > { %v425_v0 = vmax.f32 %v320_v16, %v665_v23  ;;  %v471_v30 = vrot.slane %v424_v25, %v954_v38  ;;  %v674_v34 = vrot.slane %v353_v26, 9  ;;  %v355_v35 = vcombine.high %v353_v26, %v353_v26 }
 0x168   : > { %v673_v36 = vrot.slane %v354_v27, 9  ;;  %v432_v37 = vmax.f32 %v346_v22, %v672_v28  ;;  %v667_v39 = vrot.slane %v321_v32, 9  ;;  %v426_v40 = vmax.f32 %v319_v57, %v666_v24 }
 0x169   : > { %v675_v42 = vrot.slane %v355_v35, 9  ;;  %v434_v29 = vmax.f32 %v353_v26, %v674_v34  ;;  %v475_v31 = vrot.slane %v425_v0, %v954_v38  ;;  %v517_v43 = vsel %vm516_vm1, %v459_v56, %v455_v59 }
 0x16a   : > { %v433_v44 = vmax.f32 %v354_v27, %v673_v36  ;;  %v503_v45 = vrot.slane %v432_v37, %v954_v38  ;;  %v427_v46 = vmax.f32 %v321_v32, %v667_v39  ;;  %v479_v47 = vrot.slane %v426_v40, %v954_v38 }
 0x16b   : > { %v435_v48 = vmax.f32 %v355_v35, %v675_v42  ;;  %v511_v49 = vrot.slane %v434_v29, %v954_v38  ;;  %v519_v41 = vsel %vm518_vm2, %v463_v2, %v517_v43  ;;  %v530_v52 = vsel %vm516_vm1, %v491_v20, %v487_v15 }
 0x16c   : > { %v483_v50 = vrot.slane %v427_v46, %v954_v38  ;;  %v507_v53 = vrot.slane %v433_v44, %v954_v38  ;;  %v521_v54 = vsel %vm520_vm3, %v467_v11, %v519_v41  ;;  %v531_v55 = vsel %vm518_vm2, %v495_v21, %v530_v52 }
 0x16d   : > { %v515_v58 = vrot.slane %v435_v48, %v954_v38  ;;  %v523_v59 = vsel %vm522_vm4, %v471_v30, %v521_v54  ;;  %v532_v60 = vsel %vm520_vm3, %v499_v33, %v531_v55 }
 0x16e   : > { %v525_v61 = vsel %vm524_vm5, %v475_v31, %v523_v59  ;;  %v533_v62 = vsel %vm522_vm4, %v503_v45, %v532_v60 }
 0x16f   : > { %v527_v63 = vsel %vm526_vm6, %v479_v47, %v525_v61  ;;  %v534_v1 = vsel %vm524_vm5, %v507_v53, %v533_v62 }
 0x170   : > { %v529_v38 = vsel %vm528_vm7, %v483_v50, %v527_v63  ;;  %v535_v51 = vsel %vm526_vm6, %v511_v49, %v534_v1 }
 0x171   : > { %v536_v56 = vsel %vm528_vm7, %v515_v58, %v535_v51  ;;  %539 = vst [vmem:[%s144_s4] sm:$0xff] %v529_v38 }
 0x172   : > { %540 = vst [vmem:[%s144_s4 + $0x8] sm:$0xff] %v536_v56 }
 0x173   : > { %756 = shalt.err (!%p753_p3)
}
 0x174   : > { %s757_s22 = scalar_lea.hbm %s1018_s8, 256  ;;  %s761_s25 = scalar_lea.hbm %s1068_s2, 512 }
 0x175   : > { %p758_p4 = scmp.ne.s32.totalorder %s1018_s8, %s757_s22  ;;  %p762_p9 = scmp.lt.u32.totalorder %s1018_s8, %s1068_s2 }
 0x176   : > { %p763_p10 = scmp.lt.u32.totalorder %s761_s25, %s757_s22  ;;  %p765_p12 = scmp.lt.u32.totalorder %s757_s22, %s1018_s8 }
 0x177   : > { %p759_p7 = pnand %p758_p4, %p865_p5 }
 0x178   : > { %p764_p11 = por %p763_p10, %p762_p9 }
 0x179   : > { %p760_p8 = pneg %p759_p7 }
 0x17a   : > { %p766_p13 = por %p765_p12, %p764_p11 }
 0x17c   : > { %p767_p0 = pnand %p766_p13, %p760_p8 }
 0x17e   : > { %770 = shalt.err (!%p767_p0)
}
 0x17f   : > { %s810_s28 = smov 128   ;;  %s811_s29 = smov 8  }
 0x180   : > { %684 = dma.vmem_to_hbm [thread:$0]  (%p865_p5), %s1020_s5, 256, %s1018_s8, %s1025_s13, %s810_s28, %s810_s28, %s811_s29  }
 0x181 PF: > { %p690_p1 = scmp.ge.s32.totalorder %s805_s12, 2  ;;  %s586_s30 = sand.u32 1, %s793_s9  }
 0x182   : > { %s587_s3 = scalar_lea.sflag [#allocation3], %s586_s30 }
 0x183   : > { %p687_p2 = pnand %p690_p1, %p869_p6 }
 0x185   : > { %788 = dma.done.wait (!%p687_p2), %s587_s3, 256  }
 0x186   : > { %790 = vsyncadd (!%p687_p2), %s587_s3, 4294967040  ;;  %p13_p3 = scmp.ge.s32.totalorder %s852_s15, 4   ;;  %s1071_s9 = smov %s797_s10 }
 0x187   : > { %s1072_s10 = smov %s801_s11  ;;  %s1073_s11 = smov %s863_s18 }
 0x188   : > { %s1074_s12 = smov %s852_s15  ;;  %15 = sbr.rel (!%p13_p3) target bundleno = 3 (0x3), region = 71 }
 0x18f   :  { %592 = vsyncpa [#allocation3], 1 }
 0x190   :  { %594 = vsyncpa [#allocation3 + $0x1], 1 }

</bundles_post_ra>
